<compile_context>
chip_gen: v7x
topology: tpu7x:2x2x1
jax: 0.10.0
libtpu: 0.0.40
codegen_flags: <defaults>
</compile_context>

<pallas_src>
import functools
import math

import jax
import jax.numpy as jnp
from jax import lax
from jax.experimental import pallas as pl
from jax.experimental.pallas import tpu as pltpu


_LN_EPS = 1e-5


def _round_up(a, b):
    return -(-a // b) * b


def _layernorm(x, gamma, beta):
    mu = jnp.mean(x, axis=-1, keepdims=True)
    xc = x - mu
    var = jnp.mean(xc * xc, axis=-1, keepdims=True)
    return xc * lax.rsqrt(var + _LN_EPS) * gamma + beta


def _gelu_exact(x):
    return 0.5 * x * (1.0 + lax.erf(x * 0.7071067811865476))


# Row indices inside the packed small-parameter array.
_BPE, _BV, _BO, _G1, _BE1, _B1, _B2, _G2, _BE2, _BF1, _BF2 = range(11)


def vit_batched_kernel(
    x_ref,      # (R, T)    f32  streamed row tile (R = samples_per_tile * C)
    pos_ref,    # (R, E)    f32  position embedding tiled over one row tile (resident)
    small_ref,  # (11, W)   f32  all biases / LN params packed into one array (resident)
    wpe_ref,    # (T, E)    bf16 patch embedding, pre-transposed (resident)
    wv_ref,     # (E, E)    bf16 attention value projection (resident)
    wo_ref,     # (E, E)    bf16 attention output projection (resident)
    w1_ref,     # (E, F)    bf16 FFN linear1 (resident)
    w2_ref,     # (F, E)    bf16 FFN linear2 (resident)
    wf1_ref,    # (E, HP)   bf16 fc_1, hidden zero-padded to HP (resident)
    wf2_ref,    # (HP, KP)  bf16 fc_2, classes zero-padded to KP (resident)
    o_ref,      # (R, KP)   f32  streamed output tile (softmax probs; padded lanes = 0)
    *,
    n_classes: int,
):
    f32 = jnp.float32
    E = wv_ref.shape[0]
    F = w1_ref.shape[1]
    HP = wf1_ref.shape[1]
    KP = wf2_ref.shape[1]

    # TODO(synk): on real TPU HW the MXU takes the bf16 weights directly; the
    # interpret/CPU dot thunk does not support BF16xBF16=F32, so upcast to f32
    # (bf16 *storage* still halves the HBM weight bytes, which is what matters here).
    def mm(a, w_ref, bias_row, width):
        b = small_ref[bias_row:bias_row + 1, :width]
        return jnp.dot(a, w_ref[...].astype(f32), preferred_element_type=f32) + b

    x = x_ref[...]                                                   # (R, T) f32

    # ---- patch embedding + position embedding ------------------------------
    h = mm(x, wpe_ref, _BPE, E) + pos_ref[...]                       # (R, E)

    # ---- TransformerEncoderLayer (post-LN, eval-mode dropout == identity) --
    # S == 1  =>  softmax(q k^T / sqrt(hd)) == 1  =>  MHA(x,x,x) == out_proj(v_proj(x)).
    attn = mm(mm(h, wv_ref, _BV, E), wo_ref, _BO, E)                 # (R, E)
    x1 = _layernorm(h + attn, small_ref[_G1:_G1 + 1, :E], small_ref[_BE1:_BE1 + 1, :E])

    ff = jnp.maximum(mm(x1, w1_ref, _B1, F), 0.0)                    # ReLU (PyTorch default)
    ff = mm(ff, w2_ref, _B2, E)
    x2 = _layernorm(x1 + ff, small_ref[_G2:_G2 + 1, :E], small_ref[_BE2:_BE2 + 1, :E])

    # ---- AvgPool1d(1) is the identity.  Lane-padded classification head ----
    z = _gelu_exact(mm(x2, wf1_ref, _BF1, HP))                       # (R, HP)
    logits = mm(z, wf2_ref, _BF2, KP)                                # (R, KP)

    # softmax over the real classes only; padded lanes get probability 0
    col = lax.broadcasted_iota(jnp.int32, logits.shape, 1)
    logits = jnp.where(col < n_classes, logits, -jnp.inf)
    logits = logits - jnp.max(logits, axis=-1, keepdims=True)
    p = jnp.exp(logits)
    o_ref[...] = (p / jnp.sum(p, axis=-1, keepdims=True)).astype(o_ref.dtype)


def transformer_forward(x, params, *, n_classes=3, rows_per_tile=256):
    """Batched forward of the PyTorch `transformer` module.

    x: (B, T, P) float32 (a single (T, P) sample is also accepted).
    Returns (B, C, n_classes) softmax probabilities — the module's per-sample
    (1, C, 3) output stacked over the batch.
    """
    if x.ndim == 2:
        x = x[None]
    B, T, P = x.shape
    C, E = params["pos"].shape
    assert P == C, "position_embedding broadcast requires P == channel"
    assert params["wpe"].shape == (T, E)
    F = params["w1"].shape[1]
    HP = params["wf1"].shape[1]
    KP = params["wf2"].shape[1]

    # ---- row tile: whole samples per tile, sublane (8) aligned, v7x-safe cap ----
    unit = 8 // math.gcd(C, 8)            # smallest samples-per-tile step keeping R % 8 == 0
    spt = max(unit, (min(rows_per_tile, B * C) // C) // unit * unit)  # samples per tile
    R = spt * C                                                        # rows per grid step
    Bp = _round_up(B, spt)
    if Bp != B:
        x = jnp.concatenate([x, jnp.zeros((Bp - B, T, P), x.dtype)], axis=0)
    n_tiles = (Bp * C) // R

    # The module's per-sample x.permute(1, 0): (T, P) -> (C, T), stacked over the batch.
    rows = jnp.transpose(x, (0, 2, 1)).reshape(Bp * C, T).astype(jnp.float32)

    # Position embedding repeated for exactly one row tile (VMEM-resident across the grid;
    # every tile holds whole samples so the per-row channel pattern is identical per tile).
    pos_tile = jnp.tile(params["pos"].astype(jnp.float32), (spt, 1))   # (R, E)

    kernel = functools.partial(vit_batched_kernel, n_classes=n_classes)

    resident = lambda i: (0, 0)   # weights / packed params: fetched once, stay in VMEM
    streamed = lambda i: (i, 0)   # input / output rows: one tile per grid step

    flops = 2 * Bp * C * (T * E + 2 * E * E + 2 * E * F + E * HP + HP * KP)
    bytes_accessed = (
        rows.size * 4 + pos_tile.size * 4 + params["small"].size * 4
        + sum(params[k].size * jnp.dtype(params[k].dtype).itemsize
              for k in ("wpe", "wv", "wo", "w1", "w2", "wf1", "wf2"))
        + Bp * C * KP * 4)
    cost = pl.CostEstimate(flops=int(flops),
                           transcendentals=int(Bp * C * (HP + KP)),
                           bytes_accessed=int(bytes_accessed))

    out = pl.pallas_call(
        kernel,
        out_shape=jax.ShapeDtypeStruct((Bp * C, KP), jnp.float32),
        grid=(n_tiles,),
        in_specs=[
            pl.BlockSpec((R, T), streamed),               # x rows
            pl.BlockSpec((R, E), resident),               # tiled position embedding
            pl.BlockSpec(params["small"].shape, resident),
            pl.BlockSpec((T, E), resident),               # wpe
            pl.BlockSpec((E, E), resident),               # wv
            pl.BlockSpec((E, E), resident),               # wo
            pl.BlockSpec((E, F), resident),               # w1
            pl.BlockSpec((F, E), resident),               # w2
            pl.BlockSpec((E, HP), resident),              # wf1
            pl.BlockSpec((HP, KP), resident),             # wf2
        ],
        out_specs=pl.BlockSpec((R, KP), streamed),
        compiler_params=pltpu.CompilerParams(
            dimension_semantics=("parallel",)),           # shards row tiles across v7x's 2 TCs
        cost_estimate=cost,
    )(rows, pos_tile, params["small"],
      params["wpe"], params["wv"], params["wo"],
      params["w1"], params["w2"], params["wf1"], params["wf2"])

    return out[: B * C, :n_classes].reshape(B, C, n_classes)


def init_params(key, *, timewin, channel, embed_dim, ffn_dim,
                hidden=64, n_classes=3, weight_dtype=jnp.bfloat16):
    """Parameters mirroring the PyTorch module.

    Big matmul weights are pre-transposed (y = x @ W) and stored bf16 (halved HBM
    footprint; f32 compute in-kernel).  All biases / LayerNorm params are packed into
    one small f32 array (params["small"]) -> one tiny DMA instead of ~12.  fc_1/fc_2
    are zero-padded to lane width (exact: GELU(0)=0, padded wf2 rows are 0).
    q/k projections of nn.MultiheadAttention are mathematically dead for seq_len == 1
    and are not created; cls_token exists on the module but is never used in forward().
    """
    E, F, T, C = embed_dim, ffn_dim, timewin, channel
    HP = _round_up(hidden, 128)
    KP = _round_up(n_classes, 128)
    W = max(E, F, HP, KP)
    ks = jax.random.split(key, 20)
    f32 = jnp.float32

    def w(k, shape):
        return (0.02 * jax.random.normal(k, shape, f32)).astype(weight_dtype)

    def vec(k, n):
        return 0.02 * jax.random.normal(k, (n,), f32)

    wf1 = jnp.pad(0.02 * jax.random.normal(ks[6], (E, hidden), f32),
                  ((0, 0), (0, HP - hidden))).astype(weight_dtype)
    wf2 = (jnp.zeros((HP, KP), f32)
           .at[:hidden, :n_classes]
           .set(0.02 * jax.random.normal(ks[7], (hidden, n_classes), f32))
           .astype(weight_dtype))

    def row(v):
        v = jnp.asarray(v, f32).reshape(-1)
        return jnp.pad(v, (0, W - v.shape[0]))

    small = jnp.stack([
        row(vec(ks[8], E)),                                   # bpe
        row(vec(ks[9], E)),                                   # bv
        row(vec(ks[10], E)),                                  # bo
        row(jnp.ones((E,), f32)),                             # layernorm1 gamma
        row(vec(ks[11], E)),                                  # layernorm1 beta
        row(vec(ks[12], F)),                                  # b1
        row(vec(ks[13], E)),                                  # b2
        row(jnp.ones((E,), f32)),                             # layernorm2 gamma
        row(vec(ks[14], E)),                                  # layernorm2 beta
        row(jnp.pad(vec(ks[15], hidden), (0, HP - hidden))),  # bf1 (padding stays 0)
        row(jnp.pad(vec(ks[16], n_classes), (0, KP - n_classes))),  # bf2 (padding stays 0)
    ])

    return {
        "pos": jax.random.normal(ks[1], (C, E), f32),
        "small": small,
        "wpe": w(ks[0], (T, E)),
        "wv": w(ks[2], (E, E)),
        "wo": w(ks[3], (E, E)),
        "w1": w(ks[4], (E, F)),
        "w2": w(ks[5], (F, E)),
        "wf1": wf1,
        "wf2": wf2,
    }


def _reference_forward(x, params, n_classes=3):
    """Pure-JAX reference with identical math (bf16-stored weights upcast to f32)."""
    C, E = params["pos"].shape
    F = params["w1"].shape[1]
    HP = params["wf1"].shape[1]
    KP = params["wf2"].shape[1]
    s = params["small"]
    f32 = jnp.float32

    def mm(a, w, r, width):
        return a @ w.astype(f32) + s[r, :width]

    def ln(a, g, b):
        mu = a.mean(-1, keepdims=True)
        xc = a - mu
        var = (xc * xc).mean(-1, keepdims=True)
        return xc * lax.rsqrt(var + _LN_EPS) * g + b

    outs = []
    for i in range(x.shape[0]):
        xi = x[i].T.astype(f32)                                          # (C, T)
        h = mm(xi, params["wpe"], _BPE, E) + params["pos"]
        attn = mm(mm(h, params["wv"], _BV, E), params["wo"], _BO, E)
        x1 = ln(h + attn, s[_G1, :E], s[_BE1, :E])
        ff = jnp.maximum(mm(x1, params["w1"], _B1, F), 0.0)
        ff = mm(ff, params["w2"], _B2, E)
        x2 = ln(x1 + ff, s[_G2, :E], s[_BE2, :E])
        z = _gelu_exact(mm(x2, params["wf1"], _BF1, HP))
        logits = mm(z, params["wf2"], _BF2, KP)[:, :n_classes]
        outs.append(jax.nn.softmax(logits, axis=-1))
    return jnp.stack(outs)


if __name__ == "__main__":
    # Small config consistent with the module (real defaults: channel=20, embed_dim=256,
    # timewin=225, dim_feedforward=2048, head 64 -> 3).  Lane-dense E/F; batch of
    # samples so the grid/weight-residency/megacore path is exercised (48 samples pad
    # to 64 -> 2 row tiles of 256 rows).
    B, T, C, E, F = 48, 64, 8, 128, 256
    key = jax.random.PRNGKey(0)
    kx, kp = jax.random.split(key)
    x = jax.random.normal(kx, (B, T, C), dtype=jnp.float32)   # batch of (T, P) module inputs
    params = init_params(kp, timewin=T, channel=C, embed_dim=E, ffn_dim=F)

    y = jax.jit(transformer_forward)(x, params)
    jax.block_until_ready(y)

    assert y.shape == (B, C, 3)
    assert bool(jnp.all(jnp.isfinite(y)))
    assert bool(jnp.allclose(jnp.sum(y, axis=-1), 1.0, atol=1e-3))       # rows are softmax probs
    y_ref = _reference_forward(x, params)
    assert bool(jnp.allclose(y, y_ref, atol=2e-3, rtol=2e-3))
    print("KERNEL_OK")
</pallas_src>

<mosaic_0001>
module attributes {stable_mosaic.version = 11 : i64} {
  func.func @vit_batched_kernel(%arg0: i32, %arg1: memref<256x64xf32, #tpu.memory_space<vmem>>, %arg2: memref<256x128xf32, #tpu.memory_space<vmem>>, %arg3: memref<11x256xf32, #tpu.memory_space<vmem>>, %arg4: memref<64x128xbf16, #tpu.memory_space<vmem>>, %arg5: memref<128x128xbf16, #tpu.memory_space<vmem>>, %arg6: memref<128x128xbf16, #tpu.memory_space<vmem>>, %arg7: memref<128x256xbf16, #tpu.memory_space<vmem>>, %arg8: memref<256x128xbf16, #tpu.memory_space<vmem>>, %arg9: memref<128x128xbf16, #tpu.memory_space<vmem>>, %arg10: memref<128x128xbf16, #tpu.memory_space<vmem>>, %arg11: memref<256x128xf32, #tpu.memory_space<vmem>>) attributes {dimension_semantics = [#tpu.dimension_semantics<parallel>], iteration_bounds = array<i64: 2>, scalar_prefetch = 0 : i64, scratch_operands = 0 : i64, tpu.core_type = #tpu.core_type<tc>, window_params = [{transform_indices = @transform_0, window_bounds = array<i64: 256, 64>}, {pipeline_mode = #tpu.pipeline_mode<synchronous>, transform_indices = @transform_1, window_bounds = array<i64: 256, 128>}, {pipeline_mode = #tpu.pipeline_mode<synchronous>, transform_indices = @transform_2, window_bounds = array<i64: 11, 256>}, {pipeline_mode = #tpu.pipeline_mode<synchronous>, transform_indices = @transform_3, window_bounds = array<i64: 64, 128>}, {pipeline_mode = #tpu.pipeline_mode<synchronous>, transform_indices = @transform_4, window_bounds = array<i64: 128, 128>}, {pipeline_mode = #tpu.pipeline_mode<synchronous>, transform_indices = @transform_5, window_bounds = array<i64: 128, 128>}, {pipeline_mode = #tpu.pipeline_mode<synchronous>, transform_indices = @transform_6, window_bounds = array<i64: 128, 256>}, {pipeline_mode = #tpu.pipeline_mode<synchronous>, transform_indices = @transform_7, window_bounds = array<i64: 256, 128>}, {pipeline_mode = #tpu.pipeline_mode<synchronous>, transform_indices = @transform_8, window_bounds = array<i64: 128, 128>}, {pipeline_mode = #tpu.pipeline_mode<synchronous>, transform_indices = @transform_9, window_bounds = array<i64: 128, 128>}, {transform_indices = @transform_10, window_bounds = array<i64: 256, 128>}]} {
    %c0 = arith.constant 0 : index
    %c0_0 = arith.constant 0 : index
    %0 = vector.load %arg1[%c0, %c0_0] : memref<256x64xf32, #tpu.memory_space<vmem>>, vector<256x64xf32>
    %c0_1 = arith.constant 0 : index
    %c0_2 = arith.constant 0 : index
    %1 = vector.load %arg3[%c0_1, %c0_2] : memref<11x256xf32, #tpu.memory_space<vmem>>, vector<1x128xf32>
    %c0_3 = arith.constant 0 : index
    %c0_4 = arith.constant 0 : index
    %2 = vector.load %arg4[%c0_3, %c0_4] : memref<64x128xbf16, #tpu.memory_space<vmem>>, vector<64x128xbf16>
    %3 = arith.extf %2 : vector<64x128xbf16> to vector<64x128xf32>
    %cst = arith.constant dense<0.000000e+00> : vector<256x128xf32>
    %4 = tpu.matmul %0, %3, %cst {dimension_numbers = #tpu.dot_dimension_numbers<[1], [0], [0], [1], [0, 0, 1, 1], [], []>} : vector<256x64xf32>, vector<64x128xf32>, vector<256x128xf32> -> vector<256x128xf32>
    %5 = vector.broadcast %1 : vector<1x128xf32> to vector<256x128xf32>
    %6 = arith.addf %4, %5 : vector<256x128xf32>
    %c0_5 = arith.constant 0 : index
    %c0_6 = arith.constant 0 : index
    %7 = vector.load %arg2[%c0_5, %c0_6] : memref<256x128xf32, #tpu.memory_space<vmem>>, vector<256x128xf32>
    %8 = arith.addf %6, %7 : vector<256x128xf32>
    %c1 = arith.constant 1 : index
    %c0_7 = arith.constant 0 : index
    %9 = vector.load %arg3[%c1, %c0_7] : memref<11x256xf32, #tpu.memory_space<vmem>>, vector<1x128xf32>
    %c0_8 = arith.constant 0 : index
    %c0_9 = arith.constant 0 : index
    %10 = vector.load %arg5[%c0_8, %c0_9] : memref<128x128xbf16, #tpu.memory_space<vmem>>, vector<128x128xbf16>
    %11 = arith.extf %10 : vector<128x128xbf16> to vector<128x128xf32>
    %cst_10 = arith.constant dense<0.000000e+00> : vector<256x128xf32>
    %12 = tpu.matmul %8, %11, %cst_10 {dimension_numbers = #tpu.dot_dimension_numbers<[1], [0], [0], [1], [0, 0, 1, 1], [], []>} : vector<256x128xf32>, vector<128x128xf32>, vector<256x128xf32> -> vector<256x128xf32>
    %13 = vector.broadcast %9 : vector<1x128xf32> to vector<256x128xf32>
    %14 = arith.addf %12, %13 : vector<256x128xf32>
    %c2 = arith.constant 2 : index
    %c0_11 = arith.constant 0 : index
    %15 = vector.load %arg3[%c2, %c0_11] : memref<11x256xf32, #tpu.memory_space<vmem>>, vector<1x128xf32>
    %c0_12 = arith.constant 0 : index
    %c0_13 = arith.constant 0 : index
    %16 = vector.load %arg6[%c0_12, %c0_13] : memref<128x128xbf16, #tpu.memory_space<vmem>>, vector<128x128xbf16>
    %17 = arith.extf %16 : vector<128x128xbf16> to vector<128x128xf32>
    %cst_14 = arith.constant dense<0.000000e+00> : vector<256x128xf32>
    %18 = tpu.matmul %14, %17, %cst_14 {dimension_numbers = #tpu.dot_dimension_numbers<[1], [0], [0], [1], [0, 0, 1, 1], [], []>} : vector<256x128xf32>, vector<128x128xf32>, vector<256x128xf32> -> vector<256x128xf32>
    %19 = vector.broadcast %15 : vector<1x128xf32> to vector<256x128xf32>
    %20 = arith.addf %18, %19 : vector<256x128xf32>
    %21 = arith.addf %8, %20 : vector<256x128xf32>
    %c3 = arith.constant 3 : index
    %c0_15 = arith.constant 0 : index
    %22 = vector.load %arg3[%c3, %c0_15] : memref<11x256xf32, #tpu.memory_space<vmem>>, vector<1x128xf32>
    %c4 = arith.constant 4 : index
    %c0_16 = arith.constant 0 : index
    %23 = vector.load %arg3[%c4, %c0_16] : memref<11x256xf32, #tpu.memory_space<vmem>>, vector<1x128xf32>
    %cst_17 = arith.constant dense<0.000000e+00> : vector<256xf32>
    %24 = vector.multi_reduction <add>, %21, %cst_17 [1] : vector<256x128xf32> to vector<256xf32>
    %25 = vector.shape_cast %24 : vector<256xf32> to vector<256x1xf32>
    %cst_18 = arith.constant 1.280000e+02 : f32
    %26 = vector.broadcast %cst_18 : f32 to vector<256x1xf32>
    %27 = arith.divf %25, %26 : vector<256x1xf32>
    %28 = vector.broadcast %27 : vector<256x1xf32> to vector<256x128xf32>
    %29 = arith.subf %21, %28 : vector<256x128xf32>
    %30 = arith.mulf %29, %29 : vector<256x128xf32>
    %cst_19 = arith.constant dense<0.000000e+00> : vector<256xf32>
    %31 = vector.multi_reduction <add>, %30, %cst_19 [1] : vector<256x128xf32> to vector<256xf32>
    %32 = vector.shape_cast %31 : vector<256xf32> to vector<256x1xf32>
    %cst_20 = arith.constant 1.280000e+02 : f32
    %33 = vector.broadcast %cst_20 : f32 to vector<256x1xf32>
    %34 = arith.divf %32, %33 : vector<256x1xf32>
    %cst_21 = arith.constant 9.99999974E-6 : f32
    %35 = vector.broadcast %cst_21 : f32 to vector<256x1xf32>
    %36 = arith.addf %34, %35 : vector<256x1xf32>
    %37 = math.rsqrt %36 : vector<256x1xf32>
    %38 = vector.broadcast %37 : vector<256x1xf32> to vector<256x128xf32>
    %39 = arith.mulf %29, %38 : vector<256x128xf32>
    %40 = vector.broadcast %22 : vector<1x128xf32> to vector<256x128xf32>
    %41 = arith.mulf %39, %40 : vector<256x128xf32>
    %42 = vector.broadcast %23 : vector<1x128xf32> to vector<256x128xf32>
    %43 = arith.addf %41, %42 : vector<256x128xf32>
    %c5 = arith.constant 5 : index
    %c0_22 = arith.constant 0 : index
    %44 = vector.load %arg3[%c5, %c0_22] : memref<11x256xf32, #tpu.memory_space<vmem>>, vector<1x256xf32>
    %c0_23 = arith.constant 0 : index
    %c0_24 = arith.constant 0 : index
    %45 = vector.load %arg7[%c0_23, %c0_24] : memref<128x256xbf16, #tpu.memory_space<vmem>>, vector<128x256xbf16>
    %46 = arith.extf %45 : vector<128x256xbf16> to vector<128x256xf32>
    %cst_25 = arith.constant dense<0.000000e+00> : vector<256x256xf32>
    %47 = tpu.matmul %43, %46, %cst_25 {dimension_numbers = #tpu.dot_dimension_numbers<[1], [0], [0], [1], [0, 0, 1, 1], [], []>} : vector<256x128xf32>, vector<128x256xf32>, vector<256x256xf32> -> vector<256x256xf32>
    %48 = vector.broadcast %44 : vector<1x256xf32> to vector<256x256xf32>
    %49 = arith.addf %47, %48 : vector<256x256xf32>
    %cst_26 = arith.constant 0.000000e+00 : f32
    %50 = vector.broadcast %cst_26 : f32 to vector<256x256xf32>
    %51 = arith.maximumf %49, %50 : vector<256x256xf32>
    %c6 = arith.constant 6 : index
    %c0_27 = arith.constant 0 : index
    %52 = vector.load %arg3[%c6, %c0_27] : memref<11x256xf32, #tpu.memory_space<vmem>>, vector<1x128xf32>
    %c0_28 = arith.constant 0 : index
    %c0_29 = arith.constant 0 : index
    %53 = vector.load %arg8[%c0_28, %c0_29] : memref<256x128xbf16, #tpu.memory_space<vmem>>, vector<256x128xbf16>
    %54 = arith.extf %53 : vector<256x128xbf16> to vector<256x128xf32>
    %cst_30 = arith.constant dense<0.000000e+00> : vector<256x128xf32>
    %55 = tpu.matmul %51, %54, %cst_30 {dimension_numbers = #tpu.dot_dimension_numbers<[1], [0], [0], [1], [0, 0, 1, 1], [], []>} : vector<256x256xf32>, vector<256x128xf32>, vector<256x128xf32> -> vector<256x128xf32>
    %56 = vector.broadcast %52 : vector<1x128xf32> to vector<256x128xf32>
    %57 = arith.addf %55, %56 : vector<256x128xf32>
    %58 = arith.addf %43, %57 : vector<256x128xf32>
    %c7 = arith.constant 7 : index
    %c0_31 = arith.constant 0 : index
    %59 = vector.load %arg3[%c7, %c0_31] : memref<11x256xf32, #tpu.memory_space<vmem>>, vector<1x128xf32>
    %c8 = arith.constant 8 : index
    %c0_32 = arith.constant 0 : index
    %60 = vector.load %arg3[%c8, %c0_32] : memref<11x256xf32, #tpu.memory_space<vmem>>, vector<1x128xf32>
    %cst_33 = arith.constant dense<0.000000e+00> : vector<256xf32>
    %61 = vector.multi_reduction <add>, %58, %cst_33 [1] : vector<256x128xf32> to vector<256xf32>
    %62 = vector.shape_cast %61 : vector<256xf32> to vector<256x1xf32>
    %cst_34 = arith.constant 1.280000e+02 : f32
    %63 = vector.broadcast %cst_34 : f32 to vector<256x1xf32>
    %64 = arith.divf %62, %63 : vector<256x1xf32>
    %65 = vector.broadcast %64 : vector<256x1xf32> to vector<256x128xf32>
    %66 = arith.subf %58, %65 : vector<256x128xf32>
    %67 = arith.mulf %66, %66 : vector<256x128xf32>
    %cst_35 = arith.constant dense<0.000000e+00> : vector<256xf32>
    %68 = vector.multi_reduction <add>, %67, %cst_35 [1] : vector<256x128xf32> to vector<256xf32>
    %69 = vector.shape_cast %68 : vector<256xf32> to vector<256x1xf32>
    %cst_36 = arith.constant 1.280000e+02 : f32
    %70 = vector.broadcast %cst_36 : f32 to vector<256x1xf32>
    %71 = arith.divf %69, %70 : vector<256x1xf32>
    %cst_37 = arith.constant 9.99999974E-6 : f32
    %72 = vector.broadcast %cst_37 : f32 to vector<256x1xf32>
    %73 = arith.addf %71, %72 : vector<256x1xf32>
    %74 = math.rsqrt %73 : vector<256x1xf32>
    %75 = vector.broadcast %74 : vector<256x1xf32> to vector<256x128xf32>
    %76 = arith.mulf %66, %75 : vector<256x128xf32>
    %77 = vector.broadcast %59 : vector<1x128xf32> to vector<256x128xf32>
    %78 = arith.mulf %76, %77 : vector<256x128xf32>
    %79 = vector.broadcast %60 : vector<1x128xf32> to vector<256x128xf32>
    %80 = arith.addf %78, %79 : vector<256x128xf32>
    %c9 = arith.constant 9 : index
    %c0_38 = arith.constant 0 : index
    %81 = vector.load %arg3[%c9, %c0_38] : memref<11x256xf32, #tpu.memory_space<vmem>>, vector<1x128xf32>
    %c0_39 = arith.constant 0 : index
    %c0_40 = arith.constant 0 : index
    %82 = vector.load %arg9[%c0_39, %c0_40] : memref<128x128xbf16, #tpu.memory_space<vmem>>, vector<128x128xbf16>
    %83 = arith.extf %82 : vector<128x128xbf16> to vector<128x128xf32>
    %cst_41 = arith.constant dense<0.000000e+00> : vector<256x128xf32>
    %84 = tpu.matmul %80, %83, %cst_41 {dimension_numbers = #tpu.dot_dimension_numbers<[1], [0], [0], [1], [0, 0, 1, 1], [], []>} : vector<256x128xf32>, vector<128x128xf32>, vector<256x128xf32> -> vector<256x128xf32>
    %85 = vector.broadcast %81 : vector<1x128xf32> to vector<256x128xf32>
    %86 = arith.addf %84, %85 : vector<256x128xf32>
    %cst_42 = arith.constant 5.000000e-01 : f32
    %87 = vector.broadcast %cst_42 : f32 to vector<256x128xf32>
    %88 = arith.mulf %87, %86 : vector<256x128xf32>
    %cst_43 = arith.constant 0.707106769 : f32
    %89 = vector.broadcast %cst_43 : f32 to vector<256x128xf32>
    %90 = arith.mulf %86, %89 : vector<256x128xf32>
    %91 = math.erf %90 : vector<256x128xf32>
    %cst_44 = arith.constant 1.000000e+00 : f32
    %92 = vector.broadcast %cst_44 : f32 to vector<256x128xf32>
    %93 = arith.addf %92, %91 : vector<256x128xf32>
    %94 = arith.mulf %88, %93 : vector<256x128xf32>
    %c10 = arith.constant 10 : index
    %c0_45 = arith.constant 0 : index
    %95 = vector.load %arg3[%c10, %c0_45] : memref<11x256xf32, #tpu.memory_space<vmem>>, vector<1x128xf32>
    %c0_46 = arith.constant 0 : index
    %c0_47 = arith.constant 0 : index
    %96 = vector.load %arg10[%c0_46, %c0_47] : memref<128x128xbf16, #tpu.memory_space<vmem>>, vector<128x128xbf16>
    %97 = arith.extf %96 : vector<128x128xbf16> to vector<128x128xf32>
    %cst_48 = arith.constant dense<0.000000e+00> : vector<256x128xf32>
    %98 = tpu.matmul %94, %97, %cst_48 {dimension_numbers = #tpu.dot_dimension_numbers<[1], [0], [0], [1], [0, 0, 1, 1], [], []>} : vector<256x128xf32>, vector<128x128xf32>, vector<256x128xf32> -> vector<256x128xf32>
    %99 = vector.broadcast %95 : vector<1x128xf32> to vector<256x128xf32>
    %100 = arith.addf %98, %99 : vector<256x128xf32>
    %101 = tpu.iota {dimensions = array<i32: 1>} : vector<256x128xi32>
    %c3_i32 = arith.constant 3 : i32
    %102 = vector.broadcast %c3_i32 : i32 to vector<256x128xi32>
    %103 = arith.cmpi slt, %101, %102 : vector<256x128xi32>
    %cst_49 = arith.constant 0xFF800000 : f32
    %104 = vector.broadcast %cst_49 : f32 to vector<256x128xf32>
    %105 = arith.select %103, %100, %104 : vector<256x128xi1>, vector<256x128xf32>
    %cst_50 = arith.constant dense<0xFF800000> : vector<256xf32>
    %106 = vector.multi_reduction <maximumf>, %105, %cst_50 [1] : vector<256x128xf32> to vector<256xf32>
    %107 = vector.shape_cast %106 : vector<256xf32> to vector<256x1xf32>
    %108 = vector.broadcast %107 : vector<256x1xf32> to vector<256x128xf32>
    %109 = arith.subf %105, %108 : vector<256x128xf32>
    %110 = math.exp %109 : vector<256x128xf32>
    %cst_51 = arith.constant dense<0.000000e+00> : vector<256xf32>
    %111 = vector.multi_reduction <add>, %110, %cst_51 [1] : vector<256x128xf32> to vector<256xf32>
    %112 = vector.shape_cast %111 : vector<256xf32> to vector<256x1xf32>
    %113 = vector.broadcast %112 : vector<256x1xf32> to vector<256x128xf32>
    %114 = arith.divf %110, %113 : vector<256x128xf32>
    %c0_52 = arith.constant 0 : index
    %c0_53 = arith.constant 0 : index
    %115 = vector.load %arg11[%c0_52, %c0_53] : memref<256x128xf32, #tpu.memory_space<vmem>>, vector<256x128xf32>
    tpu.vector_store %arg11[%c0_52, %c0_53], %114 {strides = array<i32>} : memref<256x128xf32, #tpu.memory_space<vmem>>, vector<256x128xf32>,
    return
  }
  func.func @transform_0(%arg0: i32) -> (i32, i32) {
    %c0_i32 = arith.constant 0 : i32
    %c0_i32_0 = arith.constant 0 : i32
    return %arg0, %c0_i32 : i32, i32
  }
  func.func @transform_1(%arg0: i32) -> (i32, i32) {
    %c0_i32 = arith.constant 0 : i32
    %c0_i32_0 = arith.constant 0 : i32
    %c0_i32_1 = arith.constant 0 : i32
    return %c0_i32, %c0_i32_0 : i32, i32
  }
  func.func @transform_2(%arg0: i32) -> (i32, i32) {
    %c0_i32 = arith.constant 0 : i32
    %c0_i32_0 = arith.constant 0 : i32
    %c0_i32_1 = arith.constant 0 : i32
    return %c0_i32, %c0_i32_0 : i32, i32
  }
  func.func @transform_3(%arg0: i32) -> (i32, i32) {
    %c0_i32 = arith.constant 0 : i32
    %c0_i32_0 = arith.constant 0 : i32
    %c0_i32_1 = arith.constant 0 : i32
    return %c0_i32, %c0_i32_0 : i32, i32
  }
  func.func @transform_4(%arg0: i32) -> (i32, i32) {
    %c0_i32 = arith.constant 0 : i32
    %c0_i32_0 = arith.constant 0 : i32
    %c0_i32_1 = arith.constant 0 : i32
    return %c0_i32, %c0_i32_0 : i32, i32
  }
  func.func @transform_5(%arg0: i32) -> (i32, i32) {
    %c0_i32 = arith.constant 0 : i32
    %c0_i32_0 = arith.constant 0 : i32
    %c0_i32_1 = arith.constant 0 : i32
    return %c0_i32, %c0_i32_0 : i32, i32
  }
  func.func @transform_6(%arg0: i32) -> (i32, i32) {
    %c0_i32 = arith.constant 0 : i32
    %c0_i32_0 = arith.constant 0 : i32
    %c0_i32_1 = arith.constant 0 : i32
    return %c0_i32, %c0_i32_0 : i32, i32
  }
  func.func @transform_7(%arg0: i32) -> (i32, i32) {
    %c0_i32 = arith.constant 0 : i32
    %c0_i32_0 = arith.constant 0 : i32
    %c0_i32_1 = arith.constant 0 : i32
    return %c0_i32, %c0_i32_0 : i32, i32
  }
  func.func @transform_8(%arg0: i32) -> (i32, i32) {
    %c0_i32 = arith.constant 0 : i32
    %c0_i32_0 = arith.constant 0 : i32
    %c0_i32_1 = arith.constant 0 : i32
    return %c0_i32, %c0_i32_0 : i32, i32
  }
  func.func @transform_9(%arg0: i32) -> (i32, i32) {
    %c0_i32 = arith.constant 0 : i32
    %c0_i32_0 = arith.constant 0 : i32
    %c0_i32_1 = arith.constant 0 : i32
    return %c0_i32, %c0_i32_0 : i32, i32
  }
  func.func @transform_10(%arg0: i32) -> (i32, i32) {
    %c0_i32 = arith.constant 0 : i32
    %c0_i32_0 = arith.constant 0 : i32
    return %arg0, %c0_i32 : i32, i32
  }
}

</mosaic_0001>

<bundles_post_ra>
// kernel: transformer_forward.1
= control target key start
LH: loop header
LB: loop body
LE: loop exit
PB: predicated region body
PF: predicated region fallthrough
CT: control target
= control target key end

     0   :  { %s5555_s13 = smov 0   ;;  %s7670_s0 = inlined_call_operand.vmem [shape: f32[512,64], index: 0, kind: input, shape index: {}]   ;;  %s7671_s1 = inlined_call_operand.vmem [shape: f32[256,128], index: 1, kind: input, shape index: {}]   ;;  %s7672_s2 = inlined_call_operand.vmem [shape: f32[11,256], index: 2, kind: input, shape index: {}]   ;;  %s7673_s3 = inlined_call_operand.vmem [shape: bf16[64,128], index: 3, kind: input, shape index: {}]   ;;  %s7674_s4 = inlined_call_operand.vmem [shape: bf16[128,128], index: 4, kind: input, shape index: {}]   ;;  %s7675_s5 = inlined_call_operand.vmem [shape: bf16[128,128], index: 5, kind: input, shape index: {}]   ;;  %s7676_s6 = inlined_call_operand.vmem [shape: bf16[128,256], index: 6, kind: input, shape index: {}]   ;;  %s7677_s7 = inlined_call_operand.vmem [shape: bf16[256,128], index: 7, kind: input, shape index: {}]   ;;  %s7678_s8 = inlined_call_operand.vmem [shape: bf16[128,128], index: 8, kind: input, shape index: {}]   ;;  %s7679_s9 = inlined_call_operand.vmem [shape: bf16[128,128], index: 9, kind: input, shape index: {}]   ;;  %s7680_s10 = inlined_call_operand.vmem [shape: f32[512,128], index: 10, kind: output, shape index: {}]  }
   0x1 LB: > { %s3974_s14 = sadd.s32 4294967295, %s5496_s13   ;;  %p3978_p0 = scmp.ge.s32.totalorder %s5496_s13, 1  ;;  %s5496_s13 = sphi %s5555_s13, %s20_s13  }
   0x2   : > { %p313_p1 = scmp.lt.s32.totalorder %s5496_s13, 3 }
   0x4   : > { %p314_p2 = pnand %p3978_p0, %p313_p1 }
   0x5   : > { %v4019_v0 = vld [vmem:[%s7673_s3] sm:$0xff] (!%p314_p2)   ;;  %v4226_v1 = vld [vmem:[%s7673_s3 + $0x8] sm:$0xff] (!%p314_p2)   ;;  %s3979_s19 = sshll.u32 (!%p314_p2), %s3974_s14, 5  ;;  %v4227_v2 = vld [vmem:[%s7673_s3 + $0x10] sm:$0xff] (!%p314_p2)   ;;  %vm412_vm0 = vcmask (!%p314_p2), 523264  }
   0x6   : > { %317 = sbr.rel (%p314_p2) target bundleno = 2615 (0xa37), region = 60  ;;  %4889 = vmatprep.subr.bf16.mxu0 (!%p314_p2), %v4019_v0  ;;  %p352_p3 = scmp.lt.s32.totalorder (!%p314_p2), %s3979_s19, 63  ;;  %5112 = vmatprep.subr.bf16.mxu1 (!%p314_p2), %v4019_v0  ;;  %v4228_v4 = vld [vmem:[%s7673_s3 + $0x18] sm:$0xff] (!%p314_p2)   ;;  %v4035_v6 = vld [vmem:[%s7674_s4] sm:$0xff] (!%p314_p2)   ;;  %v4229_v12 = vld [vmem:[%s7674_s4 + $0x8] sm:$0xff] (!%p314_p2)  }
   0x7   : > { %4891 = vmatpush3.bf16.msra.mxu0 (!%p314_p2), %v4019_v0  ;;  %5116 = vmatpush3.bf16.msra.mxu1 (!%p314_p2), %v4019_v0  ;;  %v4230_v16 = vld [vmem:[%s7674_s4 + $0x10] sm:$0xff] (!%p314_p2)   ;;  %v4231_v21 = vld [vmem:[%s7674_s4 + $0x18] sm:$0xff] (!%p314_p2)   ;;  %v4232_v26 = vld [vmem:[%s7674_s4 + $0x20] sm:$0xff] (!%p314_p2)  }
   0x8   : > { %4893 = vmatprep.subr.bf16.mxu0 (!%p314_p2), %v4226_v1  ;;  %5113 = vmatprep.subr.bf16.mxu1 (!%p314_p2), %v4226_v1  ;;  %v4233_v31 = vld [vmem:[%s7674_s4 + $0x28] sm:$0xff] (!%p314_p2)   ;;  %v4234_v36 = vld [vmem:[%s7674_s4 + $0x30] sm:$0xff] (!%p314_p2)   ;;  %v4235_v43 = vld [vmem:[%s7674_s4 + $0x38] sm:$0xff] (!%p314_p2)  }
   0x9   : > { %v4067_v44 = vld [vmem:[%s7675_s5] sm:$0xff] (!%p314_p2)   ;;  %v4236_v45 = vld [vmem:[%s7675_s5 + $0x8] sm:$0xff] (!%p314_p2)   ;;  %v4237_v46 = vld [vmem:[%s7675_s5 + $0x10] sm:$0xff] (!%p314_p2)  }
   0xa   : > { %v4238_v47 = vld [vmem:[%s7675_s5 + $0x18] sm:$0xff] (!%p314_p2)   ;;  %v4239_v48 = vld [vmem:[%s7675_s5 + $0x20] sm:$0xff] (!%p314_p2)   ;;  %v4240_v49 = vld [vmem:[%s7675_s5 + $0x28] sm:$0xff] (!%p314_p2)  }
   0xb   : > { %4895 = vmatpush3.bf16.msra.mxu0 (!%p314_p2), %v4226_v1  ;;  %5117 = vmatpush3.bf16.msra.mxu1 (!%p314_p2), %v4226_v1  ;;  %v4241_v50 = vld [vmem:[%s7675_s5 + $0x30] sm:$0xff] (!%p314_p2)   ;;  %v5697_v51 = vld [vmem:[%s7672_s2] ss:$0 sm:$0xff] (!%p314_p2)  ;;  %v735_v58 = vld [vmem:[%s7671_s1 + $0x8] sm:$0xff] (!%p314_p2) }
   0xc   : > { %4897 = vmatprep.subr.bf16.mxu0 (!%p314_p2), %v4227_v2  ;;  %5114 = vmatprep.subr.bf16.mxu1 (!%p314_p2), %v4227_v2  ;;  %v734_v56 = vld [vmem:[%s7671_s1] sm:$0xff] (!%p314_p2)  ;;  %v737_v62 = vld [vmem:[%s7671_s1 + $0x18] sm:$0xff] (!%p314_p2) }
   0xd   : > { %s7682_s19 = smov (!%p352_p3, %s3979_s19), 63 }
   0xe   : > { %s3980_s22 = sshll.u32 %s7682_s19, 3 }
   0xf   : > { %s5580_s25 = scalar_lea.vmem %s7670_s0, %s3980_s22  ;;  %4899 = vmatpush3.bf16.msra.mxu0 %v4227_v2  ;;  %5118 = vmatpush3.bf16.msra.mxu1 %v4227_v2  ;;  %s7601_s23 = scalar_lea.vmem %s7680_s10, %s3980_s22 }
  0x10   : > { %v363_v3 = vld [vmem:[%s5580_s25] sm:$0xff]  ;;  %4901 = vmatprep.subr.bf16.mxu0 %v4228_v4  ;;  %5115 = vmatprep.subr.bf16.mxu1 %v4228_v4  ;;  %v364_v7 = vld [vmem:[%s5580_s25 + $0x8] sm:$0xff]  ;;  %v365_v9 = vld [vmem:[%s5580_s25 + $0x10] sm:$0xff] }
  0x11   : > { %4520 = vmatprep.mubr.msk.f32.mxu0 %vm412_vm0, %v363_v3  ;;  %v379_v5 = vld [vmem:[%s5580_s25 + $0x80] sm:$0xff]  ;;  %v380_v8 = vld [vmem:[%s5580_s25 + $0x88] sm:$0xff]  ;;  %v381_v10 = vld [vmem:[%s5580_s25 + $0x90] sm:$0xff] }
  0x12   : > { %4544 = vmatprep.mubr.msk.f32.mxu1 %vm412_vm0, %v379_v5  ;;  %v366_v11 = vld [vmem:[%s5580_s25 + $0x18] sm:$0xff]  ;;  %v367_v13 = vld [vmem:[%s5580_s25 + $0x20] sm:$0xff]  ;;  %v368_v17 = vld [vmem:[%s5580_s25 + $0x28] sm:$0xff] }
  0x13   : > { %4903 = vmatpush3.bf16.msra.mxu0 %v4228_v4  ;;  %5119 = vmatpush3.bf16.msra.mxu1 %v4228_v4  ;;  %v382_v14 = vld [vmem:[%s5580_s25 + $0x98] sm:$0xff]  ;;  %v383_v15 = vld [vmem:[%s5580_s25 + $0xa0] sm:$0xff]  ;;  %v384_v18 = vld [vmem:[%s5580_s25 + $0xa8] sm:$0xff] }
  0x14   : > { %4905 = vmatprep.subr.bf16.mxu1 %v4035_v6  ;;  %v369_v19 = vld [vmem:[%s5580_s25 + $0x30] sm:$0xff]  ;;  %v370_v22 = vld [vmem:[%s5580_s25 + $0x38] sm:$0xff]  ;;  %v371_v24 = vld [vmem:[%s5580_s25 + $0x40] sm:$0xff]  ;;  %4937 = vmatprep.subr.bf16.mxu0 %v4067_v44 }
  0x15   : > { %v385_v20 = vld [vmem:[%s5580_s25 + $0xb0] sm:$0xff]  ;;  %v386_v23 = vld [vmem:[%s5580_s25 + $0xb8] sm:$0xff]  ;;  %v387_v25 = vld [vmem:[%s5580_s25 + $0xc0] sm:$0xff] }
  0x16   : > { %4521 = vmatmul.mubr.msk.f32.vlgmr.msra.gmra.mrb[0].mxu0 %vm412_vm0, %v364_v7  ;;  %4545 = vmatmul.mubr.msk.f32.vlgmr.msra.gmra.mrb[0].mxu1 %vm412_vm0, %v380_v8  ;;  %v372_v27 = vld [vmem:[%s5580_s25 + $0x48] sm:$0xff]  ;;  %v373_v29 = vld [vmem:[%s5580_s25 + $0x50] sm:$0xff]  ;;  %v374_v32 = vld [vmem:[%s5580_s25 + $0x58] sm:$0xff] }
  0x17   : > { %4523 = vmatprep.mubr.msk.f32.mxu0 %vm412_vm0, %v365_v9  ;;  %4547 = vmatprep.mubr.msk.f32.mxu1 %vm412_vm0, %v381_v10  ;;  %v388_v28 = vld [vmem:[%s5580_s25 + $0xc8] sm:$0xff]  ;;  %v389_v30 = vld [vmem:[%s5580_s25 + $0xd0] sm:$0xff]  ;;  %v390_v33 = vld [vmem:[%s5580_s25 + $0xd8] sm:$0xff] }
  0x18   : > { %4907 = vmatpush3.bf16.msra.mxu1 %v4035_v6  ;;  %v375_v34 = vld [vmem:[%s5580_s25 + $0x60] sm:$0xff]  ;;  %v376_v37 = vld [vmem:[%s5580_s25 + $0x68] sm:$0xff]  ;;  %v377_v39 = vld [vmem:[%s5580_s25 + $0x70] sm:$0xff]  ;;  %4939 = vmatpush3.bf16.msra.mxu0 %v4067_v44 }
  0x19   : > { %4909 = vmatprep.subr.bf16.mxu1 %v4229_v12  ;;  %v391_v35 = vld [vmem:[%s5580_s25 + $0xe0] sm:$0xff]  ;;  %v392_v38 = vld [vmem:[%s5580_s25 + $0xe8] sm:$0xff]  ;;  %v393_v40 = vld [vmem:[%s5580_s25 + $0xf0] sm:$0xff]  ;;  %4941 = vmatprep.subr.bf16.mxu0 %v4236_v45 }
  0x1a   : > { %4524 = vmatmul.mubr.msk.f32.gmra.mrb[2].mxu0 %vm412_vm0, %v366_v11  ;;  %4548 = vmatmul.mubr.msk.f32.gmra.mrb[2].mxu1 %vm412_vm0, %v382_v14  ;;  %v378_v41 = vld [vmem:[%s5580_s25 + $0x78] sm:$0xff]  ;;  %v736_v3 = vld [vmem:[%s7671_s1 + $0x10] sm:$0xff]  ;;  %v739_v9 = vld [vmem:[%s7671_s1 + $0x28] sm:$0xff] }
  0x1b   : > { %4526 = vmatprep.mubr.msk.f32.mxu0 %vm412_vm0, %v367_v13  ;;  %4550 = vmatprep.mubr.msk.f32.mxu1 %vm412_vm0, %v383_v15  ;;  %v394_v42 = vld [vmem:[%s5580_s25 + $0xf8] sm:$0xff]  ;;  %v738_v13 = vld [vmem:[%s7671_s1 + $0x20] sm:$0xff] }
  0x1c   : > { %4911 = vmatpush3.bf16.msra.mxu1 %v4229_v12  ;;  %4943 = vmatpush3.bf16.msra.mxu0 %v4236_v45 }
  0x1d   : > { %4913 = vmatprep.subr.bf16.mxu1 %v4230_v16  ;;  %4945 = vmatprep.subr.bf16.mxu0 %v4237_v46 }
  0x1e   : > { %4527 = vmatmul.mubr.msk.f32.gmra.mrb[4].mxu0 %vm412_vm0, %v368_v17  ;;  %4551 = vmatmul.mubr.msk.f32.gmra.mrb[4].mxu1 %vm412_vm0, %v384_v18 }
  0x1f   : > { %4529 = vmatprep.mubr.msk.f32.mxu0 %vm412_vm0, %v369_v19  ;;  %4553 = vmatprep.mubr.msk.f32.mxu1 %vm412_vm0, %v385_v20  ;;  %v741_v19 = vld [vmem:[%s7671_s1 + $0x38] sm:$0xff] }
  0x20   : > { %4915 = vmatpush3.bf16.msra.mxu1 %v4230_v16  ;;  %4947 = vmatpush3.bf16.msra.mxu0 %v4237_v46 }
  0x21   : > { %4917 = vmatprep.subr.bf16.mxu1 %v4231_v21  ;;  %4949 = vmatprep.subr.bf16.mxu0 %v4238_v47 }
  0x22   : > { %4530 = vmatmul.mubr.msk.f32.gmra.mrb[6].mxu0 %vm412_vm0, %v370_v22  ;;  %4554 = vmatmul.mubr.msk.f32.gmra.mrb[6].mxu1 %vm412_vm0, %v386_v23  ;;  %v740_v23 = vld [vmem:[%s7671_s1 + $0x30] sm:$0xff] }
  0x23   : > { %4532 = vmatprep.mubr.msk.f32.mxu0 %vm412_vm0, %v371_v24  ;;  %4556 = vmatprep.mubr.msk.f32.mxu1 %vm412_vm0, %v387_v25 }
  0x24   : > { %4919 = vmatpush3.bf16.msra.mxu1 %v4231_v21  ;;  %4951 = vmatpush3.bf16.msra.mxu0 %v4238_v47 }
  0x25   : > { %4921 = vmatprep.subr.bf16.mxu1 %v4232_v26  ;;  %4953 = vmatprep.subr.bf16.mxu0 %v4239_v48 }
  0x26   : > { %4533 = vmatmul.mubr.msk.f32.gmra.mrb[8].mxu0 %vm412_vm0, %v372_v27  ;;  %4557 = vmatmul.mubr.msk.f32.gmra.mrb[8].mxu1 %vm412_vm0, %v388_v28 }
  0x27   : > { %4535 = vmatprep.mubr.msk.f32.mxu0 %vm412_vm0, %v373_v29  ;;  %4559 = vmatprep.mubr.msk.f32.mxu1 %vm412_vm0, %v389_v30  ;;  %v743_v29 = vld [vmem:[%s7671_s1 + $0x48] sm:$0xff] }
  0x28   : > { %4923 = vmatpush3.bf16.msra.mxu1 %v4232_v26  ;;  %4955 = vmatpush3.bf16.msra.mxu0 %v4239_v48 }
  0x29   : > { %4925 = vmatprep.subr.bf16.mxu1 %v4233_v31  ;;  %4957 = vmatprep.subr.bf16.mxu0 %v4240_v49 }
  0x2a   : > { %4536 = vmatmul.mubr.msk.f32.gmra.mrb[10].mxu0 %vm412_vm0, %v374_v32  ;;  %4560 = vmatmul.mubr.msk.f32.gmra.mrb[10].mxu1 %vm412_vm0, %v390_v33  ;;  %v742_v33 = vld [vmem:[%s7671_s1 + $0x40] sm:$0xff] }
  0x2b   : > { %4538 = vmatprep.mubr.msk.f32.mxu0 %vm412_vm0, %v375_v34  ;;  %4562 = vmatprep.mubr.msk.f32.mxu1 %vm412_vm0, %v391_v35 }
  0x2c   : > { %4927 = vmatpush3.bf16.msra.mxu1 %v4233_v31  ;;  %4959 = vmatpush3.bf16.msra.mxu0 %v4240_v49  ;;  %v747_v49 = vld [vmem:[%s7671_s1 + $0x68] sm:$0xff] }
  0x2d   : > { %4929 = vmatprep.subr.bf16.mxu1 %v4234_v36  ;;  %4961 = vmatprep.subr.bf16.mxu0 %v4241_v50 }
  0x2e   : > { %4539 = vmatmul.mubr.msk.f32.gmra.mrb[12].mxu0 %vm412_vm0, %v376_v37  ;;  %4563 = vmatmul.mubr.msk.f32.gmra.mrb[12].mxu1 %vm412_vm0, %v392_v38 }
  0x2f   : > { %4541 = vmatprep.mubr.msk.f32.mxu0 %vm412_vm0, %v377_v39  ;;  %4565 = vmatprep.mubr.msk.f32.mxu1 %vm412_vm0, %v393_v40  ;;  %v745_v39 = vld [vmem:[%s7671_s1 + $0x58] sm:$0xff] }
  0x30   : > { %4931 = vmatpush3.bf16.msra.mxu1 %v4234_v36  ;;  %4963 = vmatpush3.bf16.msra.mxu0 %v4241_v50 }
  0x31   : > { %4933 = vmatprep.subr.bf16.mxu1 %v4235_v43 }
  0x32   : > { %4542 = vmatmul.mubr.msk.f32.gmra.mrb[14].mxu0 %vm412_vm0, %v378_v41  ;;  %4566 = vmatmul.mubr.msk.f32.gmra.mrb[14].mxu1 %vm412_vm0, %v394_v42 }
  0x34   : > { %4935 = vmatpush3.bf16.msra.mxu1 %v4235_v43  ;;  %v744_v43 = vld [vmem:[%s7671_s1 + $0x50] sm:$0xff] }
  0xe9   : > { %v4522_v52 = vpop.f32.mrb[0].mxu0  ;;  %v5699_v53 = vpop.f32.mrb[0].mxu1 }
  0xea   : > { %v581_v54 = vadd.f32 %v4522_v52, %v5697_v51  ;;  %v575_v55 = vpop.f32.mrb[1].mxu0  ;;  %v5705_v57 = vpop.f32.mrb[1].mxu1 }
  0xeb   : > { %v576_v59 = vadd.f32 %v575_v55, %v5697_v51  ;;  %v746_v55 = vld [vmem:[%s7671_s1 + $0x60] sm:$0xff] }
  0xec   : > { %v5718_v0 = vadd.f32 %v735_v58, %v581_v54 }
  0xed   : > { %v5711_v60 = vadd.f32 %v734_v56, %v576_v59  ;;  %v4525_v61 = vpop.f32.mrb[2].mxu0  ;;  %v5716_v63 = vpop.f32.mrb[2].mxu1 }
  0xee   : > { %v591_v1 = vadd.f32 %v4525_v61, %v5697_v51  ;;  %v585_v2 = vpop.f32.mrb[3].mxu0  ;;  %v5724_v4 = vpop.f32.mrb[3].mxu1 }
  0xef   : > { %v586_v5 = vadd.f32 %v585_v2, %v5697_v51  ;;  %4600 = vmatprep.mubr.f32.mxu1 %v5711_v60  ;;  %v656_v2 = vadd.f32 %v5705_v57, %v5697_v51  ;;  %v661_v57 = vadd.f32 %v5699_v53, %v5697_v51  ;;  %v671_v53 = vadd.f32 %v5716_v63, %v5697_v51 }
  0xf0   : > { %v5728_v6 = vadd.f32 %v737_v62, %v591_v1  ;;  %4601 = vmatmul.mubr.f32.vlgmr.msra.gmra.mrb[16].mxu1 %v5718_v0  ;;  %v749_v1 = vld [vmem:[%s7671_s1 + $0x78] sm:$0xff] }
  0xf1   : > { %v5731_v7 = vadd.f32 %v736_v3, %v586_v5  ;;  %v4528_v8 = vpop.f32.mrb[4].mxu0  ;;  %v5736_v10 = vpop.f32.mrb[4].mxu1 }
  0xf2   : > { %v601_v11 = vadd.f32 %v4528_v8, %v5697_v51  ;;  %v595_v12 = vpop.f32.mrb[5].mxu0  ;;  %v5742_v14 = vpop.f32.mrb[5].mxu1  ;;  %v681_v63 = vadd.f32 %v5736_v10, %v5697_v51 }
  0xf3   : > { %v596_v15 = vadd.f32 %v595_v12, %v5697_v51  ;;  %4603 = vmatprep.mubr.f32.mxu1 %v5731_v7 }
  0xf4   : > { %v5746_v16 = vadd.f32 %v739_v9, %v601_v11  ;;  %4604 = vmatmul.mubr.f32.gmra.mrb[18].mxu1 %v5728_v6  ;;  %v748_v9 = vld [vmem:[%s7671_s1 + $0x70] sm:$0xff]  ;;  %v750_v11 = vld [vmem:[%s7671_s1 + $0x80] sm:$0xff] }
  0xf5   : > { %v5749_v17 = vadd.f32 %v738_v13, %v596_v15  ;;  %v4531_v18 = vpop.f32.mrb[6].mxu0  ;;  %v5754_v20 = vpop.f32.mrb[6].mxu1 }
  0xf6   : > { %v611_v21 = vadd.f32 %v4531_v18, %v5697_v51  ;;  %v605_v22 = vpop.f32.mrb[7].mxu0  ;;  %v5760_v24 = vpop.f32.mrb[7].mxu1  ;;  %v691_v10 = vadd.f32 %v5754_v20, %v5697_v51 }
  0xf7   : > { %v606_v25 = vadd.f32 %v605_v22, %v5697_v51  ;;  %4606 = vmatprep.mubr.f32.mxu1 %v5749_v17  ;;  %v666_v22 = vadd.f32 %v5724_v4, %v5697_v51  ;;  %v676_v4 = vadd.f32 %v5742_v14, %v5697_v51  ;;  %v686_v14 = vadd.f32 %v5760_v24, %v5697_v51 }
  0xf8   : > { %v5764_v26 = vadd.f32 %v741_v19, %v611_v21  ;;  %4607 = vmatmul.mubr.f32.gmra.mrb[20].mxu1 %v5746_v16  ;;  %v751_v19 = vld [vmem:[%s7671_s1 + $0x88] sm:$0xff]  ;;  %v5849_v21 = vadd.f32 %v750_v11, %v656_v2  ;;  %v765_v11 = vld [vmem:[%s7671_s1 + $0xf8] sm:$0xff] }
  0xf9   : > { %v5767_v27 = vadd.f32 %v740_v23, %v606_v25  ;;  %v4534_v28 = vpop.f32.mrb[8].mxu0  ;;  %v5772_v30 = vpop.f32.mrb[8].mxu1  ;;  %v752_v23 = vld [vmem:[%s7671_s1 + $0x90] sm:$0xff]  ;;  %v5857_v25 = vadd.f32 %v751_v19, %v661_v57  ;;  %v763_v2 = vld [vmem:[%s7671_s1 + $0xe8] sm:$0xff] }
  0xfa   : > { %v621_v31 = vadd.f32 %v4534_v28, %v5697_v51  ;;  %v615_v32 = vpop.f32.mrb[9].mxu0  ;;  %v5778_v34 = vpop.f32.mrb[9].mxu1  ;;  %v753_v28 = vld [vmem:[%s7671_s1 + $0x98] sm:$0xff]  ;;  %v701_v20 = vadd.f32 %v5772_v30, %v5697_v51 }
  0xfb   : > { %v616_v35 = vadd.f32 %v615_v32, %v5697_v51  ;;  %4609 = vmatprep.mubr.f32.mxu1 %v5767_v27  ;;  %v5873_v32 = vadd.f32 %v753_v28, %v671_v53  ;;  %v696_v24 = vadd.f32 %v5778_v34, %v5697_v51 }
  0xfc   : > { %v5782_v36 = vadd.f32 %v743_v29, %v621_v31  ;;  %4610 = vmatmul.mubr.f32.gmra.mrb[22].mxu1 %v5764_v26  ;;  %v5865_v29 = vadd.f32 %v752_v23, %v666_v22  ;;  %v754_v31 = vld [vmem:[%s7671_s1 + $0xa0] sm:$0xff] }
  0xfd   : > { %v5785_v37 = vadd.f32 %v742_v33, %v616_v35  ;;  %v4537_v38 = vpop.f32.mrb[10].mxu0  ;;  %v5790_v40 = vpop.f32.mrb[10].mxu1  ;;  %v755_v33 = vld [vmem:[%s7671_s1 + $0xa8] sm:$0xff]  ;;  %v5881_v35 = vadd.f32 %v754_v31, %v676_v4 }
  0xfe   : > { %v631_v41 = vadd.f32 %v4537_v38, %v5697_v51  ;;  %v625_v42 = vpop.f32.mrb[11].mxu0  ;;  %v5796_v44 = vpop.f32.mrb[11].mxu1  ;;  %v756_v38 = vld [vmem:[%s7671_s1 + $0xb0] sm:$0xff]  ;;  %v711_v30 = vadd.f32 %v5790_v40, %v5697_v51 }
  0xff   : > { %v626_v45 = vadd.f32 %v625_v42, %v5697_v51  ;;  %4612 = vmatprep.mubr.f32.mxu1 %v5785_v37  ;;  %v5897_v42 = vadd.f32 %v756_v38, %v686_v14  ;;  %v706_v34 = vadd.f32 %v5796_v44, %v5697_v51 }
 0x100   : > { %v5800_v46 = vadd.f32 %v745_v39, %v631_v41  ;;  %4613 = vmatmul.mubr.f32.gmra.mrb[24].mxu1 %v5782_v36  ;;  %v5889_v39 = vadd.f32 %v755_v33, %v681_v63  ;;  %v757_v41 = vld [vmem:[%s7671_s1 + $0xb8] sm:$0xff] }
 0x101   : > { %v5803_v47 = vadd.f32 %v744_v43, %v626_v45  ;;  %v4540_v48 = vpop.f32.mrb[12].mxu0  ;;  %v5808_v50 = vpop.f32.mrb[12].mxu1  ;;  %v758_v43 = vld [vmem:[%s7671_s1 + $0xc0] sm:$0xff]  ;;  %v5905_v45 = vadd.f32 %v757_v41, %v691_v10 }
 0x102   : > { %v641_v52 = vadd.f32 %v4540_v48, %v5697_v51  ;;  %v635_v54 = vpop.f32.mrb[13].mxu0  ;;  %v5814_v56 = vpop.f32.mrb[13].mxu1  ;;  %v759_v48 = vld [vmem:[%s7671_s1 + $0xc8] sm:$0xff]  ;;  %v721_v40 = vadd.f32 %v5808_v50, %v5697_v51 }
 0x103   : > { %v636_v58 = vadd.f32 %v635_v54, %v5697_v51  ;;  %4615 = vmatprep.mubr.f32.mxu1 %v5803_v47  ;;  %v5921_v54 = vadd.f32 %v759_v48, %v701_v20  ;;  %v716_v44 = vadd.f32 %v5814_v56, %v5697_v51 }
 0x104   : > { %v5818_v59 = vadd.f32 %v747_v49, %v641_v52  ;;  %4616 = vmatmul.mubr.f32.gmra.mrb[26].mxu1 %v5800_v46  ;;  %v5913_v49 = vadd.f32 %v758_v43, %v696_v24  ;;  %v760_v52 = vld [vmem:[%s7671_s1 + $0xd0] sm:$0xff] }
 0x105   : > { %v5821_v61 = vadd.f32 %v746_v55, %v636_v58  ;;  %v4543_v62 = vpop.f32.mrb[14].mxu0  ;;  %v5828_v3 = vpop.f32.mrb[14].mxu1  ;;  %v761_v55 = vld [vmem:[%s7671_s1 + $0xd8] sm:$0xff]  ;;  %v5929_v58 = vadd.f32 %v760_v52, %v706_v34 }
 0x106   : > { %v651_v5 = vadd.f32 %v4543_v62, %v5697_v51  ;;  %v645_v8 = vpop.f32.mrb[15].mxu0  ;;  %v725_v12 = vpop.f32.mrb[15].mxu1  ;;  %v762_v62 = vld [vmem:[%s7671_s1 + $0xe0] sm:$0xff]  ;;  %v731_v50 = vadd.f32 %v5828_v3, %v5697_v51 }
 0x107   : > { %v646_v13 = vadd.f32 %v645_v8, %v5697_v51  ;;  %4618 = vmatprep.mubr.f32.mxu1 %v5821_v61  ;;  %v726_v56 = vadd.f32 %v725_v12, %v5697_v51  ;;  %v764_v8 = vld [vmem:[%s7671_s1 + $0xf0] sm:$0xff]  ;;  %v4242_v51 = vld [vmem:[%s7675_s5 + $0x38] sm:$0xff]   ;;  %v5974_v3 = vld [vmem:[%s7672_s2 + $0x1] ss:$0 sm:$0xff] }
 0x108   : > { %v5839_v15 = vadd.f32 %v749_v1, %v651_v5  ;;  %4619 = vmatmul.mubr.f32.gmra.mrb[28].mxu1 %v5818_v59  ;;  %v5937_v1 = vadd.f32 %v761_v55, %v711_v30  ;;  %v5945_v5 = vadd.f32 %v762_v62, %v716_v44  ;;  %v5963_v12 = vadd.f32 %v765_v11, %v731_v50 }
 0x109   : > { %v5844_v18 = vadd.f32 %v748_v9, %v646_v13  ;;  %v5952_v9 = vadd.f32 %v763_v2, %v721_v40  ;;  %v5960_v13 = vadd.f32 %v764_v8, %v726_v56  ;;  %4965 = vmatprep.subr.bf16.mxu0 %v4242_v51 }
 0x10a   : > { %4967 = vmatpush3.bf16.msra.mxu0 %v4242_v51 }
 0x10b   : > { %4621 = vmatprep.mubr.f32.mxu1 %v5844_v18 }
 0x10c   : > { %4622 = vmatmul.mubr.f32.gmra.mrb[30].mxu1 %v5839_v15 }
 0x10d   : > { %4624 = vmatprep.mubr.f32.mxu1 %v5849_v21 }
 0x110   : > { %4625 = vmatmul.mubr.f32.gmra.mrb[32].mxu1 %v5857_v25 }
 0x111   : > { %4627 = vmatprep.mubr.f32.mxu1 %v5865_v29 }
 0x114   : > { %4628 = vmatmul.mubr.f32.gmra.mrb[34].mxu1 %v5873_v32 }
 0x115   : > { %4630 = vmatprep.mubr.f32.mxu1 %v5881_v35 }
 0x118   : > { %4631 = vmatmul.mubr.f32.gmra.mrb[36].mxu1 %v5889_v39 }
 0x119   : > { %4633 = vmatprep.mubr.f32.mxu1 %v5897_v42 }
 0x11c   : > { %4634 = vmatmul.mubr.f32.gmra.mrb[38].mxu1 %v5905_v45 }
 0x11d   : > { %4636 = vmatprep.mubr.f32.mxu1 %v5913_v49 }
 0x120   : > { %4637 = vmatmul.mubr.f32.gmra.mrb[40].mxu1 %v5921_v54 }
 0x121   : > { %4639 = vmatprep.mubr.f32.mxu1 %v5929_v58 }
 0x124   : > { %4640 = vmatmul.mubr.f32.gmra.mrb[42].mxu1 %v5937_v1 }
 0x125   : > { %4642 = vmatprep.mubr.f32.mxu1 %v5945_v5 }
 0x128   : > { %4643 = vmatmul.mubr.f32.gmra.mrb[44].mxu1 %v5952_v9 }
 0x129   : > { %4645 = vmatprep.mubr.f32.mxu1 %v5960_v13 }
 0x12c   : > { %4646 = vmatmul.mubr.f32.gmra.mrb[46].mxu1 %v5963_v12 }
 0x1c3   : > { %v4602_v57 = vpop.f32.mrb[16].mxu1 }
 0x1c4   : > { %v897_v19 = vpop.f32.mrb[17].mxu1  ;;  %v903_v23 = vadd.f32 %v4602_v57, %v5974_v3 }
 0x1c5   : > { %v898_v22 = vadd.f32 %v897_v19, %v5974_v3 }
 0x1c7   : > { %v4605_v53 = vpop.f32.mrb[18].mxu1  ;;  %4680 = vmatprep.mubr.f32.mxu0 %v898_v22 }
 0x1c8   : > { %v913_v28 = vadd.f32 %v4605_v53, %v5974_v3  ;;  %v907_v4 = vpop.f32.mrb[19].mxu1  ;;  %4681 = vmatmul.mubr.f32.vlgmr.msra.gmra.mrb[16].mxu0 %v903_v23 }
 0x1c9   : > { %v908_v31 = vadd.f32 %v907_v4, %v5974_v3 }
 0x1cb   : > { %v4608_v63 = vpop.f32.mrb[20].mxu1  ;;  %4683 = vmatprep.mubr.f32.mxu0 %v908_v31 }
 0x1cc   : > { %v923_v33 = vadd.f32 %v4608_v63, %v5974_v3  ;;  %v917_v14 = vpop.f32.mrb[21].mxu1  ;;  %4684 = vmatmul.mubr.f32.gmra.mrb[18].mxu0 %v913_v28 }
 0x1cd   : > { %v918_v38 = vadd.f32 %v917_v14, %v5974_v3 }
 0x1cf   : > { %v4611_v10 = vpop.f32.mrb[22].mxu1  ;;  %4686 = vmatprep.mubr.f32.mxu0 %v918_v38 }
 0x1d0   : > { %v933_v41 = vadd.f32 %v4611_v10, %v5974_v3  ;;  %v927_v24 = vpop.f32.mrb[23].mxu1  ;;  %4687 = vmatmul.mubr.f32.gmra.mrb[20].mxu0 %v923_v33 }
 0x1d1   : > { %v928_v43 = vadd.f32 %v927_v24, %v5974_v3 }
 0x1d3   : > { %v4614_v20 = vpop.f32.mrb[24].mxu1  ;;  %4689 = vmatprep.mubr.f32.mxu0 %v928_v43 }
 0x1d4   : > { %v943_v48 = vadd.f32 %v4614_v20, %v5974_v3  ;;  %v937_v34 = vpop.f32.mrb[25].mxu1  ;;  %4690 = vmatmul.mubr.f32.gmra.mrb[22].mxu0 %v933_v41 }
 0x1d5   : > { %v938_v52 = vadd.f32 %v937_v34, %v5974_v3 }
 0x1d7   : > { %v4617_v30 = vpop.f32.mrb[26].mxu1  ;;  %4692 = vmatprep.mubr.f32.mxu0 %v938_v52 }
 0x1d8   : > { %v953_v55 = vadd.f32 %v4617_v30, %v5974_v3  ;;  %v947_v44 = vpop.f32.mrb[27].mxu1  ;;  %4693 = vmatmul.mubr.f32.gmra.mrb[24].mxu0 %v943_v48 }
 0x1d9   : > { %v948_v62 = vadd.f32 %v947_v44, %v5974_v3 }
 0x1db   : > { %v4620_v40 = vpop.f32.mrb[28].mxu1  ;;  %4695 = vmatprep.mubr.f32.mxu0 %v948_v62 }
 0x1dc   : > { %v963_v2 = vadd.f32 %v4620_v40, %v5974_v3  ;;  %v957_v56 = vpop.f32.mrb[29].mxu1  ;;  %4696 = vmatmul.mubr.f32.gmra.mrb[26].mxu0 %v953_v55 }
 0x1dd   : > { %v958_v8 = vadd.f32 %v957_v56, %v5974_v3 }
 0x1df   : > { %v4623_v50 = vpop.f32.mrb[30].mxu1  ;;  %4698 = vmatprep.mubr.f32.mxu0 %v958_v8 }
 0x1e0   : > { %v973_v11 = vadd.f32 %v4623_v50, %v5974_v3  ;;  %v967_v51 = vpop.f32.mrb[31].mxu1  ;;  %4699 = vmatmul.mubr.f32.gmra.mrb[28].mxu0 %v963_v2 }
 0x1e1   : > { %v968_v57 = vadd.f32 %v967_v51, %v5974_v3 }
 0x1e3   : > { %v4626_v19 = vpop.f32.mrb[32].mxu1  ;;  %4701 = vmatprep.mubr.f32.mxu0 %v968_v57 }
 0x1e4   : > { %v983_v22 = vadd.f32 %v4626_v19, %v5974_v3  ;;  %v977_v23 = vpop.f32.mrb[33].mxu1  ;;  %4702 = vmatmul.mubr.f32.gmra.mrb[30].mxu0 %v973_v11 }
 0x1e5   : > { %v978_v53 = vadd.f32 %v977_v23, %v5974_v3 }
 0x1e7   : > { %v4629_v28 = vpop.f32.mrb[34].mxu1  ;;  %4704 = vmatprep.mubr.f32.mxu0 %v978_v53 }
 0x1e8   : > { %v993_v4 = vadd.f32 %v4629_v28, %v5974_v3  ;;  %v987_v31 = vpop.f32.mrb[35].mxu1  ;;  %4705 = vmatmul.mubr.f32.gmra.mrb[32].mxu0 %v983_v22  ;;  %v6011_v22 = vld [vmem:[%s7672_s2 + $0x2] ss:$0 sm:$0xff] }
 0x1e9   : > { %v988_v63 = vadd.f32 %v987_v31, %v5974_v3 }
 0x1eb   : > { %v4632_v33 = vpop.f32.mrb[36].mxu1  ;;  %4707 = vmatprep.mubr.f32.mxu0 %v988_v63 }
 0x1ec   : > { %v1003_v14 = vadd.f32 %v4632_v33, %v5974_v3  ;;  %v997_v38 = vpop.f32.mrb[37].mxu1  ;;  %4708 = vmatmul.mubr.f32.gmra.mrb[34].mxu0 %v993_v4 }
 0x1ed   : > { %v998_v10 = vadd.f32 %v997_v38, %v5974_v3 }
 0x1ef   : > { %v4635_v41 = vpop.f32.mrb[38].mxu1  ;;  %4710 = vmatprep.mubr.f32.mxu0 %v998_v10 }
 0x1f0   : > { %v1013_v24 = vadd.f32 %v4635_v41, %v5974_v3  ;;  %v1007_v43 = vpop.f32.mrb[39].mxu1  ;;  %4711 = vmatmul.mubr.f32.gmra.mrb[36].mxu0 %v1003_v14 }
 0x1f1   : > { %v1008_v20 = vadd.f32 %v1007_v43, %v5974_v3 }
 0x1f3   : > { %v4638_v48 = vpop.f32.mrb[40].mxu1  ;;  %4713 = vmatprep.mubr.f32.mxu0 %v1008_v20 }
 0x1f4   : > { %v1023_v34 = vadd.f32 %v4638_v48, %v5974_v3  ;;  %v1017_v52 = vpop.f32.mrb[41].mxu1  ;;  %4714 = vmatmul.mubr.f32.gmra.mrb[38].mxu0 %v1013_v24 }
 0x1f5   : > { %v1018_v30 = vadd.f32 %v1017_v52, %v5974_v3 }
 0x1f7   : > { %v4641_v55 = vpop.f32.mrb[42].mxu1  ;;  %4716 = vmatprep.mubr.f32.mxu0 %v1018_v30 }
 0x1f8   : > { %v1033_v44 = vadd.f32 %v4641_v55, %v5974_v3  ;;  %v1027_v62 = vpop.f32.mrb[43].mxu1  ;;  %4717 = vmatmul.mubr.f32.gmra.mrb[40].mxu0 %v1023_v34 }
 0x1f9   : > { %v1028_v40 = vadd.f32 %v1027_v62, %v5974_v3 }
 0x1fb   : > { %v4644_v2 = vpop.f32.mrb[44].mxu1  ;;  %4719 = vmatprep.mubr.f32.mxu0 %v1028_v40 }
 0x1fc   : > { %v1043_v56 = vadd.f32 %v4644_v2, %v5974_v3  ;;  %v1037_v8 = vpop.f32.mrb[45].mxu1  ;;  %4720 = vmatmul.mubr.f32.gmra.mrb[42].mxu0 %v1033_v44 }
 0x1fd   : > { %v1038_v50 = vadd.f32 %v1037_v8, %v5974_v3 }
 0x1ff   : > { %v4647_v11 = vpop.f32.mrb[46].mxu1  ;;  %4722 = vmatprep.mubr.f32.mxu0 %v1038_v50 }
 0x200   : > { %v1053_v51 = vadd.f32 %v4647_v11, %v5974_v3  ;;  %v1047_v57 = vpop.f32.mrb[47].mxu1  ;;  %4723 = vmatmul.mubr.f32.gmra.mrb[44].mxu0 %v1043_v56 }
 0x201   : > { %v1048_v19 = vadd.f32 %v1047_v57, %v5974_v3 }
 0x203   : > { %4725 = vmatprep.mubr.f32.mxu0 %v1048_v19 }
 0x204   : > { %4726 = vmatmul.mubr.f32.gmra.mrb[46].mxu0 %v1053_v51 }
 0x29b   : > { %v4682_v23 = vpop.f32.mrb[16].mxu0 }
 0x29c   : > { %v1155_v53 = vpop.f32.mrb[17].mxu0  ;;  %v1161_v4 = vadd.f32 %v4682_v23, %v6011_v22 }
 0x29d   : > { %v1156_v28 = vadd.f32 %v1155_v53, %v6011_v22 }
 0x29e   : > { %v6025_v41 = vadd.f32 %v1161_v4, %v5718_v0 }
 0x29f   : > { %v4685_v31 = vpop.f32.mrb[18].mxu0  ;;  %v6016_v63 = vadd.f32 %v1156_v28, %v5711_v60 }
 0x2a0   : > { %v1165_v33 = vpop.f32.mrb[19].mxu0  ;;  %v1171_v14 = vadd.f32 %v4685_v31, %v6011_v22 }
 0x2a1   : > { %v1166_v3 = vadd.f32 %v1165_v33, %v6011_v22  ;;  %1348 = vadd.xlane.f32.xlu0 %v6016_v63 }
 0x2a2   : > { %v6032_v48 = vadd.f32 %v1171_v14, %v5728_v6 }
 0x2a3   : > { %v4688_v38 = vpop.f32.mrb[20].mxu0  ;;  %v6022_v10 = vadd.f32 %v1166_v3, %v5731_v7 }
 0x2a4   : > { %v1175_v24 = vpop.f32.mrb[21].mxu0  ;;  %v1181_v60 = vadd.f32 %v4688_v38, %v6011_v22 }
 0x2a5   : > { %v1176_v43 = vadd.f32 %v1175_v24, %v6011_v22  ;;  %1352 = vadd.xlane.f32.xlu1 %v6022_v10  ;;  %1350 = vadd.xlane.f32.xlu0 %v6025_v41 }
 0x2a6   : > { %v6042_v55 = vadd.f32 %v1181_v60, %v5746_v16 }
 0x2a7   : > { %v4691_v20 = vpop.f32.mrb[22].mxu0  ;;  %v6035_v34 = vadd.f32 %v1176_v43, %v5749_v17 }
 0x2a8   : > { %v1185_v7 = vpop.f32.mrb[23].mxu0  ;;  %v1191_v52 = vadd.f32 %v4691_v20, %v6011_v22 }
 0x2a9   : > { %v1186_v0 = vadd.f32 %v1185_v7, %v6011_v22  ;;  %1354 = vadd.xlane.f32.xlu1 %v6032_v48  ;;  %1356 = vadd.xlane.f32.xlu0 %v6035_v34 }
 0x2aa   : > { %v6052_v2 = vadd.f32 %v1191_v52, %v5764_v26 }
 0x2ab   : > { %v4694_v30 = vpop.f32.mrb[24].mxu0  ;;  %v6045_v44 = vadd.f32 %v1186_v0, %v5767_v27 }
 0x2ac   : > { %v1195_v6 = vpop.f32.mrb[25].mxu0  ;;  %v1201_v62 = vadd.f32 %v4694_v30, %v6011_v22 }
 0x2ad   : > { %v1196_v17 = vadd.f32 %v1195_v6, %v6011_v22  ;;  %1358 = vadd.xlane.f32.xlu1 %v6042_v55  ;;  %1360 = vadd.xlane.f32.xlu0 %v6045_v44 }
 0x2ae   : > { %v6062_v11 = vadd.f32 %v1201_v62, %v5782_v36 }
 0x2af   : > { %v4697_v40 = vpop.f32.mrb[26].mxu0  ;;  %v6055_v56 = vadd.f32 %v1196_v17, %v5785_v37 }
 0x2b0   : > { %v1205_v16 = vpop.f32.mrb[27].mxu0  ;;  %v1211_v8 = vadd.f32 %v4697_v40, %v6011_v22 }
 0x2b1   : > { %v1206_v27 = vadd.f32 %v1205_v16, %v6011_v22  ;;  %1362 = vadd.xlane.f32.xlu1 %v6052_v2  ;;  %1364 = vadd.xlane.f32.xlu0 %v6055_v56 }
 0x2b2   : > { %v6072_v23 = vadd.f32 %v1211_v8, %v5800_v46 }
 0x2b3   : > { %v4700_v50 = vpop.f32.mrb[28].mxu0  ;;  %v6065_v51 = vadd.f32 %v1206_v27, %v5803_v47 }
 0x2b4   : > { %v1215_v26 = vpop.f32.mrb[29].mxu0  ;;  %v1221_v57 = vadd.f32 %v4700_v50, %v6011_v22 }
 0x2b5   : > { %v1216_v37 = vadd.f32 %v1215_v26, %v6011_v22  ;;  %1366 = vadd.xlane.f32.xlu1 %v6062_v11  ;;  %1368 = vadd.xlane.f32.xlu0 %v6065_v51 }
 0x2b6   : > { %v6082_v31 = vadd.f32 %v1221_v57, %v5818_v59 }
 0x2b7   : > { %v4703_v19 = vpop.f32.mrb[30].mxu0  ;;  %v6075_v53 = vadd.f32 %v1216_v37, %v5821_v61 }
 0x2b8   : > { %v1225_v36 = vpop.f32.mrb[31].mxu0  ;;  %v1231_v28 = vadd.f32 %v4703_v19, %v6011_v22 }
 0x2b9   : > { %v1226_v47 = vadd.f32 %v1225_v36, %v6011_v22  ;;  %1370 = vadd.xlane.f32.xlu1 %v6072_v23  ;;  %1372 = vadd.xlane.f32.xlu0 %v6075_v53 }
 0x2ba   : > { %v6092_v38 = vadd.f32 %v1231_v28, %v5839_v15 }
 0x2bb   : > { %v4706_v4 = vpop.f32.mrb[32].mxu0  ;;  %v6085_v33 = vadd.f32 %v1226_v47, %v5844_v18 }
 0x2bc   : > { %v1235_v46 = vpop.f32.mrb[33].mxu0  ;;  %v1241_v3 = vadd.f32 %v4706_v4, %v6011_v22 }
 0x2bd   : > { %v1236_v61 = vadd.f32 %v1235_v46, %v6011_v22  ;;  %1374 = vadd.xlane.f32.xlu1 %v6082_v31  ;;  %1376 = vadd.xlane.f32.xlu0 %v6085_v33 }
 0x2be   : > { %v6102_v20 = vadd.f32 %v1241_v3, %v5857_v25 }
 0x2bf   : > { %v4709_v14 = vpop.f32.mrb[34].mxu0  ;;  %v6095_v24 = vadd.f32 %v1236_v61, %v5849_v21 }
 0x2c0   : > { %v1245_v59 = vpop.f32.mrb[35].mxu0  ;;  %v1251_v43 = vadd.f32 %v4709_v14, %v6011_v22 }
 0x2c1   : > { %v1246_v18 = vadd.f32 %v1245_v59, %v6011_v22  ;;  %1378 = vadd.xlane.f32.xlu1 %v6092_v38  ;;  %1380 = vadd.xlane.f32.xlu0 %v6095_v24  ;;  %v5154_v59 = vld [vmem:[%s7676_s6 + $0x20] ss:$8 sps:$4 sm:$0xff]  }
 0x2c2   : > { %v6111_v52 = vadd.f32 %v1251_v43, %v5873_v32  ;;  %v5157_v43 = vld [vmem:[%s7676_s6 + $0x30] ss:$8 sps:$4 sm:$0xff]  }
 0x2c3   : > { %v4712_v60 = vpop.f32.mrb[36].mxu0  ;;  %v6105_v7 = vadd.f32 %v1246_v18, %v5865_v29  ;;  %v5155_v18 = vld [vmem:[%s7676_s6 + $0x34] ss:$8 sps:$4 sm:$0xff]  }
 0x2c4   : > { %v1255_v15 = vpop.f32.mrb[37].mxu0  ;;  %v1261_v25 = vadd.f32 %v4712_v60, %v6011_v22  ;;  %v5158_v60 = vld [vmem:[%s7676_s6 + $0x44] ss:$8 sps:$4 sm:$0xff]  }
 0x2c5   : > { %1382 = vadd.xlane.f32.xlu1 %v6102_v20  ;;  %1384 = vadd.xlane.f32.xlu0 %v6105_v7  ;;  %v1256_v21 = vadd.f32 %v1255_v15, %v6011_v22  ;;  %v5160_v15 = vld [vmem:[%s7676_s6 + $0x40] ss:$8 sps:$4 sm:$0xff]  }
 0x2c6   : > { %v6122_v32 = vadd.f32 %v1261_v25, %v5889_v39 }
 0x2c7   : > { %v4715_v0 = vpop.f32.mrb[38].mxu0  ;;  %v6116_v29 = vadd.f32 %v1256_v21, %v5881_v35  ;;  %v5161_v21 = vld [vmem:[%s7676_s6 + $0x54] ss:$8 sps:$4 sm:$0xff]  }
 0x2c8   : > { %v1265_v30 = vpop.f32.mrb[39].mxu0  ;;  %v1271_v35 = vadd.f32 %v4715_v0, %v6011_v22  ;;  %v5163_v0 = vld [vmem:[%s7676_s6 + $0x50] ss:$8 sps:$4 sm:$0xff]  }
 0x2c9   : > { %1386 = vadd.xlane.f32.xlu1 %v6111_v52  ;;  %v1266_v40 = vadd.f32 %v1265_v30, %v6011_v22 }
 0x2ca   : > { %v6136_v28 = vadd.f32 %v1271_v35, %v5905_v45 }
 0x2cb   : > { %v4718_v6 = vpop.f32.mrb[40].mxu0  ;;  %v6129_v37 = vadd.f32 %v1266_v40, %v5897_v42 }
 0x2cc   : > { %v1281_v17 = vadd.f32 %v4718_v6, %v6011_v22  ;;  %v1275_v62 = vpop.f32.mrb[41].mxu0 }
 0x2cd   : > { %1388 = vadd.xlane.f32.xlu1 %v6116_v29  ;;  %v1276_v39 = vadd.f32 %v1275_v62, %v6011_v22 }
 0x2ce   : > { %v6146_v3 = vadd.f32 %v1281_v17, %v5921_v54 }
 0x2cf   : > { %v4721_v16 = vpop.f32.mrb[42].mxu0  ;;  %v6142_v42 = vadd.f32 %v1276_v39, %v5913_v49 }
 0x2d0   : > { %v1291_v27 = vadd.f32 %v4721_v16, %v6011_v22  ;;  %v1285_v8 = vpop.f32.mrb[43].mxu0 }
 0x2d1   : > { %v1286_v50 = vadd.f32 %v1285_v8, %v6011_v22  ;;  %1390 = vadd.xlane.f32.xlu1 %v6122_v32 }
 0x2d2   : > { %v6154_v14 = vadd.f32 %v1291_v27, %v5937_v1 }
 0x2d3   : > { %v4724_v26 = vpop.f32.mrb[44].mxu0  ;;  %v6150_v45 = vadd.f32 %v1286_v50, %v5929_v58 }
 0x2d4   : > { %v1301_v57 = vadd.f32 %v4724_v26, %v6011_v22  ;;  %v1295_v19 = vpop.f32.mrb[45].mxu0 }
 0x2d5   : > { %v1296_v36 = vadd.f32 %v1295_v19, %v6011_v22  ;;  %1392 = vadd.xlane.f32.xlu1 %v6129_v37 }
 0x2d6   : > { %v6162_v54 = vadd.f32 %v1301_v57, %v5952_v9  ;;  %v5148_v9 = vld [vmem:[%s7676_s6] ss:$8 sps:$4 sm:$0xff]  }
 0x2d7   : > { %v4727_v47 = vpop.f32.mrb[46].mxu0  ;;  %v6158_v49 = vadd.f32 %v1296_v36, %v5945_v5  ;;  %v5146_v5 = vld [vmem:[%s7676_s6 + $0x4] ss:$8 sps:$4 sm:$0xff]  }
 0x2d8   : > { %v1311_v4 = vadd.f32 %v4727_v47, %v6011_v22  ;;  %v1305_v46 = vpop.f32.mrb[47].mxu0  ;;  %4969 = vmatprep.subr.bf16.mxu1 %v5146_v5 }
 0x2d9   : > { %v1306_v61 = vadd.f32 %v1305_v46, %v6011_v22  ;;  %1394 = vadd.xlane.f32.xlu1 %v6136_v28  ;;  %4971 = vmatpush1.bf16.msra.mxu1 %v5148_v9  ;;  %v5152_v22 = vld [vmem:[%s7676_s6 + $0x24] ss:$8 sps:$4 sm:$0xff]  }
 0x2da   : > { %v6170_v1 = vadd.f32 %v1311_v4, %v5963_v12  ;;  %v5151_v12 = vld [vmem:[%s7676_s6 + $0x10] ss:$8 sps:$4 sm:$0xff]  }
 0x2db   : > { %v6166_v58 = vadd.f32 %v1306_v61, %v5960_v13  ;;  %v5149_v13 = vld [vmem:[%s7676_s6 + $0x14] ss:$8 sps:$4 sm:$0xff]  }
 0x2dc   : > { %4973 = vmatprep.subr.bf16.mxu1 %v5149_v13 }
 0x2dd   : > { %1396 = vadd.xlane.f32.xlu1 %v6142_v42  ;;  %4975 = vmatpush1.bf16.msra.mxu1 %v5151_v12 }
 0x2de   : > { %4977 = vmatprep.subr.bf16.mxu1 %v5152_v22 }
 0x2e1   : > { %1398 = vadd.xlane.f32.xlu1 %v6146_v3  ;;  %4979 = vmatpush1.bf16.msra.mxu1 %v5154_v59 }
 0x2e2   : > { %4981 = vmatprep.subr.bf16.mxu1 %v5155_v18 }
 0x2e5   : > { %1400 = vadd.xlane.f32.xlu1 %v6150_v45  ;;  %4983 = vmatpush1.bf16.msra.mxu1 %v5157_v43 }
 0x2e6   : > { %4985 = vmatprep.subr.bf16.mxu1 %v5158_v60 }
 0x2e9   : > { %1402 = vadd.xlane.f32.xlu1 %v6154_v14  ;;  %4987 = vmatpush1.bf16.msra.mxu1 %v5160_v15 }
 0x2ea   : > { %4989 = vmatprep.subr.bf16.mxu1 %v5161_v21 }
 0x2ed   : > { %1404 = vadd.xlane.f32.xlu1 %v6158_v49  ;;  %4991 = vmatpush1.bf16.msra.mxu1 %v5163_v0 }
 0x2f1   : > { %1406 = vadd.xlane.f32.xlu1 %v6162_v54 }
 0x2f5   : > { %1408 = vadd.xlane.f32.xlu1 %v6166_v58 }
 0x2f9   : > { %1410 = vadd.xlane.f32.xlu1 %v6170_v1 }
 0x32e   : > { %v1349_v30 = vpop.xlane.xlu0 %1348 }
 0x32f   : > { %v1413_v25 = vmul.f32 0.0078125, %v1349_v30 }
 0x331   : > { %v6210_v6 = vsub.f32 %v6016_v63, %v1413_v25 }
 0x332   : > { %v1353_v17 = vpop.xlane.xlu1 %1352  ;;  %v1351_v62 = vpop.xlane.xlu0 %1350 }
 0x333   : > { %v1415_v40 = vmul.f32 0.0078125, %v1353_v17  ;;  %v1414_v16 = vmul.f32 0.0078125, %v1351_v62  ;;  %v1477_v27 = vmul.f32 %v6210_v6, %v6210_v6 }
 0x335   : > { %1509 = vadd.xlane.f32.xlu0 %v1477_v27  ;;  %v6215_v8 = vsub.f32 %v6025_v41, %v1414_v16  ;;  %v6220_v57 = vsub.f32 %v6022_v10, %v1415_v40 }
 0x336   : > { %v1355_v50 = vpop.xlane.xlu1 %1354  ;;  %v1357_v63 = vpop.xlane.xlu0 %1356 }
 0x337   : > { %v1416_v35 = vmul.f32 0.0078125, %v1355_v50  ;;  %v1478_v26 = vmul.f32 %v6215_v8, %v6215_v8  ;;  %v1417_v36 = vmul.f32 0.0078125, %v1357_v63  ;;  %v1479_v39 = vmul.f32 %v6220_v57, %v6220_v57 }
 0x339   : > { %1511 = vadd.xlane.f32.xlu0 %v1478_v26  ;;  %v6225_v47 = vsub.f32 %v6032_v48, %v1416_v35  ;;  %v6230_v61 = vsub.f32 %v6035_v34, %v1417_v36  ;;  %v5167_v26 = vld [vmem:[%s7676_s6 + $0x74] ss:$8 sps:$4 sm:$0xff]  }
 0x33a   : > { %v1359_v19 = vpop.xlane.xlu1 %1358  ;;  %v1361_v10 = vpop.xlane.xlu0 %1360 }
 0x33b   : > { %v1418_v4 = vmul.f32 0.0078125, %v1359_v19  ;;  %v1480_v46 = vmul.f32 %v6225_v47, %v6225_v47  ;;  %v1419_v9 = vmul.f32 0.0078125, %v1361_v10  ;;  %v1481_v13 = vmul.f32 %v6230_v61, %v6230_v61 }
 0x33d   : > { %1513 = vadd.xlane.f32.xlu0 %v1479_v39  ;;  %v6235_v12 = vsub.f32 %v6042_v55, %v1418_v4  ;;  %v6240_v34 = vsub.f32 %v6045_v44, %v1419_v9  ;;  %v5164_v44 = vld [vmem:[%s7676_s6 + $0x64] ss:$8 sps:$4 sm:$0xff]  }
 0x33e   : > { %v1363_v41 = vpop.xlane.xlu1 %1362  ;;  %v1365_v48 = vpop.xlane.xlu0 %1364  ;;  %4993 = vmatprep.subr.bf16.mxu1 %v5164_v44 }
 0x33f   : > { %v1420_v59 = vmul.f32 0.0078125, %v1363_v41  ;;  %v1482_v18 = vmul.f32 %v6235_v12, %v6235_v12  ;;  %v1421_v43 = vmul.f32 0.0078125, %v1365_v48  ;;  %v1483_v21 = vmul.f32 %v6240_v34, %v6240_v34 }
 0x341   : > { %1515 = vadd.xlane.f32.xlu0 %v1480_v46  ;;  %v6245_v55 = vsub.f32 %v6052_v2, %v1420_v59  ;;  %v6251_v17 = vsub.f32 %v6055_v56, %v1421_v43 }
 0x342   : > { %v1367_v5 = vpop.xlane.xlu1 %1366  ;;  %v1369_v0 = vpop.xlane.xlu0 %1368 }
 0x343   : > { %v1422_v62 = vmul.f32 0.0078125, %v1367_v5  ;;  %v1484_v2 = vmul.f32 %v6245_v55, %v6245_v55  ;;  %v1423_v27 = vmul.f32 0.0078125, %v1369_v0  ;;  %v1485_v36 = vmul.f32 %v6251_v17, %v6251_v17 }
 0x345   : > { %1517 = vadd.xlane.f32.xlu0 %v1481_v13  ;;  %v6274_v39 = vsub.f32 %v6062_v11, %v1422_v62  ;;  %v6283_v46 = vsub.f32 %v6065_v51, %v1423_v27  ;;  %v5498_v13 = vmov 0.0  }
 0x346   : > { %v1371_v22 = vpop.xlane.xlu1 %1370  ;;  %v1373_v50 = vpop.xlane.xlu0 %1372  ;;  %1890 = vmatprep.mubr.f32.mxu1 %v5498_v13 }
 0x347   : > { %v1424_v10 = vmul.f32 0.0078125, %v1371_v22  ;;  %v1486_v9 = vmul.f32 %v6274_v39, %v6274_v39  ;;  %v1425_v59 = vmul.f32 0.0078125, %v1373_v50 }
 0x349   : > { %1519 = vadd.xlane.f32.xlu0 %v1482_v18  ;;  %v1487_v18 = vmul.f32 %v6283_v46, %v6283_v46  ;;  %v6298_v43 = vsub.f32 %v6072_v23, %v1424_v10 }
 0x34a   : > { %v1375_v60 = vpop.xlane.xlu1 %1374  ;;  %v1377_v48 = vpop.xlane.xlu0 %1376 }
 0x34b   : > { %v1426_v15 = vmul.f32 0.0078125, %v1375_v60 }
 0x34d   : > { %1521 = vadd.xlane.f32.xlu0 %v1483_v21  ;;  %v6248_v30 = vsub.f32 %v6082_v31, %v1426_v15  ;;  %v5166_v31 = vld [vmem:[%s7676_s6 + $0x60] ss:$8 sps:$4 sm:$0xff]   ;;  %v1427_v21 = vmul.f32 0.0078125, %v1377_v48 }
 0x34e   : > { %v1379_v25 = vpop.xlane.xlu1 %1378  ;;  %4995 = vmatpush1.bf16.msra.mxu1 %v5166_v31  ;;  %v1381_v60 = vpop.xlane.xlu0 %1380 }
 0x34f   : > { %v1428_v40 = vmul.f32 0.0078125, %v1379_v25  ;;  %v1490_v16 = vmul.f32 %v6248_v30, %v6248_v30  ;;  %4997 = vmatprep.subr.bf16.mxu1 %v5167_v26  ;;  %v6303_v25 = vsub.f32 %v6075_v53, %v1425_v59 }
 0x351   : > { %1535 = vadd.xlane.f32.xlu1 %v1490_v16  ;;  %1523 = vadd.xlane.f32.xlu0 %v1484_v2  ;;  %v6264_v56 = vsub.f32 %v6092_v38, %v1428_v40  ;;  %v5169_v38 = vld [vmem:[%s7676_s6 + $0x70] ss:$8 sps:$4 sm:$0xff]   ;;  %v1429_v40 = vmul.f32 0.0078125, %v1381_v60  ;;  %v1489_v16 = vmul.f32 %v6303_v25, %v6303_v25  ;;  %v6313_v2 = vsub.f32 %v6085_v33, %v1427_v21 }
 0x352   : > { %v1383_v35 = vpop.xlane.xlu1 %1382  ;;  %4999 = vmatpush1.bf16.msra.mxu1 %v5169_v38  ;;  %v1385_v31 = vpop.xlane.xlu0 %1384 }
 0x353   : > { %v1430_v63 = vmul.f32 0.0078125, %v1383_v35  ;;  %v1492_v19 = vmul.f32 %v6264_v56, %v6264_v56  ;;  %v1431_v27 = vmul.f32 0.0078125, %v1385_v31  ;;  %v6318_v35 = vsub.f32 %v6095_v24, %v1429_v40 }
 0x355   : > { %1539 = vadd.xlane.f32.xlu1 %v1492_v19  ;;  %1525 = vadd.xlane.f32.xlu0 %v1485_v36  ;;  %v6280_v41 = vsub.f32 %v6102_v20, %v1430_v63  ;;  %v1493_v36 = vmul.f32 %v6318_v35, %v6318_v35  ;;  %v6328_v38 = vsub.f32 %v6105_v7, %v1431_v27 }
 0x356   : > { %v1387_v4 = vpop.xlane.xlu1 %1386 }
 0x357   : > { %v1432_v5 = vmul.f32 0.0078125, %v1387_v4  ;;  %v1494_v11 = vmul.f32 %v6280_v41, %v6280_v41 }
 0x359   : > { %1543 = vadd.xlane.f32.xlu1 %v1494_v11  ;;  %1527 = vadd.xlane.f32.xlu0 %v1486_v9  ;;  %v6291_v20 = vsub.f32 %v6111_v52, %v1432_v5  ;;  %v1488_v52 = vmul.f32 %v6298_v43, %v6298_v43 }
 0x35a   : > { %v1389_v51 = vpop.xlane.xlu1 %1388 }
 0x35b   : > { %v1496_v22 = vmul.f32 %v6291_v20, %v6291_v20  ;;  %v1433_v19 = vmul.f32 0.0078125, %v1389_v51 }
 0x35d   : > { %1547 = vadd.xlane.f32.xlu1 %v1496_v22  ;;  %1529 = vadd.xlane.f32.xlu0 %v1487_v18  ;;  %v6333_v5 = vsub.f32 %v6116_v29, %v1433_v19 }
 0x35e   : > { %v1391_v15 = vpop.xlane.xlu1 %1390 }
 0x35f   : > { %v1434_v0 = vmul.f32 0.0078125, %v1391_v15  ;;  %v1497_v51 = vmul.f32 %v6333_v5, %v6333_v5 }
 0x361   : > { %1531 = vadd.xlane.f32.xlu0 %v1488_v52  ;;  %v6306_v44 = vsub.f32 %v6122_v32, %v1434_v0  ;;  %v1491_v32 = vmul.f32 %v6313_v2, %v6313_v2 }
 0x362   : > { %v1393_v62 = vpop.xlane.xlu1 %1392 }
 0x363   : > { %v1498_v23 = vmul.f32 %v6306_v44, %v6306_v44  ;;  %v1435_v24 = vmul.f32 0.0078125, %v1393_v62 }
 0x365   : > { %1551 = vadd.xlane.f32.xlu1 %v1498_v23  ;;  %1533 = vadd.xlane.f32.xlu0 %v1489_v16  ;;  %v6343_v59 = vsub.f32 %v6129_v37, %v1435_v24 }
 0x366   : > { %v1395_v53 = vpop.xlane.xlu1 %1394 }
 0x367   : > { %v1436_v50 = vmul.f32 0.0078125, %v1395_v53 }
 0x369   : > { %1537 = vadd.xlane.f32.xlu0 %v1491_v32  ;;  %v6321_v26 = vsub.f32 %v6136_v28, %v1436_v50  ;;  %v1495_v28 = vmul.f32 %v6328_v38, %v6328_v38 }
 0x36a   : > { %v1397_v63 = vpop.xlane.xlu1 %1396 }
 0x36b   : > { %v1500_v33 = vmul.f32 %v6321_v26, %v6321_v26  ;;  %v1437_v48 = vmul.f32 0.0078125, %v1397_v63 }
 0x36d   : > { %1555 = vadd.xlane.f32.xlu1 %v1500_v33  ;;  %1541 = vadd.xlane.f32.xlu0 %v1493_v36  ;;  %v6348_v60 = vsub.f32 %v6142_v42, %v1437_v48 }
 0x36e   : > { %v1399_v4 = vpop.xlane.xlu1 %1398 }
 0x36f   : > { %v1438_v10 = vmul.f32 0.0078125, %v1399_v4  ;;  %v1501_v52 = vmul.f32 %v6348_v60, %v6348_v60 }
 0x371   : > { %1545 = vadd.xlane.f32.xlu0 %v1495_v28  ;;  %v6336_v11 = vsub.f32 %v6146_v3, %v1438_v10  ;;  %v1499_v3 = vmul.f32 %v6343_v59, %v6343_v59 }
 0x372   : > { %v1401_v9 = vpop.xlane.xlu1 %1400 }
 0x373   : > { %v1502_v7 = vmul.f32 %v6336_v11, %v6336_v11  ;;  %v1439_v29 = vmul.f32 0.0078125, %v1401_v9 }
 0x375   : > { %1559 = vadd.xlane.f32.xlu1 %v1502_v7  ;;  %1549 = vadd.xlane.f32.xlu0 %v1497_v51  ;;  %v6358_v62 = vsub.f32 %v6150_v45, %v1439_v29  ;;  %v6385_v29 = vld [vmem:[%s7672_s2 + $0x3] ss:$0 sm:$0xff] }
 0x376   : > { %v1403_v22 = vpop.xlane.xlu1 %1402 }
 0x377   : > { %v1440_v18 = vmul.f32 0.0078125, %v1403_v22  ;;  %v1503_v23 = vmul.f32 %v6358_v62, %v6358_v62 }
 0x379   : > { %1553 = vadd.xlane.f32.xlu0 %v1499_v3  ;;  %v6351_v15 = vsub.f32 %v6154_v14, %v1440_v18 }
 0x37a   : > { %v1405_v21 = vpop.xlane.xlu1 %1404 }
 0x37b   : > { %v1441_v0 = vmul.f32 0.0078125, %v1405_v21  ;;  %v1504_v37 = vmul.f32 %v6351_v15, %v6351_v15 }
 0x37d   : > { %1563 = vadd.xlane.f32.xlu1 %v1504_v37  ;;  %1557 = vadd.xlane.f32.xlu0 %v1501_v52  ;;  %v6363_v14 = vsub.f32 %v6158_v49, %v1441_v0  ;;  %v6391_v0 = vld [vmem:[%s7672_s2 + $0x4] ss:$0 sm:$0xff] }
 0x37e   : > { %v1407_v40 = vpop.xlane.xlu1 %1406 }
 0x37f   : > { %v1442_v42 = vmul.f32 0.0078125, %v1407_v40  ;;  %v1505_v27 = vmul.f32 %v6363_v14, %v6363_v14 }
 0x381   : > { %1561 = vadd.xlane.f32.xlu0 %v1503_v23  ;;  %v6366_v16 = vsub.f32 %v6162_v54, %v1442_v42 }
 0x382   : > { %v1409_v31 = vpop.xlane.xlu1 %1408 }
 0x383   : > { %v1443_v53 = vmul.f32 0.0078125, %v1409_v31  ;;  %v1506_v45 = vmul.f32 %v6366_v16, %v6366_v16 }
 0x385   : > { %1567 = vadd.xlane.f32.xlu1 %v1506_v45  ;;  %1565 = vadd.xlane.f32.xlu0 %v1505_v27  ;;  %v6373_v50 = vsub.f32 %v6166_v58, %v1443_v53  ;;  %v5499_v45 = vmov 0.0|0.0  }
 0x386   : > { %v1411_v32 = vpop.xlane.xlu1 %1410  ;;  %5000 = vmatprep.subr.bf16.mxu0 %v5499_v45 }
 0x387   : > { %v1444_v49 = vmul.f32 0.0078125, %v1411_v32  ;;  %v1507_v63 = vmul.f32 %v6373_v50, %v6373_v50 }
 0x389   : > { %1569 = vadd.xlane.f32.xlu0 %v1507_v63  ;;  %v6378_v54 = vsub.f32 %v6170_v1, %v1444_v49 }
 0x38b   : > { %v1508_v19 = vmul.f32 %v6378_v54, %v6378_v54 }
 0x38d   : > { %1571 = vadd.xlane.f32.xlu1 %v1508_v19 }
 0x3c2   : > { %v1510_v33 = vpop.xlane.xlu0 %1509 }
 0x3c3   : > { %v1573_v36 = vmul.f32 0.0078125, %v1510_v33 }
 0x3c5   : > { %v1605_v4 = vadd.f32 1e-05, %v1573_v36 }
 0x3c6   : > { %v1512_v24 = vpop.xlane.xlu0 %1511 }
 0x3c7   : > { %5170 = vrsqrt.f32 %v1605_v4  ;;  %v1574_v58 = vmul.f32 0.0078125, %v1512_v24 }
 0x3c9   : > { %v1606_v10 = vadd.f32 1e-05, %v1574_v58 }
 0x3ca   : > { %v1514_v28 = vpop.xlane.xlu0 %1513 }
 0x3cb   : > { %5172 = vrsqrt.f32 %v1606_v10  ;;  %v1575_v9 = vmul.f32 0.0078125, %v1514_v28  ;;  %v4244_v10 = vld [vmem:[%s7677_s7 + $0x10] sm:$0xff]  }
 0x3cd   : > { %v1607_v48 = vadd.f32 1e-05, %v1575_v9 }
 0x3ce   : > { %v1516_v7 = vpop.xlane.xlu0 %1515 }
 0x3cf   : > { %5174 = vrsqrt.f32 %v1607_v48  ;;  %v1576_v51 = vmul.f32 0.0078125, %v1516_v7 }
 0x3d1   : > { %v5171_v1 = vpop.eup %5170  ;;  %v1608_v22 = vadd.f32 1e-05, %v1576_v51 }
 0x3d2   : > { %v1669_v18 = vmul.f32 %v5171_v1, %v6210_v6  ;;  %v1518_v3 = vpop.xlane.xlu0 %1517  ;;  %v4099_v6 = vld [vmem:[%s7677_s7] sm:$0xff]  }
 0x3d3   : > { %5176 = vrsqrt.f32 %v1608_v22  ;;  %v1577_v21 = vmul.f32 0.0078125, %v1518_v3  ;;  %5002 = vmatpush1.bf16.msra.mxu0 %v4099_v6  ;;  %v4245_v22 = vld [vmem:[%s7677_s7 + $0x18] sm:$0xff]  }
 0x3d4   : > { %v1701_v37 = vmul.f32 %v1669_v18, %v6385_v29  ;;  %5003 = vmatprep.subr.bf16.mxu0 %v5499_v45 }
 0x3d5   : > { %v5173_v52 = vpop.eup %5172  ;;  %v1609_v40 = vadd.f32 1e-05, %v1577_v21 }
 0x3d6   : > { %v1520_v42 = vpop.xlane.xlu0 %1519  ;;  %v6395_v23 = vadd.f32 %v1701_v37, %v6391_v0  ;;  %v1670_v31 = vmul.f32 %v5173_v52, %v6215_v8  ;;  %v4243_v8 = vld [vmem:[%s7677_s7 + $0x8] sm:$0xff]  }
 0x3d7   : > { %5178 = vrsqrt.f32 %v1609_v40  ;;  %v1578_v53 = vmul.f32 0.0078125, %v1520_v42  ;;  %5005 = vmatpush1.bf16.msra.mxu0 %v4243_v8  ;;  %v4246_v42 = vld [vmem:[%s7677_s7 + $0x20] sm:$0xff]   ;;  %v4247_v8 = vld [vmem:[%s7677_s7 + $0x28] sm:$0xff]  }
 0x3d8   : > { %1891 = vmatmul.mubr.f32.vlgmr.msra.gmra.mrb[48].mxu1 %v6395_v23  ;;  %v1702_v27 = vmul.f32 %v1670_v31, %v6385_v29  ;;  %5006 = vmatprep.subr.bf16.mxu0 %v5499_v45 }
 0x3d9   : > { %v5175_v32 = vpop.eup %5174  ;;  %v1610_v49 = vadd.f32 1e-05, %v1578_v53  ;;  %1896 = vmatprep.mubr.f32.mxu1 %v5498_v13 }
 0x3da   : > { %v1522_v63 = vpop.xlane.xlu0 %1521  ;;  %v6410_v19 = vadd.f32 %v1702_v27, %v6391_v0  ;;  %v1671_v33 = vmul.f32 %v5175_v32, %v6220_v57 }
 0x3db   : > { %5180 = vrsqrt.f32 %v1610_v49  ;;  %v1579_v36 = vmul.f32 0.0078125, %v1522_v63  ;;  %5008 = vmatpush1.bf16.msra.mxu0 %v4244_v10  ;;  %v4248_v10 = vld [vmem:[%s7677_s7 + $0x30] sm:$0xff]  }
 0x3dc   : > { %1897 = vmatmul.mubr.f32.gmra.mrb[50].mxu1 %v6410_v19  ;;  %v1703_v4 = vmul.f32 %v1671_v33, %v6385_v29  ;;  %5009 = vmatprep.subr.bf16.mxu0 %v5499_v45 }
 0x3dd   : > { %v5177_v24 = vpop.eup %5176  ;;  %v1611_v58 = vadd.f32 1e-05, %v1579_v36  ;;  %1902 = vmatprep.mubr.f32.mxu1 %v5498_v13 }
 0x3de   : > { %v1524_v28 = vpop.xlane.xlu0 %1523  ;;  %v6421_v57 = vadd.f32 %v1703_v4, %v6391_v0  ;;  %v1672_v9 = vmul.f32 %v5177_v24, %v6225_v47  ;;  %v1536_v4 = vpop.xlane.xlu1 %1535 }
 0x3df   : > { %5182 = vrsqrt.f32 %v1611_v58  ;;  %v1580_v48 = vmul.f32 0.0078125, %v1524_v28  ;;  %5011 = vmatpush1.bf16.msra.mxu0 %v4245_v22 }
 0x3e0   : > { %1903 = vmatmul.mubr.f32.gmra.mrb[52].mxu1 %v6421_v57  ;;  %v1704_v7 = vmul.f32 %v1672_v9, %v6385_v29  ;;  %5012 = vmatprep.subr.bf16.mxu0 %v5499_v45 }
 0x3e1   : > { %v5179_v51 = vpop.eup %5178  ;;  %v1612_v1 = vadd.f32 1e-05, %v1580_v48  ;;  %1908 = vmatprep.mubr.f32.mxu1 %v5498_v13  ;;  %v1586_v48 = vmul.f32 0.0078125, %v1536_v4  ;;  %v4251_v4 = vld [vmem:[%s7677_s7 + $0x48] sm:$0xff]  }
 0x3e2   : > { %v1526_v18 = vpop.xlane.xlu0 %1525  ;;  %v6432_v47 = vadd.f32 %v1704_v7, %v6391_v0  ;;  %v1673_v3 = vmul.f32 %v5179_v51, %v6230_v61 }
 0x3e3   : > { %v1581_v21 = vmul.f32 0.0078125, %v1526_v18  ;;  %5184 = vrsqrt.f32 %v1612_v1  ;;  %5014 = vmatpush1.bf16.msra.mxu0 %v4246_v42  ;;  %v4249_v18 = vld [vmem:[%s7677_s7 + $0x38] sm:$0xff]  }
 0x3e4   : > { %1909 = vmatmul.mubr.f32.gmra.mrb[54].mxu1 %v6432_v47  ;;  %v1705_v37 = vmul.f32 %v1673_v3, %v6385_v29  ;;  %5015 = vmatprep.subr.bf16.mxu0 %v5499_v45 }
 0x3e5   : > { %v5181_v52 = vpop.eup %5180  ;;  %v1613_v40 = vadd.f32 1e-05, %v1581_v21  ;;  %1914 = vmatprep.mubr.f32.mxu1 %v5498_v13 }
 0x3e6   : > { %v1528_v31 = vpop.xlane.xlu0 %1527  ;;  %v6443_v61 = vadd.f32 %v1705_v37, %v6391_v0  ;;  %v1674_v6 = vmul.f32 %v5181_v52, %v6235_v12  ;;  %v1618_v37 = vadd.f32 1e-05, %v1586_v48 }
 0x3e7   : > { %v1582_v53 = vmul.f32 0.0078125, %v1528_v31  ;;  %5186 = vrsqrt.f32 %v1613_v40  ;;  %5017 = vmatpush1.bf16.msra.mxu0 %v4247_v8  ;;  %v1540_v40 = vpop.xlane.xlu1 %1539 }
 0x3e8   : > { %1915 = vmatmul.mubr.f32.gmra.mrb[56].mxu1 %v6443_v61  ;;  %v1706_v27 = vmul.f32 %v1674_v6, %v6385_v29  ;;  %5018 = vmatprep.subr.bf16.mxu0 %v5499_v45  ;;  %v4250_v6 = vld [vmem:[%s7677_s7 + $0x40] sm:$0xff]  }
 0x3e9   : > { %v5183_v32 = vpop.eup %5182  ;;  %v1614_v49 = vadd.f32 1e-05, %v1582_v53  ;;  %1920 = vmatprep.mubr.f32.mxu1 %v5498_v13 }
 0x3ea   : > { %v1530_v63 = vpop.xlane.xlu0 %1529  ;;  %v6454_v12 = vadd.f32 %v1706_v27, %v6391_v0  ;;  %v1675_v33 = vmul.f32 %v5183_v32, %v6240_v34 }
 0x3eb   : > { %v1583_v36 = vmul.f32 0.0078125, %v1530_v63  ;;  %5188 = vrsqrt.f32 %v1614_v49  ;;  %5020 = vmatpush1.bf16.msra.mxu0 %v4248_v10  ;;  %v1588_v49 = vmul.f32 0.0078125, %v1540_v40  ;;  %v4253_v40 = vld [vmem:[%s7677_s7 + $0x58] sm:$0xff]  }
 0x3ec   : > { %1921 = vmatmul.mubr.f32.gmra.mrb[58].mxu1 %v6454_v12  ;;  %v1707_v24 = vmul.f32 %v1675_v33, %v6385_v29  ;;  %5021 = vmatprep.subr.bf16.mxu0 %v5499_v45 }
 0x3ed   : > { %v1615_v58 = vadd.f32 1e-05, %v1583_v36  ;;  %1926 = vmatprep.mubr.f32.mxu1 %v5498_v13  ;;  %v5185_v28 = vpop.eup %5184  ;;  %v1620_v10 = vadd.f32 1e-05, %v1588_v49 }
 0x3ee   : > { %v1532_v9 = vpop.xlane.xlu0 %1531  ;;  %v6465_v34 = vadd.f32 %v1707_v24, %v6391_v0  ;;  %v1676_v51 = vmul.f32 %v5185_v28, %v6245_v55 }
 0x3ef   : > { %v1584_v7 = vmul.f32 0.0078125, %v1532_v9  ;;  %5190 = vrsqrt.f32 %v1615_v58  ;;  %5023 = vmatpush1.bf16.msra.mxu0 %v4249_v18  ;;  %v1544_v9 = vpop.xlane.xlu1 %1543 }
 0x3f0   : > { %1927 = vmatmul.mubr.f32.gmra.mrb[60].mxu1 %v6465_v34  ;;  %v1708_v22 = vmul.f32 %v1676_v51, %v6385_v29  ;;  %5024 = vmatprep.subr.bf16.mxu0 %v5499_v45  ;;  %v4252_v51 = vld [vmem:[%s7677_s7 + $0x50] sm:$0xff]   ;;  %v1590_v18 = vmul.f32 0.0078125, %v1544_v9 }
 0x3f1   : > { %v1616_v1 = vadd.f32 1e-05, %v1584_v7  ;;  %1932 = vmatprep.mubr.f32.mxu1 %v5498_v13  ;;  %v5187_v3 = vpop.eup %5186 }
 0x3f2   : > { %v1534_v21 = vpop.xlane.xlu0 %1533  ;;  %v6476_v52 = vadd.f32 %v1708_v22, %v6391_v0  ;;  %v1677_v42 = vmul.f32 %v5187_v3, %v6251_v17 }
 0x3f3   : > { %5192 = vrsqrt.f32 %v1616_v1  ;;  %v1585_v55 = vmul.f32 0.0078125, %v1534_v21  ;;  %5026 = vmatpush1.bf16.msra.mxu0 %v4250_v6 }
 0x3f4   : > { %1933 = vmatmul.mubr.f32.gmra.mrb[62].mxu1 %v6476_v52  ;;  %v1709_v32 = vmul.f32 %v1677_v42, %v6385_v29  ;;  %5194 = vrsqrt.f32 %v1618_v37  ;;  %5027 = vmatprep.subr.bf16.mxu0 %v5499_v45 }
 0x3f5   : > { %v1617_v31 = vadd.f32 1e-05, %v1585_v55  ;;  %v5189_v53 = vpop.eup %5188  ;;  %1938 = vmatprep.mubr.f32.mxu1 %v5498_v13 }
 0x3f6   : > { %v1538_v27 = vpop.xlane.xlu0 %1537  ;;  %v1678_v17 = vmul.f32 %v5189_v53, %v6274_v39  ;;  %v6488_v63 = vadd.f32 %v1709_v32, %v6391_v0 }
 0x3f7   : > { %v1587_v8 = vmul.f32 0.0078125, %v1538_v27  ;;  %5196 = vrsqrt.f32 %v1617_v31  ;;  %5029 = vmatpush1.bf16.msra.mxu0 %v4251_v4  ;;  %v1622_v31 = vadd.f32 1e-05, %v1590_v18  ;;  %v1548_v27 = vpop.xlane.xlu1 %1547 }
 0x3f8   : > { %v1710_v36 = vmul.f32 %v1678_v17, %v6385_v29  ;;  %1939 = vmatmul.mubr.f32.gmra.mrb[64].mxu1 %v6488_v63  ;;  %5030 = vmatprep.subr.bf16.mxu0 %v5499_v45  ;;  %v4254_v17 = vld [vmem:[%s7677_s7 + $0x60] sm:$0xff]  }
 0x3f9   : > { %v1619_v33 = vadd.f32 1e-05, %v1587_v8  ;;  %v5191_v24 = vpop.eup %5190  ;;  %1944 = vmatprep.mubr.f32.mxu1 %v5498_v13 }
 0x3fa   : > { %v1542_v58 = vpop.xlane.xlu0 %1541  ;;  %v6498_v28 = vadd.f32 %v1710_v36, %v6391_v0  ;;  %v1679_v48 = vmul.f32 %v5191_v24, %v6283_v46 }
 0x3fb   : > { %5198 = vrsqrt.f32 %v1619_v33  ;;  %v1589_v39 = vmul.f32 0.0078125, %v1542_v58  ;;  %5032 = vmatpush1.bf16.msra.mxu0 %v4252_v51  ;;  %v1592_v33 = vmul.f32 0.0078125, %v1548_v27 }
 0x3fc   : > { %1945 = vmatmul.mubr.f32.gmra.mrb[66].mxu1 %v6498_v28  ;;  %v1711_v1 = vmul.f32 %v1679_v48, %v6385_v29  ;;  %5200 = vrsqrt.f32 %v1620_v10  ;;  %5033 = vmatprep.subr.bf16.mxu0 %v5499_v45  ;;  %v4255_v10 = vld [vmem:[%s7677_s7 + $0x68] sm:$0xff]   ;;  %v1552_v48 = vpop.xlane.xlu1 %1551 }
 0x3fd   : > { %v5193_v7 = vpop.eup %5192  ;;  %v1621_v3 = vadd.f32 1e-05, %v1589_v39  ;;  %1950 = vmatprep.mubr.f32.mxu1 %v5498_v13  ;;  %v1624_v39 = vadd.f32 1e-05, %v1592_v33  ;;  %v1594_v18 = vmul.f32 0.0078125, %v1552_v48 }
 0x3fe   : > { %v1680_v22 = vmul.f32 %v5193_v7, %v6298_v43  ;;  %v1546_v46 = vpop.xlane.xlu0 %1545  ;;  %v6510_v21 = vadd.f32 %v1711_v1, %v6391_v0  ;;  %v5195_v55 = vpop.eup %5194 }
 0x3ff   : > { %5202 = vrsqrt.f32 %v1621_v3  ;;  %v1591_v6 = vmul.f32 0.0078125, %v1546_v46  ;;  %v1682_v32 = vmul.f32 %v5195_v55, %v6248_v30  ;;  %5035 = vmatpush1.bf16.msra.mxu0 %v4253_v40 }
 0x400   : > { %v1712_v37 = vmul.f32 %v1680_v22, %v6385_v29  ;;  %1951 = vmatmul.mubr.f32.gmra.mrb[68].mxu1 %v6510_v21  ;;  %5036 = vmatprep.subr.bf16.mxu0 %v5499_v45  ;;  %5204 = vrsqrt.f32 %v1622_v31  ;;  %v4256_v22 = vld [vmem:[%s7677_s7 + $0x70] sm:$0xff]  }
 0x401   : > { %v5197_v43 = vpop.eup %5196  ;;  %1956 = vmatprep.mubr.f32.mxu1 %v5498_v13  ;;  %v1623_v36 = vadd.f32 1e-05, %v1591_v6  ;;  %v1714_v4 = vmul.f32 %v1682_v32, %v6385_v29  ;;  %v1556_v6 = vpop.xlane.xlu1 %1555 }
 0x402   : > { %v6519_v42 = vadd.f32 %v1712_v37, %v6391_v0  ;;  %v1681_v53 = vmul.f32 %v5197_v43, %v6303_v25  ;;  %v1550_v30 = vpop.xlane.xlu0 %1549  ;;  %v1626_v43 = vadd.f32 1e-05, %v1594_v18 }
 0x403   : > { %5038 = vmatpush1.bf16.msra.mxu0 %v4254_v17  ;;  %5206 = vrsqrt.f32 %v1623_v36  ;;  %v1593_v9 = vmul.f32 0.0078125, %v1550_v30  ;;  %v6543_v7 = vadd.f32 %v1714_v4, %v6391_v0 }
 0x404   : > { %v1713_v8 = vmul.f32 %v1681_v53, %v6385_v29  ;;  %1957 = vmatmul.mubr.f32.gmra.mrb[70].mxu1 %v6519_v42  ;;  %5039 = vmatprep.subr.bf16.mxu0 %v5499_v45  ;;  %5208 = vrsqrt.f32 %v1624_v39 }
 0x405   : > { %v5199_v49 = vpop.eup %5198  ;;  %1962 = vmatprep.mubr.f32.mxu1 %v5498_v13  ;;  %v1625_v3 = vadd.f32 1e-05, %v1593_v9 }
 0x406   : > { %v6532_v25 = vadd.f32 %v1713_v8, %v6391_v0  ;;  %v1683_v24 = vmul.f32 %v5199_v49, %v6313_v2  ;;  %v5201_v58 = vpop.eup %5200  ;;  %v1554_v46 = vpop.xlane.xlu0 %1553 }
 0x407   : > { %v1684_v51 = vmul.f32 %v5201_v58, %v6264_v56  ;;  %5041 = vmatpush1.bf16.msra.mxu0 %v4255_v10  ;;  %5210 = vrsqrt.f32 %v1625_v3  ;;  %v1595_v31 = vmul.f32 0.0078125, %v1554_v46 }
 0x408   : > { %1963 = vmatmul.mubr.f32.gmra.mrb[72].mxu1 %v6532_v25  ;;  %v1715_v2 = vmul.f32 %v1683_v24, %v6385_v29  ;;  %5042 = vmatprep.subr.bf16.mxu0 %v5499_v45  ;;  %5212 = vrsqrt.f32 %v1626_v43  ;;  %v1560_v24 = vpop.xlane.xlu1 %1559 }
 0x409   : > { %1968 = vmatprep.mubr.f32.mxu1 %v5498_v13  ;;  %v5203_v1 = vpop.eup %5202  ;;  %v1716_v56 = vmul.f32 %v1684_v51, %v6385_v29  ;;  %v1627_v49 = vadd.f32 1e-05, %v1595_v31 }
 0x40a   : > { %v6554_v37 = vadd.f32 %v1715_v2, %v6391_v0  ;;  %v1685_v55 = vmul.f32 %v5203_v1, %v6318_v35  ;;  %v5205_v40 = vpop.eup %5204  ;;  %v1558_v8 = vpop.xlane.xlu0 %1557 }
 0x40b   : > { %5044 = vmatpush1.bf16.msra.mxu0 %v4256_v22  ;;  %v6562_v53 = vadd.f32 %v1716_v56, %v6391_v0  ;;  %v1686_v32 = vmul.f32 %v5205_v40, %v6280_v41  ;;  %5214 = vrsqrt.f32 %v1627_v49  ;;  %v1597_v4 = vmul.f32 0.0078125, %v1558_v8 }
 0x40c   : > { %1969 = vmatmul.mubr.f32.gmra.mrb[74].mxu1 %v6543_v7  ;;  %5045 = vmatprep.subr.bf16.mxu0 %v5499_v45  ;;  %v1717_v27 = vmul.f32 %v1685_v55, %v6385_v29  ;;  %v1596_v45 = vmul.f32 0.0078125, %v1556_v6  ;;  %v1564_v46 = vpop.xlane.xlu1 %1563 }
 0x40d   : > { %1974 = vmatprep.mubr.f32.mxu1 %v5498_v13  ;;  %v5207_v35 = vpop.eup %5206  ;;  %v1718_v33 = vmul.f32 %v1686_v32, %v6385_v29  ;;  %v1629_v48 = vadd.f32 1e-05, %v1597_v4 }
 0x40e   : > { %v6569_v17 = vadd.f32 %v1717_v27, %v6391_v0  ;;  %v1687_v36 = vmul.f32 %v5207_v35, %v6328_v38  ;;  %v5209_v30 = vpop.eup %5208  ;;  %v1628_v41 = vadd.f32 1e-05, %v1596_v45  ;;  %v1598_v38 = vmul.f32 0.0078125, %v1560_v24  ;;  %v1562_v2 = vpop.xlane.xlu0 %1561  ;;  %v4257_v24 = vld [vmem:[%s7677_s7 + $0x78] sm:$0xff]  }
 0x40f   : > { %v6576_v58 = vadd.f32 %v1718_v33, %v6391_v0  ;;  %v1688_v39 = vmul.f32 %v5209_v30, %v6291_v20  ;;  %v1599_v3 = vmul.f32 0.0078125, %v1562_v2  ;;  %5047 = vmatpush1.bf16.msra.mxu0 %v4257_v24 }
 0x410   : > { %1975 = vmatmul.mubr.f32.gmra.mrb[76].mxu1 %v6554_v37  ;;  %v1719_v10 = vmul.f32 %v1687_v36, %v6385_v29  ;;  %5216 = vrsqrt.f32 %v1628_v41  ;;  %v1630_v20 = vadd.f32 1e-05, %v1598_v38 }
 0x411   : > { %1980 = vmatprep.mubr.f32.mxu1 %v5498_v13  ;;  %v5211_v9 = vpop.eup %5210  ;;  %v1720_v1 = vmul.f32 %v1688_v39, %v6385_v29  ;;  %5218 = vrsqrt.f32 %v1629_v48  ;;  %v1631_v31 = vadd.f32 1e-05, %v1599_v3 }
 0x412   : > { %v6583_v51 = vadd.f32 %v1719_v10, %v6391_v0  ;;  %v1689_v22 = vmul.f32 %v5211_v9, %v6333_v5  ;;  %v5213_v18 = vpop.eup %5212  ;;  %5220 = vrsqrt.f32 %v1630_v20  ;;  %v1600_v5 = vmul.f32 0.0078125, %v1564_v46  ;;  %v1566_v6 = vpop.xlane.xlu0 %1565 }
 0x413   : > { %v6590_v56 = vadd.f32 %v1720_v1, %v6391_v0  ;;  %v1690_v40 = vmul.f32 %v5213_v18, %v6306_v44  ;;  %5222 = vrsqrt.f32 %v1631_v31  ;;  %v1601_v49 = vmul.f32 0.0078125, %v1566_v6  ;;  %v1568_v8 = vpop.xlane.xlu1 %1567 }
 0x414   : > { %1981 = vmatmul.mubr.f32.gmra.mrb[78].mxu1 %v6562_v53  ;;  %v1721_v55 = vmul.f32 %v1689_v22, %v6385_v29  ;;  %v1632_v44 = vadd.f32 1e-05, %v1600_v5 }
 0x415   : > { %1986 = vmatprep.mubr.f32.mxu1 %v5498_v13  ;;  %v5215_v43 = vpop.eup %5214  ;;  %v1722_v32 = vmul.f32 %v1690_v40, %v6385_v29  ;;  %v1633_v4 = vadd.f32 1e-05, %v1601_v49 }
 0x416   : > { %v6597_v27 = vadd.f32 %v1721_v55, %v6391_v0  ;;  %v1691_v35 = vmul.f32 %v5215_v43, %v6343_v59  ;;  %5224 = vrsqrt.f32 %v1632_v44  ;;  %v1602_v59 = vmul.f32 0.0078125, %v1568_v8  ;;  %v1570_v10 = vpop.xlane.xlu0 %1569 }
 0x417   : > { %v6604_v33 = vadd.f32 %v1722_v32, %v6391_v0  ;;  %5226 = vrsqrt.f32 %v1633_v4  ;;  %v1603_v2 = vmul.f32 0.0078125, %v1570_v10 }
 0x418   : > { %1987 = vmatmul.mubr.f32.gmra.mrb[80].mxu1 %v6569_v17  ;;  %v1723_v36 = vmul.f32 %v1691_v35, %v6385_v29  ;;  %v1634_v48 = vadd.f32 1e-05, %v1602_v59 }
 0x419   : > { %1992 = vmatprep.mubr.f32.mxu1 %v5498_v13 }
 0x41a   : > { %v5217_v45 = vpop.eup %5216  ;;  %v6614_v39 = vadd.f32 %v1723_v36, %v6391_v0  ;;  %v1572_v1 = vpop.xlane.xlu1 %1571  ;;  %5228 = vrsqrt.f32 %v1634_v48 }
 0x41b   : > { %v1692_v30 = vmul.f32 %v5217_v45, %v6321_v26  ;;  %v5219_v41 = vpop.eup %5218  ;;  %v1604_v46 = vmul.f32 0.0078125, %v1572_v1 }
 0x41c   : > { %1993 = vmatmul.mubr.f32.gmra.mrb[82].mxu1 %v6576_v58  ;;  %v1693_v26 = vmul.f32 %v5219_v41, %v6348_v60  ;;  %v5221_v38 = vpop.eup %5220  ;;  %v1635_v60 = vadd.f32 1e-05, %v1603_v2  ;;  %v4015_v2 = vld [vmem:[%s7672_s2 + $0x5] ss:$8 sm:$0x3] }
 0x41d   : > { %1998 = vmatprep.mubr.f32.mxu1 %v5498_v13  ;;  %v1724_v9 = vmul.f32 %v1692_v30, %v6385_v29  ;;  %v1694_v20 = vmul.f32 %v5221_v38, %v6336_v11  ;;  %v5223_v3 = vpop.eup %5222  ;;  %v1636_v11 = vadd.f32 1e-05, %v1604_v46  ;;  %v1816_v38 = vlaneseq }
 0x41e   : > { %v1725_v18 = vmul.f32 %v1693_v26, %v6385_v29  ;;  %v1695_v43 = vmul.f32 %v5223_v3, %v6358_v62  ;;  %5230 = vrsqrt.f32 %v1635_v60 }
 0x41f   : > { %v6621_v22 = vadd.f32 %v1724_v9, %v6391_v0  ;;  %v1726_v40 = vmul.f32 %v1694_v20, %v6385_v29  ;;  %5232 = vrsqrt.f32 %v1636_v11 }
 0x420   : > { %1999 = vmatmul.mubr.f32.gmra.mrb[84].mxu1 %v6583_v51  ;;  %v6628_v55 = vadd.f32 %v1725_v18, %v6391_v0  ;;  %v5225_v5 = vpop.eup %5224  ;;  %v1727_v6 = vmul.f32 %v1695_v43, %v6385_v29 }
 0x421   : > { %2004 = vmatprep.mubr.f32.mxu1 %v5498_v13  ;;  %v6635_v31 = vadd.f32 %v1726_v40, %v6391_v0  ;;  %v1696_v32 = vmul.f32 %v5225_v5, %v6351_v15  ;;  %v5227_v35 = vpop.eup %5226 }
 0x422   : > { %v6642_v62 = vadd.f32 %v1727_v6, %v6391_v0  ;;  %v1697_v44 = vmul.f32 %v5227_v35, %v6363_v14 }
 0x423   : > { %v1728_v45 = vmul.f32 %v1696_v32, %v6385_v29 }
 0x424   : > { %2005 = vmatmul.mubr.f32.gmra.mrb[86].mxu1 %v6590_v56  ;;  %v5229_v49 = vpop.eup %5228  ;;  %v1729_v8 = vmul.f32 %v1697_v44, %v6385_v29 }
 0x425   : > { %2010 = vmatprep.mubr.f32.mxu1 %v5498_v13  ;;  %v6649_v15 = vadd.f32 %v1728_v45, %v6391_v0  ;;  %v1698_v36 = vmul.f32 %v5229_v49, %v6366_v16 }
 0x426   : > { %v6656_v41 = vadd.f32 %v1729_v8, %v6391_v0 }
 0x427   : > { %v1730_v14 = vmul.f32 %v1698_v36, %v6385_v29 }
 0x428   : > { %2011 = vmatmul.mubr.f32.gmra.mrb[88].mxu1 %v6597_v27  ;;  %v5231_v30 = vpop.eup %5230 }
 0x429   : > { %2016 = vmatprep.mubr.f32.mxu1 %v5498_v13  ;;  %v1699_v59 = vmul.f32 %v5231_v30, %v6373_v50  ;;  %v5233_v4 = vpop.eup %5232  ;;  %v6663_v24 = vadd.f32 %v1730_v14, %v6391_v0 }
 0x42a   : > { %v1700_v10 = vmul.f32 %v5233_v4, %v6378_v54  ;;  %v1817_v54 = vshrl.u32 %v1816_v38, 7 }
 0x42b   : > { %v1731_v16 = vmul.f32 %v1699_v59, %v6385_v29 }
 0x42c   : > { %2017 = vmatmul.mubr.f32.gmra.mrb[90].mxu1 %v6604_v33  ;;  %v1732_v50 = vmul.f32 %v1700_v10, %v6385_v29  ;;  %v1818_v48 = vsub.s32 0, %v1817_v54  ;;  %v1822_v1 = vsub.s32 1, %v1817_v54 }
 0x42d   : > { %2022 = vmatprep.mubr.f32.mxu1 %v5498_v13  ;;  %v6670_v9 = vadd.f32 %v1731_v16, %v6391_v0 }
 0x42e   : > { %v6676_v26 = vadd.f32 %v1732_v50, %v6391_v0  ;;  %v6683_v18 = vrot.slane %v4015_v2, %v1818_v48  ;;  %v6685_v29 = vrot.slane %v4015_v2, %v1822_v1 }
 0x430   : > { %2023 = vmatmul.mubr.f32.gmra.mrb[92].mxu1 %v6614_v39 }
 0x431   : > { %2028 = vmatprep.mubr.f32.mxu1 %v5498_v13 }
 0x434   : > { %2029 = vmatmul.mubr.f32.gmra.mrb[94].mxu1 %v6621_v22 }
 0x435   : > { %2034 = vmatprep.mubr.f32.mxu1 %v5498_v13 }
 0x438   : > { %2035 = vmatmul.mubr.f32.gmra.mrb[96].mxu1 %v6628_v55 }
 0x439   : > { %2040 = vmatprep.mubr.f32.mxu1 %v5498_v13 }
 0x43c   : > { %2041 = vmatmul.mubr.f32.gmra.mrb[98].mxu1 %v6635_v31 }
 0x43d   : > { %2046 = vmatprep.mubr.f32.mxu1 %v5498_v13 }
 0x440   : > { %2047 = vmatmul.mubr.f32.gmra.mrb[100].mxu1 %v6642_v62 }
 0x441   : > { %2052 = vmatprep.mubr.f32.mxu1 %v5498_v13 }
 0x444   : > { %2053 = vmatmul.mubr.f32.gmra.mrb[102].mxu1 %v6649_v15 }
 0x445   : > { %2058 = vmatprep.mubr.f32.mxu1 %v5498_v13 }
 0x448   : > { %2059 = vmatmul.mubr.f32.gmra.mrb[104].mxu1 %v6656_v41 }
 0x449   : > { %2064 = vmatprep.mubr.f32.mxu1 %v5498_v13 }
 0x44c   : > { %2065 = vmatmul.mubr.f32.gmra.mrb[106].mxu1 %v6663_v24 }
 0x44d   : > { %2070 = vmatprep.mubr.f32.mxu1 %v5498_v13 }
 0x450   : > { %2071 = vmatmul.mubr.f32.gmra.mrb[108].mxu1 %v6670_v9 }
 0x451   : > { %2076 = vmatprep.mubr.f32.mxu1 %v5498_v13 }
 0x454   : > { %2077 = vmatmul.mubr.f32.gmra.mrb[110].mxu1 %v6676_v26 }
 0x4ab   : > { %v1892_v20 = vpop.f32.mrb[48].mxu1 }
 0x4ac   : > { %v1893_v13 = vadd.f32 %v1892_v20, %v6683_v18  ;;  %v1894_v0 = vpop.f32.mrb[49].mxu1 }
 0x4ad   : > { %v1895_v3 = vadd.f32 %v1894_v0, %v6685_v29 }
 0x4ae   : > { %v2083_v40 = vmax.f32 %v1893_v13, 0.0 }
 0x4af   : > { %v2084_v60 = vmax.f32 %v1895_v3, 0.0  ;;  %v1898_v46 = vpop.f32.mrb[50].mxu1 }
 0x4b0   : > { %v1899_v43 = vadd.f32 %v1898_v46, %v6683_v18  ;;  %v1900_v5 = vpop.f32.mrb[51].mxu1 }
 0x4b1   : > { %v1901_v11 = vadd.f32 %v1900_v5, %v6685_v29  ;;  %2276 = vmatprep.mubr.f32.mxu0 %v2084_v60 }
 0x4b2   : > { %2277 = vmatmul.mubr.f32.vlgmr.msra.gmra.mrb[48].mxu0 %v2083_v40  ;;  %v2085_v35 = vmax.f32 %v1899_v43, 0.0 }
 0x4b3   : > { %v2086_v6 = vmax.f32 %v1901_v11, 0.0  ;;  %v1904_v32 = vpop.f32.mrb[52].mxu1 }
 0x4b4   : > { %v1905_v45 = vadd.f32 %v1904_v32, %v6683_v18  ;;  %v1906_v44 = vpop.f32.mrb[53].mxu1 }
 0x4b5   : > { %v1907_v49 = vadd.f32 %v1906_v44, %v6685_v29  ;;  %2281 = vmatprep.mubr.f32.mxu0 %v2086_v6 }
 0x4b6   : > { %2282 = vmatmul.mubr.f32.gmra.mrb[50].mxu0 %v2085_v35  ;;  %v2087_v30 = vmax.f32 %v1905_v45, 0.0 }
 0x4b7   : > { %v2088_v8 = vmax.f32 %v1907_v49, 0.0  ;;  %v1910_v36 = vpop.f32.mrb[54].mxu1 }
 0x4b8   : > { %v1911_v14 = vadd.f32 %v1910_v36, %v6683_v18  ;;  %v1912_v59 = vpop.f32.mrb[55].mxu1 }
 0x4b9   : > { %v1913_v4 = vadd.f32 %v1912_v59, %v6685_v29  ;;  %2286 = vmatprep.mubr.f32.mxu0 %v2088_v8 }
 0x4ba   : > { %2287 = vmatmul.mubr.f32.gmra.mrb[52].mxu0 %v2087_v30  ;;  %v2089_v50 = vmax.f32 %v1911_v14, 0.0 }
 0x4bb   : > { %v2090_v16 = vmax.f32 %v1913_v4, 0.0  ;;  %v1916_v10 = vpop.f32.mrb[56].mxu1 }
 0x4bc   : > { %v1917_v54 = vadd.f32 %v1916_v10, %v6683_v18  ;;  %v1918_v48 = vpop.f32.mrb[57].mxu1 }
 0x4bd   : > { %v1919_v2 = vadd.f32 %v1918_v48, %v6685_v29  ;;  %2291 = vmatprep.mubr.f32.mxu0 %v2090_v16 }
 0x4be   : > { %2292 = vmatmul.mubr.f32.gmra.mrb[54].mxu0 %v2089_v50  ;;  %v2091_v13 = vmax.f32 %v1917_v54, 0.0 }
 0x4bf   : > { %v2092_v1 = vmax.f32 %v1919_v2, 0.0  ;;  %v1922_v20 = vpop.f32.mrb[58].mxu1 }
 0x4c0   : > { %v1923_v0 = vadd.f32 %v1922_v20, %v6683_v18  ;;  %v1924_v3 = vpop.f32.mrb[59].mxu1 }
 0x4c1   : > { %v1925_v60 = vadd.f32 %v1924_v3, %v6685_v29  ;;  %2296 = vmatprep.mubr.f32.mxu0 %v2092_v1 }
 0x4c2   : > { %2297 = vmatmul.mubr.f32.gmra.mrb[56].mxu0 %v2091_v13  ;;  %v2093_v43 = vmax.f32 %v1923_v0, 0.0 }
 0x4c3   : > { %v2094_v46 = vmax.f32 %v1925_v60, 0.0  ;;  %v1928_v40 = vpop.f32.mrb[60].mxu1 }
 0x4c4   : > { %v1929_v5 = vadd.f32 %v1928_v40, %v6683_v18  ;;  %v1930_v11 = vpop.f32.mrb[61].mxu1 }
 0x4c5   : > { %v1931_v6 = vadd.f32 %v1930_v11, %v6685_v29  ;;  %2301 = vmatprep.mubr.f32.mxu0 %v2094_v46 }
 0x4c6   : > { %2302 = vmatmul.mubr.f32.gmra.mrb[58].mxu0 %v2093_v43  ;;  %v2095_v35 = vmax.f32 %v1929_v5, 0.0 }
 0x4c7   : > { %v2096_v32 = vmax.f32 %v1931_v6, 0.0  ;;  %v1934_v45 = vpop.f32.mrb[62].mxu1 }
 0x4c8   : > { %v1935_v44 = vadd.f32 %v1934_v45, %v6683_v18  ;;  %v1936_v49 = vpop.f32.mrb[63].mxu1 }
 0x4c9   : > { %2306 = vmatprep.mubr.f32.mxu0 %v2096_v32  ;;  %v1937_v8 = vadd.f32 %v1936_v49, %v6685_v29 }
 0x4ca   : > { %2307 = vmatmul.mubr.f32.gmra.mrb[60].mxu0 %v2095_v35  ;;  %v2097_v30 = vmax.f32 %v1935_v44, 0.0 }
 0x4cb   : > { %v2098_v36 = vmax.f32 %v1937_v8, 0.0  ;;  %v1940_v14 = vpop.f32.mrb[64].mxu1 }
 0x4cc   : > { %v1941_v59 = vadd.f32 %v1940_v14, %v6683_v18  ;;  %v1942_v4 = vpop.f32.mrb[65].mxu1 }
 0x4cd   : > { %2311 = vmatprep.mubr.f32.mxu0 %v2098_v36  ;;  %v1943_v16 = vadd.f32 %v1942_v4, %v6685_v29 }
 0x4ce   : > { %2312 = vmatmul.mubr.f32.gmra.mrb[62].mxu0 %v2097_v30  ;;  %v2099_v54 = vmax.f32 %v1941_v59, 0.0 }
 0x4cf   : > { %v2100_v10 = vmax.f32 %v1943_v16, 0.0  ;;  %v1946_v50 = vpop.f32.mrb[66].mxu1 }
 0x4d0   : > { %v1947_v48 = vadd.f32 %v1946_v50, %v6683_v18  ;;  %v1948_v2 = vpop.f32.mrb[67].mxu1 }
 0x4d1   : > { %v1949_v1 = vadd.f32 %v1948_v2, %v6685_v29  ;;  %2316 = vmatprep.mubr.f32.mxu0 %v2100_v10 }
 0x4d2   : > { %2317 = vmatmul.mubr.f32.gmra.mrb[64].mxu0 %v2099_v54  ;;  %v2101_v0 = vmax.f32 %v1947_v48, 0.0 }
 0x4d3   : > { %v2102_v20 = vmax.f32 %v1949_v1, 0.0  ;;  %v1952_v13 = vpop.f32.mrb[68].mxu1 }
 0x4d4   : > { %v1953_v3 = vadd.f32 %v1952_v13, %v6683_v18  ;;  %v1954_v60 = vpop.f32.mrb[69].mxu1 }
 0x4d5   : > { %v1955_v46 = vadd.f32 %v1954_v60, %v6685_v29  ;;  %2321 = vmatprep.mubr.f32.mxu0 %v2102_v20 }
 0x4d6   : > { %2322 = vmatmul.mubr.f32.gmra.mrb[66].mxu0 %v2101_v0  ;;  %v2103_v5 = vmax.f32 %v1953_v3, 0.0 }
 0x4d7   : > { %v2104_v40 = vmax.f32 %v1955_v46, 0.0  ;;  %v1958_v43 = vpop.f32.mrb[70].mxu1 }
 0x4d8   : > { %v1959_v11 = vadd.f32 %v1958_v43, %v6683_v18  ;;  %v1960_v6 = vpop.f32.mrb[71].mxu1 }
 0x4d9   : > { %v1961_v32 = vadd.f32 %v1960_v6, %v6685_v29  ;;  %2326 = vmatprep.mubr.f32.mxu0 %v2104_v40 }
 0x4da   : > { %2327 = vmatmul.mubr.f32.gmra.mrb[68].mxu0 %v2103_v5  ;;  %v2105_v44 = vmax.f32 %v1959_v11, 0.0 }
 0x4db   : > { %v2106_v35 = vmax.f32 %v1961_v32, 0.0  ;;  %v1964_v45 = vpop.f32.mrb[72].mxu1 }
 0x4dc   : > { %v1965_v49 = vadd.f32 %v1964_v45, %v6683_v18  ;;  %v1966_v8 = vpop.f32.mrb[73].mxu1 }
 0x4dd   : > { %v1967_v36 = vadd.f32 %v1966_v8, %v6685_v29  ;;  %2331 = vmatprep.mubr.f32.mxu0 %v2106_v35 }
 0x4de   : > { %2332 = vmatmul.mubr.f32.gmra.mrb[70].mxu0 %v2105_v44  ;;  %v2107_v59 = vmax.f32 %v1965_v49, 0.0 }
 0x4df   : > { %v2108_v30 = vmax.f32 %v1967_v36, 0.0  ;;  %v1970_v14 = vpop.f32.mrb[74].mxu1 }
 0x4e0   : > { %v1971_v4 = vadd.f32 %v1970_v14, %v6683_v18  ;;  %v1972_v16 = vpop.f32.mrb[75].mxu1 }
 0x4e1   : > { %v1973_v10 = vadd.f32 %v1972_v16, %v6685_v29  ;;  %2336 = vmatprep.mubr.f32.mxu0 %v2108_v30 }
 0x4e2   : > { %2337 = vmatmul.mubr.f32.gmra.mrb[72].mxu0 %v2107_v59  ;;  %v2109_v48 = vmax.f32 %v1971_v4, 0.0 }
 0x4e3   : > { %v2110_v50 = vmax.f32 %v1973_v10, 0.0  ;;  %v1976_v54 = vpop.f32.mrb[76].mxu1 }
 0x4e4   : > { %v1977_v2 = vadd.f32 %v1976_v54, %v6683_v18  ;;  %v1978_v1 = vpop.f32.mrb[77].mxu1 }
 0x4e5   : > { %v1979_v20 = vadd.f32 %v1978_v1, %v6685_v29  ;;  %2341 = vmatprep.mubr.f32.mxu0 %v2110_v50 }
 0x4e6   : > { %2342 = vmatmul.mubr.f32.gmra.mrb[74].mxu0 %v2109_v48  ;;  %v2111_v3 = vmax.f32 %v1977_v2, 0.0 }
 0x4e7   : > { %v2112_v13 = vmax.f32 %v1979_v20, 0.0  ;;  %v1982_v0 = vpop.f32.mrb[78].mxu1 }
 0x4e8   : > { %v1983_v60 = vadd.f32 %v1982_v0, %v6683_v18  ;;  %v1984_v46 = vpop.f32.mrb[79].mxu1 }
 0x4e9   : > { %v1985_v40 = vadd.f32 %v1984_v46, %v6685_v29  ;;  %2346 = vmatprep.mubr.f32.mxu0 %v2112_v13 }
 0x4ea   : > { %2347 = vmatmul.mubr.f32.gmra.mrb[76].mxu0 %v2111_v3  ;;  %v2113_v11 = vmax.f32 %v1983_v60, 0.0 }
 0x4eb   : > { %v2114_v43 = vmax.f32 %v1985_v40, 0.0  ;;  %v1988_v5 = vpop.f32.mrb[80].mxu1 }
 0x4ec   : > { %v1989_v6 = vadd.f32 %v1988_v5, %v6683_v18  ;;  %v1990_v32 = vpop.f32.mrb[81].mxu1 }
 0x4ed   : > { %v1991_v35 = vadd.f32 %v1990_v32, %v6685_v29  ;;  %2351 = vmatprep.mubr.f32.mxu0 %v2114_v43 }
 0x4ee   : > { %2352 = vmatmul.mubr.f32.gmra.mrb[78].mxu0 %v2113_v11  ;;  %v2115_v49 = vmax.f32 %v1989_v6, 0.0 }
 0x4ef   : > { %v2116_v45 = vmax.f32 %v1991_v35, 0.0  ;;  %v1994_v44 = vpop.f32.mrb[82].mxu1 }
 0x4f0   : > { %v1995_v8 = vadd.f32 %v1994_v44, %v6683_v18  ;;  %v1996_v36 = vpop.f32.mrb[83].mxu1 }
 0x4f1   : > { %v1997_v30 = vadd.f32 %v1996_v36, %v6685_v29  ;;  %2356 = vmatprep.mubr.f32.mxu0 %v2116_v45 }
 0x4f2   : > { %2357 = vmatmul.mubr.f32.gmra.mrb[80].mxu0 %v2115_v49  ;;  %v2117_v4 = vmax.f32 %v1995_v8, 0.0 }
 0x4f3   : > { %v2118_v14 = vmax.f32 %v1997_v30, 0.0  ;;  %v2000_v59 = vpop.f32.mrb[84].mxu1 }
 0x4f4   : > { %v2001_v16 = vadd.f32 %v2000_v59, %v6683_v18  ;;  %v2002_v10 = vpop.f32.mrb[85].mxu1 }
 0x4f5   : > { %v2003_v50 = vadd.f32 %v2002_v10, %v6685_v29  ;;  %2361 = vmatprep.mubr.f32.mxu0 %v2118_v14 }
 0x4f6   : > { %2362 = vmatmul.mubr.f32.gmra.mrb[82].mxu0 %v2117_v4  ;;  %v2119_v2 = vmax.f32 %v2001_v16, 0.0 }
 0x4f7   : > { %v2120_v54 = vmax.f32 %v2003_v50, 0.0  ;;  %v2006_v48 = vpop.f32.mrb[86].mxu1 }
 0x4f8   : > { %v2007_v1 = vadd.f32 %v2006_v48, %v6683_v18  ;;  %v2008_v20 = vpop.f32.mrb[87].mxu1 }
 0x4f9   : > { %v2009_v13 = vadd.f32 %v2008_v20, %v6685_v29  ;;  %2366 = vmatprep.mubr.f32.mxu0 %v2120_v54 }
 0x4fa   : > { %2367 = vmatmul.mubr.f32.gmra.mrb[84].mxu0 %v2119_v2  ;;  %v2121_v60 = vmax.f32 %v2007_v1, 0.0 }
 0x4fb   : > { %v2122_v0 = vmax.f32 %v2009_v13, 0.0  ;;  %v2012_v3 = vpop.f32.mrb[88].mxu1 }
 0x4fc   : > { %v2013_v46 = vadd.f32 %v2012_v3, %v6683_v18  ;;  %v2014_v40 = vpop.f32.mrb[89].mxu1 }
 0x4fd   : > { %v2015_v43 = vadd.f32 %v2014_v40, %v6685_v29  ;;  %2371 = vmatprep.mubr.f32.mxu0 %v2122_v0 }
 0x4fe   : > { %2372 = vmatmul.mubr.f32.gmra.mrb[86].mxu0 %v2121_v60  ;;  %v2123_v6 = vmax.f32 %v2013_v46, 0.0 }
 0x4ff   : > { %v2124_v5 = vmax.f32 %v2015_v43, 0.0  ;;  %v2018_v11 = vpop.f32.mrb[90].mxu1 }
 0x500   : > { %v2019_v32 = vadd.f32 %v2018_v11, %v6683_v18  ;;  %v2020_v35 = vpop.f32.mrb[91].mxu1 }
 0x501   : > { %v2021_v45 = vadd.f32 %v2020_v35, %v6685_v29  ;;  %2376 = vmatprep.mubr.f32.mxu0 %v2124_v5 }
 0x502   : > { %2377 = vmatmul.mubr.f32.gmra.mrb[88].mxu0 %v2123_v6  ;;  %v2125_v8 = vmax.f32 %v2019_v32, 0.0 }
 0x503   : > { %v2126_v44 = vmax.f32 %v2021_v45, 0.0  ;;  %v2024_v49 = vpop.f32.mrb[92].mxu1 }
 0x504   : > { %v2025_v36 = vadd.f32 %v2024_v49, %v6683_v18  ;;  %v2026_v30 = vpop.f32.mrb[93].mxu1 }
 0x505   : > { %v2027_v14 = vadd.f32 %v2026_v30, %v6685_v29  ;;  %2381 = vmatprep.mubr.f32.mxu0 %v2126_v44 }
 0x506   : > { %2382 = vmatmul.mubr.f32.gmra.mrb[90].mxu0 %v2125_v8  ;;  %v2127_v16 = vmax.f32 %v2025_v36, 0.0 }
 0x507   : > { %v2128_v59 = vmax.f32 %v2027_v14, 0.0  ;;  %v2030_v4 = vpop.f32.mrb[94].mxu1 }
 0x508   : > { %v2031_v10 = vadd.f32 %v2030_v4, %v6683_v18  ;;  %v2032_v50 = vpop.f32.mrb[95].mxu1 }
 0x509   : > { %v2033_v54 = vadd.f32 %v2032_v50, %v6685_v29  ;;  %2386 = vmatprep.mubr.f32.mxu0 %v2128_v59 }
 0x50a   : > { %2387 = vmatmul.mubr.f32.gmra.mrb[92].mxu0 %v2127_v16  ;;  %v2129_v1 = vmax.f32 %v2031_v10, 0.0 }
 0x50b   : > { %v2130_v48 = vmax.f32 %v2033_v54, 0.0  ;;  %v2036_v2 = vpop.f32.mrb[96].mxu1 }
 0x50c   : > { %v2037_v20 = vadd.f32 %v2036_v2, %v6683_v18  ;;  %v2038_v13 = vpop.f32.mrb[97].mxu1 }
 0x50d   : > { %v2039_v0 = vadd.f32 %v2038_v13, %v6685_v29  ;;  %2391 = vmatprep.mubr.f32.mxu0 %v2130_v48 }
 0x50e   : > { %2392 = vmatmul.mubr.f32.gmra.mrb[94].mxu0 %v2129_v1  ;;  %v2131_v46 = vmax.f32 %v2037_v20, 0.0 }
 0x50f   : > { %v2132_v3 = vmax.f32 %v2039_v0, 0.0  ;;  %v2042_v60 = vpop.f32.mrb[98].mxu1 }
 0x510   : > { %v2043_v40 = vadd.f32 %v2042_v60, %v6683_v18  ;;  %v2044_v43 = vpop.f32.mrb[99].mxu1 }
 0x511   : > { %v2045_v5 = vadd.f32 %v2044_v43, %v6685_v29  ;;  %2396 = vmatprep.mubr.f32.mxu0 %v2132_v3 }
 0x512   : > { %2397 = vmatmul.mubr.f32.gmra.mrb[96].mxu0 %v2131_v46  ;;  %v2133_v32 = vmax.f32 %v2043_v40, 0.0 }
 0x513   : > { %v2134_v11 = vmax.f32 %v2045_v5, 0.0  ;;  %v2048_v6 = vpop.f32.mrb[100].mxu1 }
 0x514   : > { %v2049_v35 = vadd.f32 %v2048_v6, %v6683_v18  ;;  %v2050_v45 = vpop.f32.mrb[101].mxu1 }
 0x515   : > { %v2051_v44 = vadd.f32 %v2050_v45, %v6685_v29  ;;  %2401 = vmatprep.mubr.f32.mxu0 %v2134_v11 }
 0x516   : > { %2402 = vmatmul.mubr.f32.gmra.mrb[98].mxu0 %v2133_v32  ;;  %v2135_v36 = vmax.f32 %v2049_v35, 0.0 }
 0x517   : > { %v2136_v49 = vmax.f32 %v2051_v44, 0.0  ;;  %v2054_v8 = vpop.f32.mrb[102].mxu1 }
 0x518   : > { %v2055_v30 = vadd.f32 %v2054_v8, %v6683_v18  ;;  %v2056_v14 = vpop.f32.mrb[103].mxu1 }
 0x519   : > { %v2057_v59 = vadd.f32 %v2056_v14, %v6685_v29  ;;  %2406 = vmatprep.mubr.f32.mxu0 %v2136_v49 }
 0x51a   : > { %2407 = vmatmul.mubr.f32.gmra.mrb[100].mxu0 %v2135_v36  ;;  %v2137_v10 = vmax.f32 %v2055_v30, 0.0  ;;  %v6754_v30 = vld [vmem:[%s7672_s2 + $0x6] ss:$0 sm:$0xff] }
 0x51b   : > { %v2138_v4 = vmax.f32 %v2057_v59, 0.0  ;;  %v2060_v16 = vpop.f32.mrb[104].mxu1 }
 0x51c   : > { %v2061_v50 = vadd.f32 %v2060_v16, %v6683_v18  ;;  %v2062_v54 = vpop.f32.mrb[105].mxu1 }
 0x51d   : > { %v2063_v48 = vadd.f32 %v2062_v54, %v6685_v29  ;;  %2411 = vmatprep.mubr.f32.mxu0 %v2138_v4 }
 0x51e   : > { %2412 = vmatmul.mubr.f32.gmra.mrb[102].mxu0 %v2137_v10  ;;  %v2139_v20 = vmax.f32 %v2061_v50, 0.0 }
 0x51f   : > { %v2140_v2 = vmax.f32 %v2063_v48, 0.0  ;;  %v2066_v1 = vpop.f32.mrb[106].mxu1 }
 0x520   : > { %v2067_v13 = vadd.f32 %v2066_v1, %v6683_v18  ;;  %v2068_v0 = vpop.f32.mrb[107].mxu1 }
 0x521   : > { %v2069_v3 = vadd.f32 %v2068_v0, %v6685_v29  ;;  %2416 = vmatprep.mubr.f32.mxu0 %v2140_v2 }
 0x522   : > { %2417 = vmatmul.mubr.f32.gmra.mrb[104].mxu0 %v2139_v20  ;;  %v2141_v40 = vmax.f32 %v2067_v13, 0.0 }
 0x523   : > { %v2142_v60 = vmax.f32 %v2069_v3, 0.0  ;;  %v2072_v46 = vpop.f32.mrb[108].mxu1 }
 0x524   : > { %v2073_v43 = vadd.f32 %v2072_v46, %v6683_v18  ;;  %v2074_v5 = vpop.f32.mrb[109].mxu1 }
 0x525   : > { %v2075_v11 = vadd.f32 %v2074_v5, %v6685_v29  ;;  %2421 = vmatprep.mubr.f32.mxu0 %v2142_v60 }
 0x526   : > { %2422 = vmatmul.mubr.f32.gmra.mrb[106].mxu0 %v2141_v40  ;;  %v2143_v35 = vmax.f32 %v2073_v43, 0.0 }
 0x527   : > { %v2144_v6 = vmax.f32 %v2075_v11, 0.0  ;;  %v2078_v32 = vpop.f32.mrb[110].mxu1 }
 0x528   : > { %v2079_v45 = vadd.f32 %v2078_v32, %v6683_v18  ;;  %v2080_v44 = vpop.f32.mrb[111].mxu1 }
 0x529   : > { %v2081_v49 = vadd.f32 %v2080_v44, %v6685_v29  ;;  %2426 = vmatprep.mubr.f32.mxu0 %v2144_v6 }
 0x52a   : > { %2427 = vmatmul.mubr.f32.gmra.mrb[108].mxu0 %v2143_v35  ;;  %v2145_v36 = vmax.f32 %v2079_v45, 0.0 }
 0x52b   : > { %v2146_v8 = vmax.f32 %v2081_v49, 0.0 }
 0x52d   : > { %2431 = vmatprep.mubr.f32.mxu0 %v2146_v8 }
 0x52e   : > { %2432 = vmatmul.mubr.f32.gmra.mrb[110].mxu0 %v2145_v36 }
 0x585   : > { %v2278_v14 = vpop.f32.mrb[48].mxu0 }
 0x586   : > { %v2279_v59 = vadd.f32 %v2278_v14, %v6754_v30  ;;  %v2280_v4 = vpop.f32.mrb[49].mxu0 }
 0x588   : > { %v6758_v18 = vadd.f32 %v2279_v59, %v6395_v23 }
 0x589   : > { %v2283_v16 = vpop.f32.mrb[50].mxu0 }
 0x58a   : > { %v2284_v29 = vadd.f32 %v2283_v16, %v6754_v30  ;;  %2471 = vadd.xlane.f32.xlu0 %v6758_v18  ;;  %v2285_v10 = vpop.f32.mrb[51].mxu0 }
 0x58c   : > { %v6763_v50 = vadd.f32 %v2284_v29, %v6410_v19 }
 0x58d   : > { %v2288_v54 = vpop.f32.mrb[52].mxu0 }
 0x58e   : > { %v2289_v48 = vadd.f32 %v2288_v54, %v6754_v30  ;;  %2473 = vadd.xlane.f32.xlu1 %v6763_v50  ;;  %v2290_v2 = vpop.f32.mrb[53].mxu0 }
 0x590   : > { %v6768_v1 = vadd.f32 %v2289_v48, %v6421_v57 }
 0x591   : > { %v2293_v23 = vpop.f32.mrb[54].mxu0 }
 0x592   : > { %v2294_v20 = vadd.f32 %v2293_v23, %v6754_v30  ;;  %2475 = vadd.xlane.f32.xlu0 %v6768_v1  ;;  %v2295_v13 = vpop.f32.mrb[55].mxu0 }
 0x594   : > { %v6773_v0 = vadd.f32 %v2294_v20, %v6432_v47 }
 0x595   : > { %v2298_v19 = vpop.f32.mrb[56].mxu0 }
 0x596   : > { %v2299_v3 = vadd.f32 %v2298_v19, %v6754_v30  ;;  %2477 = vadd.xlane.f32.xlu1 %v6773_v0  ;;  %v2300_v60 = vpop.f32.mrb[57].mxu0 }
 0x598   : > { %v6778_v46 = vadd.f32 %v2299_v3, %v6443_v61 }
 0x599   : > { %v2303_v57 = vpop.f32.mrb[58].mxu0 }
 0x59a   : > { %v2304_v40 = vadd.f32 %v2303_v57, %v6754_v30  ;;  %2479 = vadd.xlane.f32.xlu0 %v6778_v46  ;;  %v2305_v43 = vpop.f32.mrb[59].mxu0 }
 0x59c   : > { %v6783_v5 = vadd.f32 %v2304_v40, %v6454_v12 }
 0x59d   : > { %v2308_v47 = vpop.f32.mrb[60].mxu0 }
 0x59e   : > { %v2309_v11 = vadd.f32 %v2308_v47, %v6754_v30  ;;  %2481 = vadd.xlane.f32.xlu1 %v6783_v5  ;;  %v2310_v6 = vpop.f32.mrb[61].mxu0 }
 0x5a0   : > { %v6788_v32 = vadd.f32 %v2309_v11, %v6465_v34 }
 0x5a1   : > { %v2313_v61 = vpop.f32.mrb[62].mxu0 }
 0x5a2   : > { %2483 = vadd.xlane.f32.xlu0 %v6788_v32  ;;  %v2314_v35 = vadd.f32 %v2313_v61, %v6754_v30  ;;  %v2315_v45 = vpop.f32.mrb[63].mxu0 }
 0x5a4   : > { %v6793_v44 = vadd.f32 %v2314_v35, %v6476_v52 }
 0x5a5   : > { %v2318_v12 = vpop.f32.mrb[64].mxu0 }
 0x5a6   : > { %2485 = vadd.xlane.f32.xlu1 %v6793_v44  ;;  %v2319_v49 = vadd.f32 %v2318_v12, %v6754_v30  ;;  %v2320_v8 = vpop.f32.mrb[65].mxu0 }
 0x5a8   : > { %v6798_v36 = vadd.f32 %v2319_v49, %v6488_v63 }
 0x5a9   : > { %v2323_v34 = vpop.f32.mrb[66].mxu0 }
 0x5aa   : > { %v2324_v14 = vadd.f32 %v2323_v34, %v6754_v30  ;;  %2487 = vadd.xlane.f32.xlu0 %v6798_v36  ;;  %v2325_v59 = vpop.f32.mrb[67].mxu0 }
 0x5ac   : > { %v6803_v4 = vadd.f32 %v2324_v14, %v6498_v28 }
 0x5ad   : > { %v2328_v52 = vpop.f32.mrb[68].mxu0 }
 0x5ae   : > { %v2329_v16 = vadd.f32 %v2328_v52, %v6754_v30  ;;  %2489 = vadd.xlane.f32.xlu1 %v6803_v4  ;;  %v2330_v29 = vpop.f32.mrb[69].mxu0 }
 0x5b0   : > { %v6808_v10 = vadd.f32 %v2329_v16, %v6510_v21 }
 0x5b1   : > { %v2333_v63 = vpop.f32.mrb[70].mxu0 }
 0x5b2   : > { %v2334_v54 = vadd.f32 %v2333_v63, %v6754_v30  ;;  %2491 = vadd.xlane.f32.xlu0 %v6808_v10  ;;  %v2335_v48 = vpop.f32.mrb[71].mxu0 }
 0x5b4   : > { %v6813_v2 = vadd.f32 %v2334_v54, %v6519_v42 }
 0x5b5   : > { %v2338_v28 = vpop.f32.mrb[72].mxu0 }
 0x5b6   : > { %v2339_v23 = vadd.f32 %v2338_v28, %v6754_v30  ;;  %2493 = vadd.xlane.f32.xlu1 %v6813_v2  ;;  %v2340_v20 = vpop.f32.mrb[73].mxu0 }
 0x5b8   : > { %v6818_v13 = vadd.f32 %v2339_v23, %v6532_v25 }
 0x5b9   : > { %v2343_v21 = vpop.f32.mrb[74].mxu0 }
 0x5ba   : > { %v2344_v19 = vadd.f32 %v2343_v21, %v6754_v30  ;;  %v2345_v3 = vpop.f32.mrb[75].mxu0  ;;  %2495 = vadd.xlane.f32.xlu0 %v6818_v13 }
 0x5bc   : > { %v6823_v60 = vadd.f32 %v2344_v19, %v6543_v7 }
 0x5bd   : > { %v2348_v42 = vpop.f32.mrb[76].mxu0 }
 0x5be   : > { %v2349_v57 = vadd.f32 %v2348_v42, %v6754_v30  ;;  %2497 = vadd.xlane.f32.xlu1 %v6823_v60  ;;  %v2350_v40 = vpop.f32.mrb[77].mxu0 }
 0x5c0   : > { %v6828_v43 = vadd.f32 %v2349_v57, %v6554_v37 }
 0x5c1   : > { %v2353_v25 = vpop.f32.mrb[78].mxu0 }
 0x5c2   : > { %v2354_v47 = vadd.f32 %v2353_v25, %v6754_v30  ;;  %v2355_v11 = vpop.f32.mrb[79].mxu0  ;;  %2499 = vadd.xlane.f32.xlu0 %v6828_v43 }
 0x5c4   : > { %v6833_v6 = vadd.f32 %v2354_v47, %v6562_v53 }
 0x5c5   : > { %v2358_v7 = vpop.f32.mrb[80].mxu0 }
 0x5c6   : > { %v2359_v61 = vadd.f32 %v2358_v7, %v6754_v30  ;;  %2501 = vadd.xlane.f32.xlu1 %v6833_v6  ;;  %v2360_v35 = vpop.f32.mrb[81].mxu0 }
 0x5c8   : > { %v6838_v45 = vadd.f32 %v2359_v61, %v6569_v17 }
 0x5c9   : > { %v2363_v37 = vpop.f32.mrb[82].mxu0 }
 0x5ca   : > { %v2364_v12 = vadd.f32 %v2363_v37, %v6754_v30  ;;  %v2365_v49 = vpop.f32.mrb[83].mxu0  ;;  %2503 = vadd.xlane.f32.xlu0 %v6838_v45 }
 0x5cc   : > { %v6843_v8 = vadd.f32 %v2364_v12, %v6576_v58 }
 0x5cd   : > { %v2368_v53 = vpop.f32.mrb[84].mxu0 }
 0x5ce   : > { %v2369_v34 = vadd.f32 %v2368_v53, %v6754_v30  ;;  %2505 = vadd.xlane.f32.xlu1 %v6843_v8  ;;  %v2370_v14 = vpop.f32.mrb[85].mxu0 }
 0x5d0   : > { %v6848_v59 = vadd.f32 %v2369_v34, %v6583_v51 }
 0x5d1   : > { %v2373_v17 = vpop.f32.mrb[86].mxu0 }
 0x5d2   : > { %v2374_v52 = vadd.f32 %v2373_v17, %v6754_v30  ;;  %v2375_v16 = vpop.f32.mrb[87].mxu0  ;;  %2507 = vadd.xlane.f32.xlu0 %v6848_v59 }
 0x5d4   : > { %v6853_v29 = vadd.f32 %v2374_v52, %v6590_v56 }
 0x5d5   : > { %v2378_v58 = vpop.f32.mrb[88].mxu0 }
 0x5d6   : > { %v2379_v63 = vadd.f32 %v2378_v58, %v6754_v30  ;;  %2509 = vadd.xlane.f32.xlu1 %v6853_v29  ;;  %v2380_v54 = vpop.f32.mrb[89].mxu0 }
 0x5d8   : > { %v6858_v48 = vadd.f32 %v2379_v63, %v6597_v27 }
 0x5d9   : > { %v2383_v51 = vpop.f32.mrb[90].mxu0 }
 0x5da   : > { %v2384_v28 = vadd.f32 %v2383_v51, %v6754_v30  ;;  %v2385_v23 = vpop.f32.mrb[91].mxu0  ;;  %2511 = vadd.xlane.f32.xlu0 %v6858_v48 }
 0x5dc   : > { %v6863_v20 = vadd.f32 %v2384_v28, %v6604_v33 }
 0x5dd   : > { %v2388_v56 = vpop.f32.mrb[92].mxu0 }
 0x5de   : > { %v2389_v21 = vadd.f32 %v2388_v56, %v6754_v30  ;;  %2513 = vadd.xlane.f32.xlu1 %v6863_v20  ;;  %v2390_v19 = vpop.f32.mrb[93].mxu0 }
 0x5e0   : > { %v6868_v3 = vadd.f32 %v2389_v21, %v6614_v39 }
 0x5e1   : > { %v2393_v27 = vpop.f32.mrb[94].mxu0 }
 0x5e2   : > { %v2394_v42 = vadd.f32 %v2393_v27, %v6754_v30  ;;  %v2395_v57 = vpop.f32.mrb[95].mxu0  ;;  %2515 = vadd.xlane.f32.xlu0 %v6868_v3 }
 0x5e4   : > { %v6873_v40 = vadd.f32 %v2394_v42, %v6621_v22 }
 0x5e5   : > { %v2398_v33 = vpop.f32.mrb[96].mxu0 }
 0x5e6   : > { %v2399_v25 = vadd.f32 %v2398_v33, %v6754_v30  ;;  %2517 = vadd.xlane.f32.xlu1 %v6873_v40  ;;  %v2400_v47 = vpop.f32.mrb[97].mxu0 }
 0x5e8   : > { %v6878_v11 = vadd.f32 %v2399_v25, %v6628_v55  ;;  %v4259_v25 = vld [vmem:[%s7678_s8 + $0x10] sm:$0xff]  }
 0x5e9   : > { %v2403_v39 = vpop.f32.mrb[98].mxu0 }
 0x5ea   : > { %v2404_v7 = vadd.f32 %v2403_v39, %v6754_v30  ;;  %v2405_v61 = vpop.f32.mrb[99].mxu0  ;;  %2519 = vadd.xlane.f32.xlu0 %v6878_v11 }
 0x5ec   : > { %v6883_v35 = vadd.f32 %v2404_v7, %v6635_v31 }
 0x5ed   : > { %v2408_v22 = vpop.f32.mrb[100].mxu0 }
 0x5ee   : > { %v2409_v37 = vadd.f32 %v2408_v22, %v6754_v30  ;;  %2521 = vadd.xlane.f32.xlu1 %v6883_v35  ;;  %v2410_v12 = vpop.f32.mrb[101].mxu0 }
 0x5f0   : > { %v6888_v49 = vadd.f32 %v2409_v37, %v6642_v62 }
 0x5f1   : > { %v2413_v55 = vpop.f32.mrb[102].mxu0 }
 0x5f2   : > { %v2414_v53 = vadd.f32 %v2413_v55, %v6754_v30  ;;  %v2415_v34 = vpop.f32.mrb[103].mxu0  ;;  %2523 = vadd.xlane.f32.xlu0 %v6888_v49 }
 0x5f4   : > { %v6893_v14 = vadd.f32 %v2414_v53, %v6649_v15 }
 0x5f5   : > { %v2418_v31 = vpop.f32.mrb[104].mxu0 }
 0x5f6   : > { %v2419_v17 = vadd.f32 %v2418_v31, %v6754_v30  ;;  %2525 = vadd.xlane.f32.xlu1 %v6893_v14  ;;  %v2420_v52 = vpop.f32.mrb[105].mxu0 }
 0x5f8   : > { %v6898_v16 = vadd.f32 %v2419_v17, %v6656_v41 }
 0x5f9   : > { %v2423_v62 = vpop.f32.mrb[106].mxu0 }
 0x5fa   : > { %v2424_v58 = vadd.f32 %v2423_v62, %v6754_v30  ;;  %v2425_v63 = vpop.f32.mrb[107].mxu0  ;;  %2527 = vadd.xlane.f32.xlu0 %v6898_v16 }
 0x5fc   : > { %v6903_v54 = vadd.f32 %v2424_v58, %v6663_v24  ;;  %v4163_v24 = vld [vmem:[%s7678_s8] sm:$0xff]  }
 0x5fd   : > { %v2428_v15 = vpop.f32.mrb[108].mxu0  ;;  %5049 = vmatprep.subr.bf16.mxu1 %v4163_v24 }
 0x5fe   : > { %v2429_v51 = vadd.f32 %v2428_v15, %v6754_v30  ;;  %2529 = vadd.xlane.f32.xlu1 %v6903_v54  ;;  %v2430_v28 = vpop.f32.mrb[109].mxu0  ;;  %5051 = vmatpush3.bf16.msra.mxu1 %v4163_v24 }
 0x600   : > { %v6908_v23 = vadd.f32 %v2429_v51, %v6670_v9  ;;  %v4258_v9 = vld [vmem:[%s7678_s8 + $0x8] sm:$0xff]  }
 0x601   : > { %v2433_v41 = vpop.f32.mrb[110].mxu0  ;;  %5053 = vmatprep.subr.bf16.mxu1 %v4258_v9 }
 0x602   : > { %v2434_v56 = vadd.f32 %v2433_v41, %v6754_v30  ;;  %v2435_v21 = vpop.f32.mrb[111].mxu0  ;;  %2531 = vadd.xlane.f32.xlu0 %v6908_v23  ;;  %5055 = vmatpush3.bf16.msra.mxu1 %v4258_v9  ;;  %v4261_v41 = vld [vmem:[%s7678_s8 + $0x20] sm:$0xff]   ;;  %v4262_v9 = vld [vmem:[%s7678_s8 + $0x28] sm:$0xff]  }
 0x603   : > { %5057 = vmatprep.subr.bf16.mxu1 %v4259_v25 }
 0x604   : > { %v6916_v19 = vadd.f32 %v2434_v56, %v6676_v26 }
 0x606   : > { %2533 = vadd.xlane.f32.xlu1 %v6916_v19  ;;  %5059 = vmatpush3.bf16.msra.mxu1 %v4259_v25 }
 0x617   : > { %v2472_v30 = vpop.xlane.xlu0 %2471 }
 0x618   : > { %v2535_v27 = vmul.f32 0.0078125, %v2472_v30 }
 0x61a   : > { %v6923_v42 = vsub.f32 %v6758_v18, %v2535_v27 }
 0x61b   : > { %v2474_v57 = vpop.xlane.xlu1 %2473 }
 0x61c   : > { %v2536_v33 = vmul.f32 0.0078125, %v2474_v57  ;;  %v2599_v26 = vmul.f32 %v6923_v42, %v6923_v42 }
 0x61e   : > { %2631 = vadd.xlane.f32.xlu0 %v2599_v26  ;;  %v6931_v47 = vsub.f32 %v6763_v50, %v2536_v33  ;;  %v4263_v33 = vld [vmem:[%s7678_s8 + $0x30] sm:$0xff]  }
 0x61f   : > { %v2476_v39 = vpop.xlane.xlu0 %2475 }
 0x620   : > { %v2537_v7 = vmul.f32 0.0078125, %v2476_v39  ;;  %v2600_v18 = vmul.f32 %v6931_v47, %v6931_v47 }
 0x622   : > { %v6936_v61 = vsub.f32 %v6768_v1, %v2537_v7  ;;  %2633 = vadd.xlane.f32.xlu1 %v2600_v18  ;;  %v4264_v7 = vld [vmem:[%s7678_s8 + $0x38] sm:$0xff]  }
 0x623   : > { %v2478_v22 = vpop.xlane.xlu1 %2477 }
 0x624   : > { %v2538_v37 = vmul.f32 0.0078125, %v2478_v22  ;;  %v2601_v12 = vmul.f32 %v6936_v61, %v6936_v61 }
 0x626   : > { %v6941_v55 = vsub.f32 %v6773_v0, %v2538_v37  ;;  %2635 = vadd.xlane.f32.xlu0 %v2601_v12 }
 0x627   : > { %v2480_v50 = vpop.xlane.xlu0 %2479 }
 0x628   : > { %v2539_v53 = vmul.f32 0.0078125, %v2480_v50  ;;  %v2602_v34 = vmul.f32 %v6941_v55, %v6941_v55 }
 0x62a   : > { %v6946_v31 = vsub.f32 %v6778_v46, %v2539_v53  ;;  %2637 = vadd.xlane.f32.xlu1 %v2602_v34  ;;  %v4260_v46 = vld [vmem:[%s7678_s8 + $0x18] sm:$0xff]  }
 0x62b   : > { %v2482_v1 = vpop.xlane.xlu1 %2481  ;;  %5061 = vmatprep.subr.bf16.mxu1 %v4260_v46 }
 0x62c   : > { %v2540_v17 = vmul.f32 0.0078125, %v2482_v1  ;;  %v2603_v52 = vmul.f32 %v6946_v31, %v6946_v31  ;;  %5063 = vmatpush3.bf16.msra.mxu1 %v4260_v46 }
 0x62d   : > { %5065 = vmatprep.subr.bf16.mxu1 %v4261_v41 }
 0x62e   : > { %v6951_v62 = vsub.f32 %v6783_v5, %v2540_v17  ;;  %2639 = vadd.xlane.f32.xlu0 %v2603_v52 }
 0x62f   : > { %v2484_v0 = vpop.xlane.xlu0 %2483 }
 0x630   : > { %v2541_v58 = vmul.f32 0.0078125, %v2484_v0  ;;  %v2604_v63 = vmul.f32 %v6951_v62, %v6951_v62  ;;  %5067 = vmatpush3.bf16.msra.mxu1 %v4261_v41 }
 0x631   : > { %5069 = vmatprep.subr.bf16.mxu1 %v4262_v9 }
 0x632   : > { %v6956_v15 = vsub.f32 %v6788_v32, %v2541_v58  ;;  %2641 = vadd.xlane.f32.xlu1 %v2604_v63 }
 0x633   : > { %v2486_v51 = vpop.xlane.xlu1 %2485 }
 0x634   : > { %v2605_v5 = vmul.f32 %v6956_v15, %v6956_v15  ;;  %v2542_v28 = vmul.f32 0.0078125, %v2486_v51  ;;  %5071 = vmatpush3.bf16.msra.mxu1 %v4262_v9 }
 0x635   : > { %5073 = vmatprep.subr.bf16.mxu1 %v4263_v33 }
 0x636   : > { %2643 = vadd.xlane.f32.xlu0 %v2605_v5  ;;  %v6967_v32 = vsub.f32 %v6793_v44, %v2542_v28 }
 0x637   : > { %v2488_v56 = vpop.xlane.xlu0 %2487 }
 0x638   : > { %v2606_v21 = vmul.f32 %v6967_v32, %v6967_v32  ;;  %v2543_v24 = vmul.f32 0.0078125, %v2488_v56  ;;  %5075 = vmatpush3.bf16.msra.mxu1 %v4263_v33 }
 0x639   : > { %5077 = vmatprep.subr.bf16.mxu1 %v4264_v7 }
 0x63a   : > { %2645 = vadd.xlane.f32.xlu1 %v2606_v21  ;;  %v6975_v30 = vsub.f32 %v6798_v36, %v2543_v24 }
 0x63b   : > { %v2490_v27 = vpop.xlane.xlu1 %2489 }
 0x63c   : > { %v2544_v44 = vmul.f32 0.0078125, %v2490_v27  ;;  %v2607_v57 = vmul.f32 %v6975_v30, %v6975_v30  ;;  %5079 = vmatpush3.bf16.msra.mxu1 %v4264_v7 }
 0x63e   : > { %v6983_v26 = vsub.f32 %v6803_v4, %v2544_v44  ;;  %2647 = vadd.xlane.f32.xlu0 %v2607_v57 }
 0x63f   : > { %v2492_v25 = vpop.xlane.xlu0 %2491 }
 0x640   : > { %v2545_v39 = vmul.f32 0.0078125, %v2492_v25  ;;  %v2608_v36 = vmul.f32 %v6983_v26, %v6983_v26 }
 0x642   : > { %v6991_v18 = vsub.f32 %v6808_v10, %v2545_v39  ;;  %2649 = vadd.xlane.f32.xlu1 %v2608_v36 }
 0x643   : > { %v2494_v22 = vpop.xlane.xlu1 %2493 }
 0x644   : > { %v2546_v4 = vmul.f32 0.0078125, %v2494_v22  ;;  %v2609_v37 = vmul.f32 %v6991_v18, %v6991_v18 }
 0x646   : > { %v6996_v12 = vsub.f32 %v6813_v2, %v2546_v4  ;;  %2651 = vadd.xlane.f32.xlu0 %v2609_v37 }
 0x647   : > { %v2496_v50 = vpop.xlane.xlu0 %2495 }
 0x648   : > { %v2547_v53 = vmul.f32 0.0078125, %v2496_v50  ;;  %v2610_v34 = vmul.f32 %v6996_v12, %v6996_v12 }
 0x64a   : > { %v7001_v1 = vsub.f32 %v6818_v13, %v2547_v53  ;;  %2653 = vadd.xlane.f32.xlu1 %v2610_v34 }
 0x64b   : > { %v2498_v10 = vpop.xlane.xlu1 %2497 }
 0x64c   : > { %v2548_v17 = vmul.f32 0.0078125, %v2498_v10  ;;  %v2611_v52 = vmul.f32 %v7001_v1, %v7001_v1 }
 0x64e   : > { %v7006_v0 = vsub.f32 %v6823_v60, %v2548_v17  ;;  %2655 = vadd.xlane.f32.xlu0 %v2611_v52 }
 0x64f   : > { %v2500_v2 = vpop.xlane.xlu0 %2499 }
 0x650   : > { %v2549_v58 = vmul.f32 0.0078125, %v2500_v2  ;;  %v2612_v63 = vmul.f32 %v7006_v0, %v7006_v0 }
 0x652   : > { %v7011_v46 = vsub.f32 %v6828_v43, %v2549_v58  ;;  %2657 = vadd.xlane.f32.xlu1 %v2612_v63 }
 0x653   : > { %v2502_v13 = vpop.xlane.xlu1 %2501 }
 0x654   : > { %v2550_v51 = vmul.f32 0.0078125, %v2502_v13  ;;  %v2613_v5 = vmul.f32 %v7011_v46, %v7011_v46 }
 0x656   : > { %v7016_v28 = vsub.f32 %v6833_v6, %v2550_v51  ;;  %2659 = vadd.xlane.f32.xlu0 %v2613_v5 }
 0x657   : > { %v2504_v60 = vpop.xlane.xlu0 %2503 }
 0x658   : > { %v2551_v41 = vmul.f32 0.0078125, %v2504_v60  ;;  %v2614_v56 = vmul.f32 %v7016_v28, %v7016_v28 }
 0x65a   : > { %v7021_v21 = vsub.f32 %v6838_v45, %v2551_v41  ;;  %2661 = vadd.xlane.f32.xlu1 %v2614_v56 }
 0x65b   : > { %v2506_v43 = vpop.xlane.xlu1 %2505 }
 0x65c   : > { %v2552_v24 = vmul.f32 0.0078125, %v2506_v43  ;;  %v2615_v9 = vmul.f32 %v7021_v21, %v7021_v21 }
 0x65e   : > { %v7026_v27 = vsub.f32 %v6843_v8, %v2552_v24  ;;  %2663 = vadd.xlane.f32.xlu0 %v2615_v9 }
 0x65f   : > { %v2508_v6 = vpop.xlane.xlu0 %2507 }
 0x660   : > { %v2553_v44 = vmul.f32 0.0078125, %v2508_v6  ;;  %v2616_v57 = vmul.f32 %v7026_v27, %v7026_v27 }
 0x662   : > { %v7031_v33 = vsub.f32 %v6848_v59, %v2553_v44  ;;  %2665 = vadd.xlane.f32.xlu1 %v2616_v57 }
 0x663   : > { %v2510_v45 = vpop.xlane.xlu1 %2509 }
 0x664   : > { %v2554_v25 = vmul.f32 0.0078125, %v2510_v45  ;;  %v2617_v39 = vmul.f32 %v7031_v33, %v7031_v33 }
 0x666   : > { %v7036_v36 = vsub.f32 %v6853_v29, %v2554_v25  ;;  %2667 = vadd.xlane.f32.xlu0 %v2617_v39 }
 0x667   : > { %v2512_v8 = vpop.xlane.xlu0 %2511 }
 0x668   : > { %v2555_v7 = vmul.f32 0.0078125, %v2512_v8  ;;  %v2618_v22 = vmul.f32 %v7036_v36, %v7036_v36 }
 0x66a   : > { %v7041_v4 = vsub.f32 %v6858_v48, %v2555_v7  ;;  %2669 = vadd.xlane.f32.xlu1 %v2618_v22 }
 0x66b   : > { %v2514_v59 = vpop.xlane.xlu1 %2513 }
 0x66c   : > { %v2556_v37 = vmul.f32 0.0078125, %v2514_v59  ;;  %v2619_v50 = vmul.f32 %v7041_v4, %v7041_v4 }
 0x66e   : > { %v7046_v53 = vsub.f32 %v6863_v20, %v2556_v37  ;;  %2671 = vadd.xlane.f32.xlu0 %v2619_v50 }
 0x66f   : > { %v2516_v29 = vpop.xlane.xlu0 %2515 }
 0x670   : > { %v2557_v34 = vmul.f32 0.0078125, %v2516_v29  ;;  %v2620_v10 = vmul.f32 %v7046_v53, %v7046_v53 }
 0x672   : > { %v7051_v17 = vsub.f32 %v6868_v3, %v2557_v34  ;;  %2673 = vadd.xlane.f32.xlu1 %v2620_v10 }
 0x673   : > { %v2518_v48 = vpop.xlane.xlu1 %2517 }
 0x674   : > { %v2558_v52 = vmul.f32 0.0078125, %v2518_v48  ;;  %v2621_v2 = vmul.f32 %v7051_v17, %v7051_v17 }
 0x676   : > { %v7056_v58 = vsub.f32 %v6873_v40, %v2558_v52  ;;  %2675 = vadd.xlane.f32.xlu0 %v2621_v2 }
 0x677   : > { %v2520_v20 = vpop.xlane.xlu0 %2519 }
 0x678   : > { %v2559_v63 = vmul.f32 0.0078125, %v2520_v20  ;;  %v2622_v13 = vmul.f32 %v7056_v58, %v7056_v58 }
 0x67a   : > { %v7061_v51 = vsub.f32 %v6878_v11, %v2559_v63  ;;  %2677 = vadd.xlane.f32.xlu1 %v2622_v13 }
 0x67b   : > { %v2522_v3 = vpop.xlane.xlu1 %2521 }
 0x67c   : > { %v2560_v5 = vmul.f32 0.0078125, %v2522_v3  ;;  %v2623_v60 = vmul.f32 %v7061_v51, %v7061_v51 }
 0x67e   : > { %v7066_v41 = vsub.f32 %v6883_v35, %v2560_v5  ;;  %2679 = vadd.xlane.f32.xlu0 %v2623_v60 }
 0x67f   : > { %v2524_v40 = vpop.xlane.xlu0 %2523 }
 0x680   : > { %v2561_v56 = vmul.f32 0.0078125, %v2524_v40  ;;  %v2624_v43 = vmul.f32 %v7066_v41, %v7066_v41 }
 0x682   : > { %v7071_v24 = vsub.f32 %v6888_v49, %v2561_v56  ;;  %2681 = vadd.xlane.f32.xlu1 %v2624_v43  ;;  %v7103_v56 = vld [vmem:[%s7672_s2 + $0x7] ss:$0 sm:$0xff] }
 0x683   : > { %v2526_v11 = vpop.xlane.xlu1 %2525 }
 0x684   : > { %v2562_v9 = vmul.f32 0.0078125, %v2526_v11  ;;  %v2625_v6 = vmul.f32 %v7071_v24, %v7071_v24 }
 0x686   : > { %v7076_v44 = vsub.f32 %v6893_v14, %v2562_v9  ;;  %2683 = vadd.xlane.f32.xlu0 %v2625_v6  ;;  %v7109_v6 = vld [vmem:[%s7672_s2 + $0x10] ss:$0 sm:$0xff] }
 0x687   : > { %v2528_v35 = vpop.xlane.xlu0 %2527 }
 0x688   : > { %v2563_v57 = vmul.f32 0.0078125, %v2528_v35  ;;  %v2626_v45 = vmul.f32 %v7076_v44, %v7076_v44 }
 0x68a   : > { %v7081_v25 = vsub.f32 %v6898_v16, %v2563_v57  ;;  %2685 = vadd.xlane.f32.xlu1 %v2626_v45 }
 0x68b   : > { %v2530_v49 = vpop.xlane.xlu1 %2529 }
 0x68c   : > { %v2564_v39 = vmul.f32 0.0078125, %v2530_v49  ;;  %v2627_v8 = vmul.f32 %v7081_v25, %v7081_v25 }
 0x68e   : > { %v7086_v7 = vsub.f32 %v6903_v54, %v2564_v39  ;;  %2687 = vadd.xlane.f32.xlu0 %v2627_v8 }
 0x68f   : > { %v2532_v14 = vpop.xlane.xlu0 %2531 }
 0x690   : > { %v2565_v22 = vmul.f32 0.0078125, %v2532_v14  ;;  %v2628_v59 = vmul.f32 %v7086_v7, %v7086_v7  ;;  %v4265_v14 = vld [vmem:[%s7679_s9 + $0x8] sm:$0xff]  }
 0x692   : > { %v7091_v37 = vsub.f32 %v6908_v23, %v2565_v22  ;;  %2689 = vadd.xlane.f32.xlu1 %v2628_v59 }
 0x693   : > { %v2534_v16 = vpop.xlane.xlu1 %2533 }
 0x694   : > { %v2566_v50 = vmul.f32 0.0078125, %v2534_v16  ;;  %v2629_v29 = vmul.f32 %v7091_v37, %v7091_v37 }
 0x696   : > { %v7096_v34 = vsub.f32 %v6916_v19, %v2566_v50  ;;  %2691 = vadd.xlane.f32.xlu0 %v2629_v29 }
 0x698   : > { %v2630_v54 = vmul.f32 %v7096_v34, %v7096_v34 }
 0x69a   : > { %2693 = vadd.xlane.f32.xlu1 %v2630_v54 }
 0x6ab   : > { %v2632_v10 = vpop.xlane.xlu0 %2631 }
 0x6ac   : > { %v2695_v48 = vmul.f32 0.0078125, %v2632_v10  ;;  %v4266_v10 = vld [vmem:[%s7679_s9 + $0x10] sm:$0xff]  }
 0x6ae   : > { %v2727_v52 = vadd.f32 1e-05, %v2695_v48 }
 0x6af   : > { %v2634_v2 = vpop.xlane.xlu1 %2633 }
 0x6b0   : > { %5234 = vrsqrt.f32 %v2727_v52  ;;  %v2696_v23 = vmul.f32 0.0078125, %v2634_v2 }
 0x6b2   : > { %v2728_v20 = vadd.f32 1e-05, %v2696_v23 }
 0x6b3   : > { %v2636_v63 = vpop.xlane.xlu0 %2635 }
 0x6b4   : > { %5236 = vrsqrt.f32 %v2728_v20  ;;  %v2697_v13 = vmul.f32 0.0078125, %v2636_v63 }
 0x6b6   : > { %v2729_v3 = vadd.f32 1e-05, %v2697_v13 }
 0x6b7   : > { %v2638_v5 = vpop.xlane.xlu1 %2637 }
 0x6b8   : > { %5238 = vrsqrt.f32 %v2729_v3  ;;  %v2698_v19 = vmul.f32 0.0078125, %v2638_v5 }
 0x6ba   : > { %v5235_v60 = vpop.eup %5234  ;;  %v2730_v40 = vadd.f32 1e-05, %v2698_v19 }
 0x6bb   : > { %v2640_v43 = vpop.xlane.xlu0 %2639  ;;  %v2791_v11 = vmul.f32 %v5235_v60, %v6923_v42  ;;  %v4195_v42 = vld [vmem:[%s7679_s9] sm:$0xff]  }
 0x6bc   : > { %5240 = vrsqrt.f32 %v2730_v40  ;;  %v2699_v9 = vmul.f32 0.0078125, %v2640_v43  ;;  %5081 = vmatprep.subr.bf16.mxu0 %v4195_v42 }
 0x6bd   : > { %v2823_v35 = vmul.f32 %v2791_v11, %v7103_v56  ;;  %5083 = vmatpush3.bf16.msra.mxu0 %v4195_v42 }
 0x6be   : > { %v5237_v57 = vpop.eup %5236  ;;  %v2731_v45 = vadd.f32 1e-05, %v2699_v9  ;;  %5085 = vmatprep.subr.bf16.mxu0 %v4265_v14 }
 0x6bf   : > { %v2792_v49 = vmul.f32 %v5237_v57, %v6931_v47  ;;  %v2642_v39 = vpop.xlane.xlu1 %2641  ;;  %v2855_v8 = vadd.f32 %v2823_v35, %v7109_v6 }
 0x6c0   : > { %5242 = vrsqrt.f32 %v2731_v45  ;;  %v2700_v22 = vmul.f32 0.0078125, %v2642_v39 }
 0x6c1   : > { %4760 = vmatprep.mubr.f32.mxu1 %v2855_v8  ;;  %v2824_v59 = vmul.f32 %v2792_v49, %v7103_v56  ;;  %5087 = vmatpush3.bf16.msra.mxu0 %v4265_v14 }
 0x6c2   : > { %v5239_v16 = vpop.eup %5238  ;;  %v2732_v47 = vadd.f32 1e-05, %v2700_v22  ;;  %5089 = vmatprep.subr.bf16.mxu0 %v4266_v10 }
 0x6c3   : > { %v2644_v50 = vpop.xlane.xlu0 %2643  ;;  %v2856_v29 = vadd.f32 %v2824_v59, %v7109_v6  ;;  %v2793_v54 = vmul.f32 %v5239_v16, %v6936_v61 }
 0x6c4   : > { %5244 = vrsqrt.f32 %v2732_v47  ;;  %v2701_v48 = vmul.f32 0.0078125, %v2644_v50 }
 0x6c5   : > { %4761 = vmatmul.mubr.f32.vlgmr.msra.gmra.mrb[112].mxu1 %v2856_v29  ;;  %v2825_v52 = vmul.f32 %v2793_v54, %v7103_v56  ;;  %5091 = vmatpush3.bf16.msra.mxu0 %v4266_v10 }
 0x6c6   : > { %v5241_v2 = vpop.eup %5240  ;;  %v2733_v23 = vadd.f32 1e-05, %v2701_v48 }
 0x6c7   : > { %v2857_v20 = vadd.f32 %v2825_v52, %v7109_v6  ;;  %v2794_v63 = vmul.f32 %v5241_v2, %v6941_v55  ;;  %v2646_v13 = vpop.xlane.xlu1 %2645 }
 0x6c8   : > { %5246 = vrsqrt.f32 %v2733_v23  ;;  %v2702_v61 = vmul.f32 0.0078125, %v2646_v13 }
 0x6c9   : > { %4763 = vmatprep.mubr.f32.mxu1 %v2857_v20  ;;  %v2826_v3 = vmul.f32 %v2794_v63, %v7103_v56 }
 0x6ca   : > { %v5243_v5 = vpop.eup %5242  ;;  %v2734_v19 = vadd.f32 1e-05, %v2702_v61 }
 0x6cb   : > { %v2858_v60 = vadd.f32 %v2826_v3, %v7109_v6  ;;  %v2795_v40 = vmul.f32 %v5243_v5, %v6946_v31  ;;  %v2648_v43 = vpop.xlane.xlu0 %2647 }
 0x6cc   : > { %5248 = vrsqrt.f32 %v2734_v19  ;;  %v2703_v55 = vmul.f32 0.0078125, %v2648_v43 }
 0x6cd   : > { %4764 = vmatmul.mubr.f32.gmra.mrb[114].mxu1 %v2858_v60  ;;  %v2827_v11 = vmul.f32 %v2795_v40, %v7103_v56 }
 0x6ce   : > { %v5245_v9 = vpop.eup %5244  ;;  %v2735_v45 = vadd.f32 1e-05, %v2703_v55 }
 0x6cf   : > { %v2859_v35 = vadd.f32 %v2827_v11, %v7109_v6  ;;  %v2796_v57 = vmul.f32 %v5245_v9, %v6951_v62  ;;  %v2650_v49 = vpop.xlane.xlu1 %2649 }
 0x6d0   : > { %5250 = vrsqrt.f32 %v2735_v45  ;;  %v2704_v42 = vmul.f32 0.0078125, %v2650_v49 }
 0x6d1   : > { %4766 = vmatprep.mubr.f32.mxu1 %v2859_v35  ;;  %v2828_v39 = vmul.f32 %v2796_v57, %v7103_v56 }
 0x6d2   : > { %v5247_v8 = vpop.eup %5246  ;;  %v2736_v22 = vadd.f32 1e-05, %v2704_v42 }
 0x6d3   : > { %v2860_v31 = vadd.f32 %v2828_v39, %v7109_v6  ;;  %v2797_v14 = vmul.f32 %v5247_v8, %v6956_v15  ;;  %v2652_v59 = vpop.xlane.xlu0 %2651 }
 0x6d4   : > { %5252 = vrsqrt.f32 %v2736_v22  ;;  %v2705_v47 = vmul.f32 0.0078125, %v2652_v59 }
 0x6d5   : > { %4767 = vmatmul.mubr.f32.gmra.mrb[116].mxu1 %v2860_v31  ;;  %v2829_v16 = vmul.f32 %v2797_v14, %v7103_v56 }
 0x6d6   : > { %v5249_v62 = vpop.eup %5248  ;;  %v2737_v29 = vadd.f32 1e-05, %v2705_v47 }
 0x6d7   : > { %v2861_v50 = vadd.f32 %v2829_v16, %v7109_v6  ;;  %v2798_v54 = vmul.f32 %v5249_v62, %v6967_v32  ;;  %v2654_v10 = vpop.xlane.xlu1 %2653 }
 0x6d8   : > { %5254 = vrsqrt.f32 %v2737_v29  ;;  %v2706_v48 = vmul.f32 0.0078125, %v2654_v10 }
 0x6d9   : > { %4769 = vmatprep.mubr.f32.mxu1 %v2861_v50  ;;  %v2830_v52 = vmul.f32 %v2798_v54, %v7103_v56 }
 0x6da   : > { %v5251_v15 = vpop.eup %5250  ;;  %v2738_v2 = vadd.f32 1e-05, %v2706_v48 }
 0x6db   : > { %v2862_v23 = vadd.f32 %v2830_v52, %v7109_v6  ;;  %v2656_v20 = vpop.xlane.xlu0 %2655  ;;  %v2799_v63 = vmul.f32 %v5251_v15, %v6975_v30 }
 0x6dc   : > { %5256 = vrsqrt.f32 %v2738_v2  ;;  %v2707_v13 = vmul.f32 0.0078125, %v2656_v20 }
 0x6dd   : > { %4770 = vmatmul.mubr.f32.gmra.mrb[118].mxu1 %v2862_v23  ;;  %v2831_v61 = vmul.f32 %v2799_v63, %v7103_v56 }
 0x6de   : > { %v5253_v3 = vpop.eup %5252  ;;  %v2739_v32 = vadd.f32 1e-05, %v2707_v13 }
 0x6df   : > { %v2658_v5 = vpop.xlane.xlu1 %2657  ;;  %v2863_v19 = vadd.f32 %v2831_v61, %v7109_v6  ;;  %v2800_v60 = vmul.f32 %v5253_v3, %v6983_v26 }
 0x6e0   : > { %5258 = vrsqrt.f32 %v2739_v32  ;;  %v2708_v40 = vmul.f32 0.0078125, %v2658_v5 }
 0x6e1   : > { %4772 = vmatprep.mubr.f32.mxu1 %v2863_v19  ;;  %v2832_v43 = vmul.f32 %v2800_v60, %v7103_v56 }
 0x6e2   : > { %v5255_v11 = vpop.eup %5254  ;;  %v2740_v9 = vadd.f32 1e-05, %v2708_v40 }
 0x6e3   : > { %v2660_v30 = vpop.xlane.xlu0 %2659  ;;  %v2864_v55 = vadd.f32 %v2832_v43, %v7109_v6  ;;  %v2801_v35 = vmul.f32 %v5255_v11, %v6991_v18 }
 0x6e4   : > { %5260 = vrsqrt.f32 %v2740_v9  ;;  %v2709_v57 = vmul.f32 0.0078125, %v2660_v30 }
 0x6e5   : > { %4773 = vmatmul.mubr.f32.gmra.mrb[120].mxu1 %v2864_v55  ;;  %v2833_v45 = vmul.f32 %v2801_v35, %v7103_v56 }
 0x6e6   : > { %v5257_v49 = vpop.eup %5256  ;;  %v2741_v39 = vadd.f32 1e-05, %v2709_v57 }
 0x6e7   : > { %v2662_v26 = vpop.xlane.xlu1 %2661  ;;  %v2865_v8 = vadd.f32 %v2833_v45, %v7109_v6  ;;  %v2802_v42 = vmul.f32 %v5257_v49, %v6996_v12 }
 0x6e8   : > { %5262 = vrsqrt.f32 %v2741_v39  ;;  %v2710_v31 = vmul.f32 0.0078125, %v2662_v26 }
 0x6e9   : > { %4775 = vmatprep.mubr.f32.mxu1 %v2865_v8  ;;  %v2834_v14 = vmul.f32 %v2802_v42, %v7103_v56 }
 0x6ea   : > { %v5259_v22 = vpop.eup %5258  ;;  %v2742_v59 = vadd.f32 1e-05, %v2710_v31 }
 0x6eb   : > { %v2664_v18 = vpop.xlane.xlu0 %2663  ;;  %v2866_v16 = vadd.f32 %v2834_v14, %v7109_v6  ;;  %v2803_v47 = vmul.f32 %v5259_v22, %v7001_v1 }
 0x6ec   : > { %5264 = vrsqrt.f32 %v2742_v59  ;;  %v2711_v62 = vmul.f32 0.0078125, %v2664_v18 }
 0x6ed   : > { %4776 = vmatmul.mubr.f32.gmra.mrb[122].mxu1 %v2866_v16  ;;  %v2835_v50 = vmul.f32 %v2803_v47, %v7103_v56 }
 0x6ee   : > { %v5261_v29 = vpop.eup %5260  ;;  %v2743_v54 = vadd.f32 1e-05, %v2711_v62 }
 0x6ef   : > { %v2666_v12 = vpop.xlane.xlu1 %2665  ;;  %v2867_v10 = vadd.f32 %v2835_v50, %v7109_v6  ;;  %v2804_v48 = vmul.f32 %v5261_v29, %v7006_v0 }
 0x6f0   : > { %5266 = vrsqrt.f32 %v2743_v54  ;;  %v2712_v52 = vmul.f32 0.0078125, %v2666_v12 }
 0x6f1   : > { %4778 = vmatprep.mubr.f32.mxu1 %v2867_v10  ;;  %v2836_v15 = vmul.f32 %v2804_v48, %v7103_v56 }
 0x6f2   : > { %v5263_v2 = vpop.eup %5262  ;;  %v2744_v23 = vadd.f32 1e-05, %v2712_v52 }
 0x6f3   : > { %v2668_v1 = vpop.xlane.xlu0 %2667  ;;  %v2868_v20 = vadd.f32 %v2836_v15, %v7109_v6  ;;  %v2805_v63 = vmul.f32 %v5263_v2, %v7011_v46 }
 0x6f4   : > { %5268 = vrsqrt.f32 %v2744_v23  ;;  %v2713_v13 = vmul.f32 0.0078125, %v2668_v1 }
 0x6f5   : > { %4779 = vmatmul.mubr.f32.gmra.mrb[124].mxu1 %v2868_v20  ;;  %v2837_v61 = vmul.f32 %v2805_v63, %v7103_v56 }
 0x6f6   : > { %v5265_v3 = vpop.eup %5264  ;;  %v2745_v32 = vadd.f32 1e-05, %v2713_v13 }
 0x6f7   : > { %v2670_v0 = vpop.xlane.xlu1 %2669  ;;  %v2869_v5 = vadd.f32 %v2837_v61, %v7109_v6  ;;  %v2806_v19 = vmul.f32 %v5265_v3, %v7016_v28 }
 0x6f8   : > { %5270 = vrsqrt.f32 %v2745_v32  ;;  %v2714_v60 = vmul.f32 0.0078125, %v2670_v0 }
 0x6f9   : > { %4781 = vmatprep.mubr.f32.mxu1 %v2869_v5  ;;  %v2838_v40 = vmul.f32 %v2806_v19, %v7103_v56 }
 0x6fa   : > { %v5267_v43 = vpop.eup %5266  ;;  %v2746_v11 = vadd.f32 1e-05, %v2714_v60 }
 0x6fb   : > { %v2672_v46 = vpop.xlane.xlu0 %2671  ;;  %v2870_v9 = vadd.f32 %v2838_v40, %v7109_v6  ;;  %v2807_v30 = vmul.f32 %v5267_v43, %v7021_v21 }
 0x6fc   : > { %5272 = vrsqrt.f32 %v2746_v11  ;;  %v2715_v55 = vmul.f32 0.0078125, %v2672_v46 }
 0x6fd   : > { %4782 = vmatmul.mubr.f32.gmra.mrb[126].mxu1 %v2870_v9  ;;  %v2839_v35 = vmul.f32 %v2807_v30, %v7103_v56 }
 0x6fe   : > { %v5269_v57 = vpop.eup %5268  ;;  %v2747_v45 = vadd.f32 1e-05, %v2715_v55 }
 0x6ff   : > { %v2674_v28 = vpop.xlane.xlu1 %2673  ;;  %v2871_v49 = vadd.f32 %v2839_v35, %v7109_v6  ;;  %v2808_v39 = vmul.f32 %v5269_v57, %v7026_v27 }
 0x700   : > { %5274 = vrsqrt.f32 %v2747_v45  ;;  %v2716_v26 = vmul.f32 0.0078125, %v2674_v28 }
 0x701   : > { %4784 = vmatprep.mubr.f32.mxu1 %v2871_v49  ;;  %v2840_v8 = vmul.f32 %v2808_v39, %v7103_v56  ;;  %v4268_v39 = vld [vmem:[%s7679_s9 + $0x20] sm:$0xff]  }
 0x702   : > { %v5271_v42 = vpop.eup %5270  ;;  %v2748_v31 = vadd.f32 1e-05, %v2716_v26 }
 0x703   : > { %v2676_v21 = vpop.xlane.xlu0 %2675  ;;  %v2872_v14 = vadd.f32 %v2840_v8, %v7109_v6  ;;  %v2809_v22 = vmul.f32 %v5271_v42, %v7031_v33 }
 0x704   : > { %5276 = vrsqrt.f32 %v2748_v31  ;;  %v2717_v59 = vmul.f32 0.0078125, %v2676_v21 }
 0x705   : > { %4785 = vmatmul.mubr.f32.gmra.mrb[128].mxu1 %v2872_v14  ;;  %v2841_v18 = vmul.f32 %v2809_v22, %v7103_v56  ;;  %v4269_v22 = vld [vmem:[%s7679_s9 + $0x28] sm:$0xff]  }
 0x706   : > { %v5273_v16 = vpop.eup %5272  ;;  %v2749_v47 = vadd.f32 1e-05, %v2717_v59 }
 0x707   : > { %v2678_v27 = vpop.xlane.xlu1 %2677  ;;  %v2873_v62 = vadd.f32 %v2841_v18, %v7109_v6  ;;  %v2810_v50 = vmul.f32 %v5273_v16, %v7036_v36 }
 0x708   : > { %5278 = vrsqrt.f32 %v2749_v47  ;;  %v2718_v29 = vmul.f32 0.0078125, %v2678_v27 }
 0x709   : > { %4787 = vmatprep.mubr.f32.mxu1 %v2873_v62  ;;  %v2842_v54 = vmul.f32 %v2810_v50, %v7103_v56  ;;  %v4270_v50 = vld [vmem:[%s7679_s9 + $0x30] sm:$0xff]  }
 0x70a   : > { %v5275_v12 = vpop.eup %5274  ;;  %v2750_v10 = vadd.f32 1e-05, %v2718_v29 }
 0x70b   : > { %v2680_v33 = vpop.xlane.xlu0 %2679  ;;  %v2874_v48 = vadd.f32 %v2842_v54, %v7109_v6  ;;  %v2811_v52 = vmul.f32 %v5275_v12, %v7041_v4 }
 0x70c   : > { %5280 = vrsqrt.f32 %v2750_v10  ;;  %v2719_v15 = vmul.f32 0.0078125, %v2680_v33 }
 0x70d   : > { %4788 = vmatmul.mubr.f32.gmra.mrb[130].mxu1 %v2874_v48  ;;  %v2843_v2 = vmul.f32 %v2811_v52, %v7103_v56  ;;  %v4271_v52 = vld [vmem:[%s7679_s9 + $0x38] sm:$0xff]  }
 0x70e   : > { %v5277_v23 = vpop.eup %5276  ;;  %v2751_v1 = vadd.f32 1e-05, %v2719_v15 }
 0x70f   : > { %v2682_v36 = vpop.xlane.xlu1 %2681  ;;  %v2875_v20 = vadd.f32 %v2843_v2, %v7109_v6  ;;  %v2812_v63 = vmul.f32 %v5277_v23, %v7046_v53 }
 0x710   : > { %5282 = vrsqrt.f32 %v2751_v1  ;;  %v2720_v13 = vmul.f32 0.0078125, %v2682_v36 }
 0x711   : > { %4790 = vmatprep.mubr.f32.mxu1 %v2875_v20  ;;  %v2844_v61 = vmul.f32 %v2812_v63, %v7103_v56 }
 0x712   : > { %v5279_v3 = vpop.eup %5278  ;;  %v2752_v32 = vadd.f32 1e-05, %v2720_v13 }
 0x713   : > { %v2684_v4 = vpop.xlane.xlu0 %2683  ;;  %v2876_v0 = vadd.f32 %v2844_v61, %v7109_v6  ;;  %v2813_v5 = vmul.f32 %v5279_v3, %v7051_v17  ;;  %v4267_v17 = vld [vmem:[%s7679_s9 + $0x18] sm:$0xff]  }
 0x714   : > { %5284 = vrsqrt.f32 %v2752_v32  ;;  %v2721_v19 = vmul.f32 0.0078125, %v2684_v4  ;;  %5093 = vmatprep.subr.bf16.mxu0 %v4267_v17 }
 0x715   : > { %4791 = vmatmul.mubr.f32.gmra.mrb[132].mxu1 %v2876_v0  ;;  %v2845_v60 = vmul.f32 %v2813_v5, %v7103_v56  ;;  %5095 = vmatpush3.bf16.msra.mxu0 %v4267_v17 }
 0x716   : > { %v5281_v40 = vpop.eup %5280  ;;  %v2753_v43 = vadd.f32 1e-05, %v2721_v19  ;;  %5097 = vmatprep.subr.bf16.mxu0 %v4268_v39 }
 0x717   : > { %v2686_v53 = vpop.xlane.xlu1 %2685  ;;  %v2877_v11 = vadd.f32 %v2845_v60, %v7109_v6  ;;  %v2814_v46 = vmul.f32 %v5281_v40, %v7056_v58  ;;  %v7233_v60 = vld [vmem:[%s7672_s2 + $0x11] ss:$0 sm:$0xff] }
 0x718   : > { %5286 = vrsqrt.f32 %v2753_v43  ;;  %v2722_v9 = vmul.f32 0.0078125, %v2686_v53 }
 0x719   : > { %4793 = vmatprep.mubr.f32.mxu1 %v2877_v11  ;;  %v2846_v30 = vmul.f32 %v2814_v46, %v7103_v56  ;;  %5099 = vmatpush3.bf16.msra.mxu0 %v4268_v39 }
 0x71a   : > { %v5283_v55 = vpop.eup %5282  ;;  %v2754_v35 = vadd.f32 1e-05, %v2722_v9  ;;  %5101 = vmatprep.subr.bf16.mxu0 %v4269_v22 }
 0x71b   : > { %v2688_v57 = vpop.xlane.xlu0 %2687  ;;  %v2878_v45 = vadd.f32 %v2846_v30, %v7109_v6  ;;  %v2815_v28 = vmul.f32 %v5283_v55, %v7061_v51 }
 0x71c   : > { %5288 = vrsqrt.f32 %v2754_v35  ;;  %v2723_v58 = vmul.f32 0.0078125, %v2688_v57 }
 0x71d   : > { %4794 = vmatmul.mubr.f32.gmra.mrb[134].mxu1 %v2878_v45  ;;  %v2847_v49 = vmul.f32 %v2815_v28, %v7103_v56  ;;  %5103 = vmatpush3.bf16.msra.mxu0 %v4269_v22 }
 0x71e   : > { %v5285_v26 = vpop.eup %5284  ;;  %v2755_v8 = vadd.f32 1e-05, %v2723_v58  ;;  %5105 = vmatprep.subr.bf16.mxu0 %v4270_v50 }
 0x71f   : > { %v2690_v42 = vpop.xlane.xlu1 %2689  ;;  %v2879_v31 = vadd.f32 %v2847_v49, %v7109_v6  ;;  %v2816_v21 = vmul.f32 %v5285_v26, %v7066_v41 }
 0x720   : > { %5290 = vrsqrt.f32 %v2755_v8  ;;  %v2724_v51 = vmul.f32 0.0078125, %v2690_v42 }
 0x721   : > { %4796 = vmatprep.mubr.f32.mxu1 %v2879_v31  ;;  %v2848_v14 = vmul.f32 %v2816_v21, %v7103_v56  ;;  %5107 = vmatpush3.bf16.msra.mxu0 %v4270_v50 }
 0x722   : > { %v5287_v59 = vpop.eup %5286  ;;  %v2756_v18 = vadd.f32 1e-05, %v2724_v51  ;;  %5109 = vmatprep.subr.bf16.mxu0 %v4271_v52 }
 0x723   : > { %v2692_v16 = vpop.xlane.xlu0 %2691  ;;  %v2880_v47 = vadd.f32 %v2848_v14, %v7109_v6  ;;  %v2817_v27 = vmul.f32 %v5287_v59, %v7071_v24 }
 0x724   : > { %5292 = vrsqrt.f32 %v2756_v18  ;;  %v2725_v41 = vmul.f32 0.0078125, %v2692_v16 }
 0x725   : > { %4797 = vmatmul.mubr.f32.gmra.mrb[136].mxu1 %v2880_v47  ;;  %v2849_v62 = vmul.f32 %v2817_v27, %v7103_v56  ;;  %5111 = vmatpush3.bf16.msra.mxu0 %v4271_v52 }
 0x726   : > { %v5289_v29 = vpop.eup %5288  ;;  %v2757_v54 = vadd.f32 1e-05, %v2725_v41 }
 0x727   : > { %v2694_v12 = vpop.xlane.xlu1 %2693  ;;  %v2881_v10 = vadd.f32 %v2849_v62, %v7109_v6  ;;  %v2818_v33 = vmul.f32 %v5289_v29, %v7076_v44 }
 0x728   : > { %5294 = vrsqrt.f32 %v2757_v54  ;;  %v2726_v24 = vmul.f32 0.0078125, %v2694_v12 }
 0x729   : > { %4799 = vmatprep.mubr.f32.mxu1 %v2881_v10  ;;  %v2850_v48 = vmul.f32 %v2818_v33, %v7103_v56 }
 0x72a   : > { %v5291_v15 = vpop.eup %5290  ;;  %v2758_v2 = vadd.f32 1e-05, %v2726_v24 }
 0x72b   : > { %v2882_v23 = vadd.f32 %v2850_v48, %v7109_v6  ;;  %v2819_v1 = vmul.f32 %v5291_v15, %v7081_v25 }
 0x72c   : > { %5296 = vrsqrt.f32 %v2758_v2 }
 0x72d   : > { %4800 = vmatmul.mubr.f32.gmra.mrb[138].mxu1 %v2882_v23  ;;  %v2851_v44 = vmul.f32 %v2819_v1, %v7103_v56 }
 0x72e   : > { %v5293_v36 = vpop.eup %5292 }
 0x72f   : > { %v2883_v20 = vadd.f32 %v2851_v44, %v7109_v6  ;;  %v2820_v63 = vmul.f32 %v5293_v36, %v7086_v7 }
 0x731   : > { %4802 = vmatprep.mubr.f32.mxu1 %v2883_v20  ;;  %v2852_v13 = vmul.f32 %v2820_v63, %v7103_v56 }
 0x732   : > { %v5295_v61 = vpop.eup %5294 }
 0x733   : > { %v2884_v3 = vadd.f32 %v2852_v13, %v7109_v6  ;;  %v2821_v32 = vmul.f32 %v5295_v61, %v7091_v37 }
 0x735   : > { %4803 = vmatmul.mubr.f32.gmra.mrb[140].mxu1 %v2884_v3  ;;  %v2853_v25 = vmul.f32 %v2821_v32, %v7103_v56 }
 0x736   : > { %v5297_v4 = vpop.eup %5296 }
 0x737   : > { %v2885_v0 = vadd.f32 %v2853_v25, %v7109_v6  ;;  %v2822_v5 = vmul.f32 %v5297_v4, %v7096_v34 }
 0x739   : > { %4805 = vmatprep.mubr.f32.mxu1 %v2885_v0  ;;  %v2854_v19 = vmul.f32 %v2822_v5, %v7103_v56 }
 0x73b   : > { %v2886_v7 = vadd.f32 %v2854_v19, %v7109_v6 }
 0x73d   : > { %4806 = vmatmul.mubr.f32.gmra.mrb[142].mxu1 %v2886_v7 }
 0x798   : > { %v4762_v37 = vpop.f32.mrb[112].mxu1 }
 0x799   : > { %v2992_v40 = vadd.f32 %v4762_v37, %v7233_v60  ;;  %v2986_v43 = vpop.f32.mrb[113].mxu1 }
 0x79a   : > { %v2987_v53 = vadd.f32 %v2986_v43, %v7233_v60 }
 0x79b   : > { %v3178_v11 = vmul.f32 0.70710677, %v2992_v40  ;;  %v3146_v26 = vmul.f32 0.5, %v2992_v40 }
 0x79c   : > { %v3177_v46 = vmul.f32 0.70710677, %v2987_v53  ;;  %v3145_v28 = vmul.f32 0.5, %v2987_v53 }
 0x79d   : > { %5298 = verf.f32 %v3178_v11 }
 0x79e   : > { %5300 = verf.f32 %v3177_v46 }
 0x7a0   : > { %v4765_v34 = vpop.f32.mrb[114].mxu1 }
 0x7a1   : > { %v3002_v56 = vadd.f32 %v4765_v34, %v7233_v60  ;;  %v2996_v6 = vpop.f32.mrb[115].mxu1 }
 0x7a2   : > { %v2997_v9 = vadd.f32 %v2996_v6, %v7233_v60 }
 0x7a3   : > { %v3180_v30 = vmul.f32 0.70710677, %v3002_v56  ;;  %v3148_v27 = vmul.f32 0.5, %v3002_v56 }
 0x7a4   : > { %v3179_v17 = vmul.f32 0.70710677, %v2997_v9  ;;  %v3147_v18 = vmul.f32 0.5, %v2997_v9 }
 0x7a5   : > { %5302 = verf.f32 %v3180_v30 }
 0x7a6   : > { %5304 = verf.f32 %v3179_v17 }
 0x7a7   : > { %v5299_v55 = vpop.eup %5298 }
 0x7a8   : > { %v5301_v35 = vpop.eup %5300  ;;  %v3242_v57 = vadd.f32 1.0, %v5299_v55  ;;  %v4768_v45 = vpop.f32.mrb[116].mxu1 }
 0x7a9   : > { %v3241_v58 = vadd.f32 1.0, %v5301_v35  ;;  %v3012_v49 = vadd.f32 %v4768_v45, %v7233_v60  ;;  %v3006_v39 = vpop.f32.mrb[117].mxu1 }
 0x7aa   : > { %v3007_v8 = vadd.f32 %v3006_v39, %v7233_v60  ;;  %v3274_v21 = vmul.f32 %v3242_v57, %v3146_v26 }
 0x7ab   : > { %v3182_v42 = vmul.f32 0.70710677, %v3012_v49  ;;  %v3273_v31 = vmul.f32 %v3241_v58, %v3145_v28  ;;  %v3150_v2 = vmul.f32 0.5, %v3012_v49 }
 0x7ac   : > { %v3181_v51 = vmul.f32 0.70710677, %v3007_v8  ;;  %v3149_v52 = vmul.f32 0.5, %v3007_v8 }
 0x7ad   : > { %5306 = verf.f32 %v3182_v42  ;;  %4840 = vmatprep.mubr.f32.mxu0 %v3273_v31 }
 0x7ae   : > { %5308 = verf.f32 %v3181_v51  ;;  %4841 = vmatmul.mubr.f32.vlgmr.msra.gmra.mrb[112].mxu0 %v3274_v21 }
 0x7af   : > { %v5303_v14 = vpop.eup %5302 }
 0x7b0   : > { %v5305_v22 = vpop.eup %5304  ;;  %v3244_v59 = vadd.f32 1.0, %v5303_v14  ;;  %v4771_v47 = vpop.f32.mrb[118].mxu1 }
 0x7b1   : > { %v3243_v16 = vadd.f32 1.0, %v5305_v22  ;;  %v3022_v41 = vadd.f32 %v4771_v47, %v7233_v60  ;;  %v3016_v62 = vpop.f32.mrb[119].mxu1 }
 0x7b2   : > { %v3017_v50 = vadd.f32 %v3016_v62, %v7233_v60  ;;  %v3276_v12 = vmul.f32 %v3244_v59, %v3148_v27 }
 0x7b3   : > { %v3275_v29 = vmul.f32 %v3243_v16, %v3147_v18  ;;  %v3184_v54 = vmul.f32 0.70710677, %v3022_v41  ;;  %v3152_v19 = vmul.f32 0.5, %v3022_v41 }
 0x7b4   : > { %v3183_v10 = vmul.f32 0.70710677, %v3017_v50  ;;  %v3151_v4 = vmul.f32 0.5, %v3017_v50 }
 0x7b5   : > { %4843 = vmatprep.mubr.f32.mxu0 %v3275_v29  ;;  %5310 = verf.f32 %v3184_v54 }
 0x7b6   : > { %4844 = vmatmul.mubr.f32.gmra.mrb[114].mxu0 %v3276_v12  ;;  %5312 = verf.f32 %v3183_v10 }
 0x7b7   : > { %v5307_v33 = vpop.eup %5306 }
 0x7b8   : > { %v5309_v24 = vpop.eup %5308  ;;  %v3246_v48 = vadd.f32 1.0, %v5307_v33  ;;  %v4774_v23 = vpop.f32.mrb[120].mxu1 }
 0x7b9   : > { %v3245_v15 = vadd.f32 1.0, %v5309_v24  ;;  %v3032_v1 = vadd.f32 %v4774_v23, %v7233_v60  ;;  %v3026_v44 = vpop.f32.mrb[121].mxu1 }
 0x7ba   : > { %v3027_v20 = vadd.f32 %v3026_v44, %v7233_v60  ;;  %v3278_v63 = vmul.f32 %v3246_v48, %v3150_v2 }
 0x7bb   : > { %v3277_v36 = vmul.f32 %v3245_v15, %v3149_v52  ;;  %v3186_v13 = vmul.f32 0.70710677, %v3032_v1  ;;  %v3154_v57 = vmul.f32 0.5, %v3032_v1 }
 0x7bc   : > { %v3185_v61 = vmul.f32 0.70710677, %v3027_v20  ;;  %v3153_v30 = vmul.f32 0.5, %v3027_v20 }
 0x7bd   : > { %4846 = vmatprep.mubr.f32.mxu0 %v3277_v36  ;;  %5314 = verf.f32 %v3186_v13 }
 0x7be   : > { %4847 = vmatmul.mubr.f32.gmra.mrb[116].mxu0 %v3278_v63  ;;  %5316 = verf.f32 %v3185_v61 }
 0x7bf   : > { %v5311_v3 = vpop.eup %5310 }
 0x7c0   : > { %v5313_v32 = vpop.eup %5312  ;;  %v3248_v25 = vadd.f32 1.0, %v5311_v3  ;;  %v4777_v5 = vpop.f32.mrb[122].mxu1 }
 0x7c1   : > { %v3247_v0 = vadd.f32 1.0, %v5313_v32  ;;  %v3042_v7 = vadd.f32 %v4777_v5, %v7233_v60  ;;  %v3036_v37 = vpop.f32.mrb[123].mxu1 }
 0x7c2   : > { %v3037_v40 = vadd.f32 %v3036_v37, %v7233_v60  ;;  %v3280_v11 = vmul.f32 %v3248_v25, %v3152_v19 }
 0x7c3   : > { %v3279_v43 = vmul.f32 %v3247_v0, %v3151_v4  ;;  %v3188_v53 = vmul.f32 0.70710677, %v3042_v7  ;;  %v3156_v59 = vmul.f32 0.5, %v3042_v7 }
 0x7c4   : > { %v3187_v46 = vmul.f32 0.70710677, %v3037_v40  ;;  %v3155_v21 = vmul.f32 0.5, %v3037_v40 }
 0x7c5   : > { %4849 = vmatprep.mubr.f32.mxu0 %v3279_v43  ;;  %5318 = verf.f32 %v3188_v53 }
 0x7c6   : > { %4850 = vmatmul.mubr.f32.gmra.mrb[118].mxu0 %v3280_v11  ;;  %5320 = verf.f32 %v3187_v46 }
 0x7c7   : > { %v5315_v34 = vpop.eup %5314 }
 0x7c8   : > { %v5317_v56 = vpop.eup %5316  ;;  %v3250_v6 = vadd.f32 1.0, %v5315_v34  ;;  %v4780_v9 = vpop.f32.mrb[124].mxu1 }
 0x7c9   : > { %v3249_v17 = vadd.f32 1.0, %v5317_v56  ;;  %v3052_v55 = vadd.f32 %v4780_v9, %v7233_v60  ;;  %v3046_v35 = vpop.f32.mrb[125].mxu1 }
 0x7ca   : > { %v3047_v45 = vadd.f32 %v3046_v35, %v7233_v60  ;;  %v3282_v39 = vmul.f32 %v3250_v6, %v3154_v57 }
 0x7cb   : > { %v3190_v28 = vmul.f32 0.70710677, %v3052_v55  ;;  %v3281_v58 = vmul.f32 %v3249_v17, %v3153_v30  ;;  %v3158_v48 = vmul.f32 0.5, %v3052_v55 }
 0x7cc   : > { %v3189_v49 = vmul.f32 0.70710677, %v3047_v45  ;;  %v3157_v12 = vmul.f32 0.5, %v3047_v45 }
 0x7cd   : > { %5322 = verf.f32 %v3190_v28  ;;  %4852 = vmatprep.mubr.f32.mxu0 %v3281_v58 }
 0x7ce   : > { %5324 = verf.f32 %v3189_v49  ;;  %4853 = vmatmul.mubr.f32.gmra.mrb[120].mxu0 %v3282_v39 }
 0x7cf   : > { %v5319_v26 = vpop.eup %5318 }
 0x7d0   : > { %v5321_v8 = vpop.eup %5320  ;;  %v3252_v42 = vadd.f32 1.0, %v5319_v26  ;;  %v4783_v31 = vpop.f32.mrb[126].mxu1 }
 0x7d1   : > { %v3251_v51 = vadd.f32 1.0, %v5321_v8  ;;  %v3062_v14 = vadd.f32 %v4783_v31, %v7233_v60  ;;  %v3056_v22 = vpop.f32.mrb[127].mxu1 }
 0x7d2   : > { %v3057_v18 = vadd.f32 %v3056_v22, %v7233_v60  ;;  %v3284_v41 = vmul.f32 %v3252_v42, %v3156_v59 }
 0x7d3   : > { %v3192_v16 = vmul.f32 0.70710677, %v3062_v14  ;;  %v3283_v47 = vmul.f32 %v3251_v51, %v3155_v21  ;;  %v3160_v25 = vmul.f32 0.5, %v3062_v14 }
 0x7d4   : > { %v3191_v27 = vmul.f32 0.70710677, %v3057_v18  ;;  %v3159_v13 = vmul.f32 0.5, %v3057_v18 }
 0x7d5   : > { %5326 = verf.f32 %v3192_v16  ;;  %4855 = vmatprep.mubr.f32.mxu0 %v3283_v47 }
 0x7d6   : > { %5328 = verf.f32 %v3191_v27  ;;  %4856 = vmatmul.mubr.f32.gmra.mrb[122].mxu0 %v3284_v41 }
 0x7d7   : > { %v5323_v62 = vpop.eup %5322 }
 0x7d8   : > { %v5325_v50 = vpop.eup %5324  ;;  %v3254_v29 = vadd.f32 1.0, %v5323_v62  ;;  %v4786_v54 = vpop.f32.mrb[128].mxu1 }
 0x7d9   : > { %v3253_v10 = vadd.f32 1.0, %v5325_v50  ;;  %v3072_v33 = vadd.f32 %v4786_v54, %v7233_v60  ;;  %v3066_v24 = vpop.f32.mrb[129].mxu1 }
 0x7da   : > { %v3067_v52 = vadd.f32 %v3066_v24, %v7233_v60  ;;  %v3286_v1 = vmul.f32 %v3254_v29, %v3158_v48 }
 0x7db   : > { %v3194_v15 = vmul.f32 0.70710677, %v3072_v33  ;;  %v3285_v2 = vmul.f32 %v3253_v10, %v3157_v12  ;;  %v3162_v6 = vmul.f32 0.5, %v3072_v33 }
 0x7dc   : > { %v3193_v23 = vmul.f32 0.70710677, %v3067_v52  ;;  %v3161_v11 = vmul.f32 0.5, %v3067_v52 }
 0x7dd   : > { %5330 = verf.f32 %v3194_v15  ;;  %4858 = vmatprep.mubr.f32.mxu0 %v3285_v2 }
 0x7de   : > { %5332 = verf.f32 %v3193_v23  ;;  %4859 = vmatmul.mubr.f32.gmra.mrb[124].mxu0 %v3286_v1 }
 0x7df   : > { %v5327_v44 = vpop.eup %5326 }
 0x7e0   : > { %v5329_v36 = vpop.eup %5328  ;;  %v3256_v20 = vadd.f32 1.0, %v5327_v44  ;;  %v4789_v63 = vpop.f32.mrb[130].mxu1 }
 0x7e1   : > { %v3255_v61 = vadd.f32 1.0, %v5329_v36  ;;  %v3082_v3 = vadd.f32 %v4789_v63, %v7233_v60  ;;  %v3076_v32 = vpop.f32.mrb[131].mxu1 }
 0x7e2   : > { %v3077_v4 = vadd.f32 %v3076_v32, %v7233_v60  ;;  %v3288_v7 = vmul.f32 %v3256_v20, %v3160_v25 }
 0x7e3   : > { %v3196_v0 = vmul.f32 0.70710677, %v3082_v3  ;;  %v3287_v5 = vmul.f32 %v3255_v61, %v3159_v13  ;;  %v3164_v42 = vmul.f32 0.5, %v3082_v3 }
 0x7e4   : > { %v3195_v19 = vmul.f32 0.70710677, %v3077_v4  ;;  %v3163_v49 = vmul.f32 0.5, %v3077_v4 }
 0x7e5   : > { %5334 = verf.f32 %v3196_v0  ;;  %4861 = vmatprep.mubr.f32.mxu0 %v3287_v5 }
 0x7e6   : > { %5336 = verf.f32 %v3195_v19  ;;  %4862 = vmatmul.mubr.f32.gmra.mrb[126].mxu0 %v3288_v7 }
 0x7e7   : > { %v5331_v37 = vpop.eup %5330 }
 0x7e8   : > { %v5333_v40 = vpop.eup %5332  ;;  %v3258_v43 = vadd.f32 1.0, %v5331_v37  ;;  %v4792_v53 = vpop.f32.mrb[132].mxu1 }
 0x7e9   : > { %v3257_v46 = vadd.f32 1.0, %v5333_v40  ;;  %v3092_v34 = vadd.f32 %v4792_v53, %v7233_v60  ;;  %v3086_v56 = vpop.f32.mrb[133].mxu1 }
 0x7ea   : > { %v3087_v9 = vadd.f32 %v3086_v56, %v7233_v60  ;;  %v3290_v35 = vmul.f32 %v3258_v43, %v3162_v6 }
 0x7eb   : > { %v3198_v30 = vmul.f32 0.70710677, %v3092_v34  ;;  %v3289_v17 = vmul.f32 %v3257_v46, %v3161_v11  ;;  %v3166_v29 = vmul.f32 0.5, %v3092_v34 }
 0x7ec   : > { %v3197_v55 = vmul.f32 0.70710677, %v3087_v9  ;;  %v3165_v27 = vmul.f32 0.5, %v3087_v9 }
 0x7ed   : > { %5338 = verf.f32 %v3198_v30  ;;  %4864 = vmatprep.mubr.f32.mxu0 %v3289_v17 }
 0x7ee   : > { %5340 = verf.f32 %v3197_v55  ;;  %4865 = vmatmul.mubr.f32.gmra.mrb[128].mxu0 %v3290_v35 }
 0x7ef   : > { %v5335_v57 = vpop.eup %5334 }
 0x7f0   : > { %v5337_v45 = vpop.eup %5336  ;;  %v3260_v28 = vadd.f32 1.0, %v5335_v57  ;;  %v4795_v58 = vpop.f32.mrb[134].mxu1 }
 0x7f1   : > { %v3259_v39 = vadd.f32 1.0, %v5337_v45  ;;  %v3102_v26 = vadd.f32 %v4795_v58, %v7233_v60  ;;  %v3096_v8 = vpop.f32.mrb[135].mxu1 }
 0x7f2   : > { %v3097_v31 = vadd.f32 %v3096_v8, %v7233_v60  ;;  %v3292_v22 = vmul.f32 %v3260_v28, %v3164_v42 }
 0x7f3   : > { %v3200_v21 = vmul.f32 0.70710677, %v3102_v26  ;;  %v3291_v51 = vmul.f32 %v3259_v39, %v3163_v49  ;;  %v3168_v20 = vmul.f32 0.5, %v3102_v26 }
 0x7f4   : > { %v3199_v14 = vmul.f32 0.70710677, %v3097_v31  ;;  %v3167_v23 = vmul.f32 0.5, %v3097_v31 }
 0x7f5   : > { %5342 = verf.f32 %v3200_v21  ;;  %4867 = vmatprep.mubr.f32.mxu0 %v3291_v51 }
 0x7f6   : > { %5344 = verf.f32 %v3199_v14  ;;  %4868 = vmatmul.mubr.f32.gmra.mrb[130].mxu0 %v3292_v22 }
 0x7f7   : > { %v5339_v59 = vpop.eup %5338 }
 0x7f8   : > { %v5341_v18 = vpop.eup %5340  ;;  %v3262_v16 = vadd.f32 1.0, %v5339_v59  ;;  %v4798_v47 = vpop.f32.mrb[136].mxu1 }
 0x7f9   : > { %v3261_v41 = vadd.f32 1.0, %v5341_v18  ;;  %v3112_v62 = vadd.f32 %v4798_v47, %v7233_v60  ;;  %v3106_v50 = vpop.f32.mrb[137].mxu1 }
 0x7fa   : > { %v3107_v54 = vadd.f32 %v3106_v50, %v7233_v60  ;;  %v3294_v24 = vmul.f32 %v3262_v16, %v3166_v29 }
 0x7fb   : > { %v3202_v12 = vmul.f32 0.70710677, %v3112_v62  ;;  %v3293_v10 = vmul.f32 %v3261_v41, %v3165_v27  ;;  %v3170_v43 = vmul.f32 0.5, %v3112_v62 }
 0x7fc   : > { %v3201_v33 = vmul.f32 0.70710677, %v3107_v54  ;;  %v3169_v19 = vmul.f32 0.5, %v3107_v54  ;;  %v7268_v54 = vand.u32 127, %v1816_v38 }
 0x7fd   : > { %5346 = verf.f32 %v3202_v12  ;;  %4870 = vmatprep.mubr.f32.mxu0 %v3293_v10  ;;  %v7273_v12 = vld [vmem:[%s7672_s2 + $0x12] ss:$0 sm:$0xff] }
 0x7fe   : > { %5348 = verf.f32 %v3201_v33  ;;  %4871 = vmatmul.mubr.f32.gmra.mrb[132].mxu0 %v3294_v24  ;;  %vm3565_vm1 = vcmp.lt.s32.totalorder %v7268_v54, 3 }
 0x7ff   : > { %v5343_v48 = vpop.eup %5342 }
 0x800   : > { %v5345_v52 = vpop.eup %5344  ;;  %v3264_v15 = vadd.f32 1.0, %v5343_v48  ;;  %v4801_v2 = vpop.f32.mrb[138].mxu1 }
 0x801   : > { %v3263_v1 = vadd.f32 1.0, %v5345_v52  ;;  %v3122_v44 = vadd.f32 %v4801_v2, %v7233_v60  ;;  %v3116_v36 = vpop.f32.mrb[139].mxu1 }
 0x802   : > { %v3117_v63 = vadd.f32 %v3116_v36, %v7233_v60  ;;  %v3296_v32 = vmul.f32 %v3264_v15, %v3168_v20 }
 0x803   : > { %v3204_v13 = vmul.f32 0.70710677, %v3122_v44  ;;  %v3295_v61 = vmul.f32 %v3263_v1, %v3167_v23  ;;  %v3172_v28 = vmul.f32 0.5, %v3122_v44 }
 0x804   : > { %v3203_v3 = vmul.f32 0.70710677, %v3117_v63  ;;  %v3171_v55 = vmul.f32 0.5, %v3117_v63 }
 0x805   : > { %5350 = verf.f32 %v3204_v13  ;;  %4873 = vmatprep.mubr.f32.mxu0 %v3295_v61 }
 0x806   : > { %5352 = verf.f32 %v3203_v3  ;;  %4874 = vmatmul.mubr.f32.gmra.mrb[134].mxu0 %v3296_v32 }
 0x807   : > { %v5347_v25 = vpop.eup %5346 }
 0x808   : > { %v5349_v4 = vpop.eup %5348  ;;  %v3266_v0 = vadd.f32 1.0, %v5347_v25  ;;  %v4804_v5 = vpop.f32.mrb[140].mxu1 }
 0x809   : > { %v3265_v7 = vadd.f32 1.0, %v5349_v4  ;;  %v3132_v37 = vadd.f32 %v4804_v5, %v7233_v60  ;;  %v3126_v40 = vpop.f32.mrb[141].mxu1 }
 0x80a   : > { %v3127_v53 = vadd.f32 %v3126_v40, %v7233_v60  ;;  %v3298_v56 = vmul.f32 %v3266_v0, %v3170_v43 }
 0x80b   : > { %v3206_v11 = vmul.f32 0.70710677, %v3132_v37  ;;  %v3297_v46 = vmul.f32 %v3265_v7, %v3169_v19  ;;  %v3174_v22 = vmul.f32 0.5, %v3132_v37 }
 0x80c   : > { %v3205_v34 = vmul.f32 0.70710677, %v3127_v53  ;;  %v3173_v51 = vmul.f32 0.5, %v3127_v53 }
 0x80d   : > { %5354 = verf.f32 %v3206_v11  ;;  %4876 = vmatprep.mubr.f32.mxu0 %v3297_v46 }
 0x80e   : > { %5356 = verf.f32 %v3205_v34  ;;  %4877 = vmatmul.mubr.f32.gmra.mrb[136].mxu0 %v3298_v56 }
 0x80f   : > { %v5351_v6 = vpop.eup %5350 }
 0x810   : > { %v5353_v9 = vpop.eup %5352  ;;  %v3268_v30 = vadd.f32 1.0, %v5351_v6  ;;  %v4807_v17 = vpop.f32.mrb[142].mxu1 }
 0x811   : > { %v3267_v35 = vadd.f32 1.0, %v5353_v9  ;;  %v3142_v57 = vadd.f32 %v4807_v17, %v7233_v60  ;;  %v3136_v45 = vpop.f32.mrb[143].mxu1 }
 0x812   : > { %v3137_v58 = vadd.f32 %v3136_v45, %v7233_v60  ;;  %v3300_v8 = vmul.f32 %v3268_v30, %v3172_v28 }
 0x813   : > { %v3208_v49 = vmul.f32 0.70710677, %v3142_v57  ;;  %v3299_v39 = vmul.f32 %v3267_v35, %v3171_v55  ;;  %v3176_v62 = vmul.f32 0.5, %v3142_v57 }
 0x814   : > { %v3207_v26 = vmul.f32 0.70710677, %v3137_v58  ;;  %v3175_v27 = vmul.f32 0.5, %v3137_v58 }
 0x815   : > { %5358 = verf.f32 %v3208_v49  ;;  %4879 = vmatprep.mubr.f32.mxu0 %v3299_v39 }
 0x816   : > { %5360 = verf.f32 %v3207_v26  ;;  %4880 = vmatmul.mubr.f32.gmra.mrb[138].mxu0 %v3300_v8 }
 0x817   : > { %v5355_v42 = vpop.eup %5354 }
 0x818   : > { %v5357_v31 = vpop.eup %5356  ;;  %v3270_v21 = vadd.f32 1.0, %v5355_v42 }
 0x819   : > { %v3269_v14 = vadd.f32 1.0, %v5357_v31 }
 0x81a   : > { %v3302_v18 = vmul.f32 %v3270_v21, %v3174_v22 }
 0x81b   : > { %v3301_v59 = vmul.f32 %v3269_v14, %v3173_v51 }
 0x81d   : > { %4882 = vmatprep.mubr.f32.mxu0 %v3301_v59 }
 0x81e   : > { %4883 = vmatmul.mubr.f32.gmra.mrb[140].mxu0 %v3302_v18 }
 0x81f   : > { %v5359_v16 = vpop.eup %5358 }
 0x820   : > { %v5361_v60 = vpop.eup %5360  ;;  %v3272_v47 = vadd.f32 1.0, %v5359_v16 }
 0x821   : > { %v3271_v41 = vadd.f32 1.0, %v5361_v60 }
 0x822   : > { %v3304_v29 = vmul.f32 %v3272_v47, %v3176_v62 }
 0x823   : > { %v3303_v50 = vmul.f32 %v3271_v41, %v3175_v27 }
 0x825   : > { %4885 = vmatprep.mubr.f32.mxu0 %v3303_v50 }
 0x826   : > { %4886 = vmatmul.mubr.f32.gmra.mrb[142].mxu0 %v3304_v29 }
 0x881   : > { %v4842_v10 = vpop.f32.mrb[112].mxu0 }
 0x882   : > { %v3410_v33 = vadd.f32 %v4842_v10, %v7273_v12  ;;  %v3404_v24 = vpop.f32.mrb[113].mxu0 }
 0x883   : > { %v3405_v48 = vadd.f32 %v3404_v24, %v7273_v12 }
 0x884   : > { %v7280_v52 = vsel %vm3565_vm1, %v3410_v33, -inf }
 0x885   : > { %3600 = vmax.xlane.f32.xlu1 %v7280_v52  ;;  %v7285_v38 = vsel %vm3565_vm1, %v3405_v48, -inf }
 0x886   : > { %3598 = vmax.xlane.f32.xlu0 %v7285_v38 }
 0x889   : > { %v4845_v15 = vpop.f32.mrb[114].mxu0 }
 0x88a   : > { %v3420_v2 = vadd.f32 %v4845_v15, %v7273_v12  ;;  %v3414_v23 = vpop.f32.mrb[115].mxu0 }
 0x88b   : > { %v3415_v1 = vadd.f32 %v3414_v23, %v7273_v12 }
 0x88c   : > { %v7292_v44 = vsel %vm3565_vm1, %v3420_v2, -inf }
 0x88d   : > { %3604 = vmax.xlane.f32.xlu1 %v7292_v44  ;;  %v7297_v36 = vsel %vm3565_vm1, %v3415_v1, -inf }
 0x88e   : > { %3602 = vmax.xlane.f32.xlu0 %v7297_v36 }
 0x891   : > { %v4848_v20 = vpop.f32.mrb[116].mxu0 }
 0x892   : > { %v3430_v63 = vadd.f32 %v4848_v20, %v7273_v12  ;;  %v3424_v13 = vpop.f32.mrb[117].mxu0 }
 0x893   : > { %v3425_v61 = vadd.f32 %v3424_v13, %v7273_v12 }
 0x894   : > { %v7304_v3 = vsel %vm3565_vm1, %v3430_v63, -inf }
 0x895   : > { %3608 = vmax.xlane.f32.xlu1 %v7304_v3  ;;  %v7309_v32 = vsel %vm3565_vm1, %v3425_v61, -inf }
 0x896   : > { %3606 = vmax.xlane.f32.xlu0 %v7309_v32 }
 0x899   : > { %v4851_v25 = vpop.f32.mrb[118].mxu0 }
 0x89a   : > { %v3440_v4 = vadd.f32 %v4851_v25, %v7273_v12  ;;  %v3434_v0 = vpop.f32.mrb[119].mxu0 }
 0x89b   : > { %v3435_v5 = vadd.f32 %v3434_v0, %v7273_v12 }
 0x89c   : > { %v7316_v19 = vsel %vm3565_vm1, %v3440_v4, -inf }
 0x89d   : > { %3612 = vmax.xlane.f32.xlu1 %v7316_v19  ;;  %v7321_v7 = vsel %vm3565_vm1, %v3435_v5, -inf }
 0x89e   : > { %3610 = vmax.xlane.f32.xlu0 %v7321_v7 }
 0x8a1   : > { %v4854_v37 = vpop.f32.mrb[120].mxu0 }
 0x8a2   : > { %v3450_v40 = vadd.f32 %v4854_v37, %v7273_v12  ;;  %v3444_v43 = vpop.f32.mrb[121].mxu0 }
 0x8a3   : > { %v3445_v53 = vadd.f32 %v3444_v43, %v7273_v12 }
 0x8a4   : > { %v7328_v11 = vsel %vm3565_vm1, %v3450_v40, -inf }
 0x8a5   : > { %3616 = vmax.xlane.f32.xlu1 %v7328_v11  ;;  %v7333_v46 = vsel %vm3565_vm1, %v3445_v53, -inf }
 0x8a6   : > { %3614 = vmax.xlane.f32.xlu0 %v7333_v46 }
 0x8a9   : > { %v4857_v34 = vpop.f32.mrb[122].mxu0 }
 0x8aa   : > { %v3460_v56 = vadd.f32 %v4857_v34, %v7273_v12  ;;  %v3454_v6 = vpop.f32.mrb[123].mxu0 }
 0x8ab   : > { %v3455_v9 = vadd.f32 %v3454_v6, %v7273_v12 }
 0x8ac   : > { %v7340_v30 = vsel %vm3565_vm1, %v3460_v56, -inf }
 0x8ad   : > { %3620 = vmax.xlane.f32.xlu1 %v7340_v30  ;;  %v7345_v17 = vsel %vm3565_vm1, %v3455_v9, -inf }
 0x8ae   : > { %3618 = vmax.xlane.f32.xlu0 %v7345_v17 }
 0x8b1   : > { %v4860_v55 = vpop.f32.mrb[124].mxu0 }
 0x8b2   : > { %v3470_v35 = vadd.f32 %v4860_v55, %v7273_v12  ;;  %v3464_v57 = vpop.f32.mrb[125].mxu0 }
 0x8b3   : > { %v3465_v45 = vadd.f32 %v3464_v57, %v7273_v12 }
 0x8b4   : > { %v7352_v28 = vsel %vm3565_vm1, %v3470_v35, -inf }
 0x8b5   : > { %3624 = vmax.xlane.f32.xlu1 %v7352_v28  ;;  %v7357_v58 = vsel %vm3565_vm1, %v3465_v45, -inf }
 0x8b6   : > { %3622 = vmax.xlane.f32.xlu0 %v7357_v58 }
 0x8b9   : > { %v4863_v49 = vpop.f32.mrb[126].mxu0 }
 0x8ba   : > { %v3480_v39 = vadd.f32 %v4863_v49, %v7273_v12  ;;  %v3474_v26 = vpop.f32.mrb[127].mxu0 }
 0x8bb   : > { %v3475_v8 = vadd.f32 %v3474_v26, %v7273_v12 }
 0x8bc   : > { %v7364_v42 = vsel %vm3565_vm1, %v3480_v39, -inf }
 0x8bd   : > { %3628 = vmax.xlane.f32.xlu1 %v7364_v42  ;;  %v7369_v31 = vsel %vm3565_vm1, %v3475_v8, -inf }
 0x8be   : > { %3626 = vmax.xlane.f32.xlu0 %v7369_v31 }
 0x8c1   : > { %v4866_v21 = vpop.f32.mrb[128].mxu0 }
 0x8c2   : > { %v3490_v51 = vadd.f32 %v4866_v21, %v7273_v12  ;;  %v3484_v14 = vpop.f32.mrb[129].mxu0 }
 0x8c3   : > { %v3485_v22 = vadd.f32 %v3484_v14, %v7273_v12 }
 0x8c4   : > { %v7376_v59 = vsel %vm3565_vm1, %v3490_v51, -inf }
 0x8c5   : > { %3632 = vmax.xlane.f32.xlu1 %v7376_v59  ;;  %v7381_v18 = vsel %vm3565_vm1, %v3485_v22, -inf }
 0x8c6   : > { %3630 = vmax.xlane.f32.xlu0 %v7381_v18 }
 0x8c9   : > { %v4869_v16 = vpop.f32.mrb[130].mxu0 }
 0x8ca   : > { %v3500_v60 = vadd.f32 %v4869_v16, %v7273_v12  ;;  %v3494_v47 = vpop.f32.mrb[131].mxu0 }
 0x8cb   : > { %v3495_v27 = vadd.f32 %v3494_v47, %v7273_v12 }
 0x8cc   : > { %v7388_v41 = vsel %vm3565_vm1, %v3500_v60, -inf }
 0x8cd   : > { %3636 = vmax.xlane.f32.xlu1 %v7388_v41  ;;  %v7393_v62 = vsel %vm3565_vm1, %v3495_v27, -inf }
 0x8ce   : > { %3634 = vmax.xlane.f32.xlu0 %v7393_v62 }
 0x8d1   : > { %v4872_v50 = vpop.f32.mrb[132].mxu0 }
 0x8d2   : > { %v3510_v29 = vadd.f32 %v4872_v50, %v7273_v12  ;;  %v3504_v10 = vpop.f32.mrb[133].mxu0 }
 0x8d3   : > { %v3505_v33 = vadd.f32 %v3504_v10, %v7273_v12 }
 0x8d4   : > { %v7400_v24 = vsel %vm3565_vm1, %v3510_v29, -inf }
 0x8d5   : > { %3640 = vmax.xlane.f32.xlu1 %v7400_v24  ;;  %v7405_v48 = vsel %vm3565_vm1, %v3505_v33, -inf }
 0x8d6   : > { %3638 = vmax.xlane.f32.xlu0 %v7405_v48 }
 0x8d9   : > { %v4875_v15 = vpop.f32.mrb[134].mxu0 }
 0x8da   : > { %v3520_v2 = vadd.f32 %v4875_v15, %v7273_v12  ;;  %v3514_v23 = vpop.f32.mrb[135].mxu0 }
 0x8db   : > { %v3515_v1 = vadd.f32 %v3514_v23, %v7273_v12 }
 0x8dc   : > { %v7412_v20 = vsel %vm3565_vm1, %v3520_v2, -inf }
 0x8dd   : > { %3644 = vmax.xlane.f32.xlu1 %v7412_v20  ;;  %v7417_v63 = vsel %vm3565_vm1, %v3515_v1, -inf }
 0x8de   : > { %3642 = vmax.xlane.f32.xlu0 %v7417_v63 }
 0x8e1   : > { %v4878_v13 = vpop.f32.mrb[136].mxu0 }
 0x8e2   : > { %v3530_v61 = vadd.f32 %v4878_v13, %v7273_v12  ;;  %v3524_v25 = vpop.f32.mrb[137].mxu0 }
 0x8e3   : > { %v3525_v4 = vadd.f32 %v3524_v25, %v7273_v12 }
 0x8e4   : > { %v7424_v0 = vsel %vm3565_vm1, %v3530_v61, -inf }
 0x8e5   : > { %3648 = vmax.xlane.f32.xlu1 %v7424_v0  ;;  %v7429_v5 = vsel %vm3565_vm1, %v3525_v4, -inf }
 0x8e6   : > { %3646 = vmax.xlane.f32.xlu0 %v7429_v5 }
 0x8e9   : > { %v4881_v37 = vpop.f32.mrb[138].mxu0 }
 0x8ea   : > { %v3540_v40 = vadd.f32 %v4881_v37, %v7273_v12  ;;  %v3534_v43 = vpop.f32.mrb[139].mxu0 }
 0x8eb   : > { %v3535_v53 = vadd.f32 %v3534_v43, %v7273_v12 }
 0x8ec   : > { %v7436_v34 = vsel %vm3565_vm1, %v3540_v40, -inf }
 0x8ed   : > { %3652 = vmax.xlane.f32.xlu1 %v7436_v34  ;;  %v7441_v56 = vsel %vm3565_vm1, %v3535_v53, -inf }
 0x8ee   : > { %3650 = vmax.xlane.f32.xlu0 %v7441_v56 }
 0x8f1   : > { %v4884_v6 = vpop.f32.mrb[140].mxu0 }
 0x8f2   : > { %v3550_v9 = vadd.f32 %v4884_v6, %v7273_v12  ;;  %v3544_v55 = vpop.f32.mrb[141].mxu0 }
 0x8f3   : > { %v3545_v35 = vadd.f32 %v3544_v55, %v7273_v12 }
 0x8f4   : > { %v7448_v57 = vsel %vm3565_vm1, %v3550_v9, -inf }
 0x8f5   : > { %3656 = vmax.xlane.f32.xlu1 %v7448_v57  ;;  %v7453_v45 = vsel %vm3565_vm1, %v3545_v35, -inf }
 0x8f6   : > { %3654 = vmax.xlane.f32.xlu0 %v7453_v45 }
 0x8f9   : > { %v4887_v49 = vpop.f32.mrb[142].mxu0 }
 0x8fa   : > { %v3560_v39 = vadd.f32 %v4887_v49, %v7273_v12  ;;  %v3554_v26 = vpop.f32.mrb[143].mxu0 }
 0x8fb   : > { %v3555_v8 = vadd.f32 %v3554_v26, %v7273_v12 }
 0x8fc   : > { %v7460_v21 = vsel %vm3565_vm1, %v3560_v39, -inf }
 0x8fd   : > { %3660 = vmax.xlane.f32.xlu1 %v7460_v21  ;;  %v7465_v51 = vsel %vm3565_vm1, %v3555_v8, -inf }
 0x8fe   : > { %3658 = vmax.xlane.f32.xlu0 %v7465_v51 }
 0x912   : > { %v3601_v14 = vpop.xlane.xlu1 %3600 }
 0x913   : > { %v3663_v22 = vsub.f32 %v7280_v52, %v3601_v14  ;;  %v3599_v16 = vpop.xlane.xlu0 %3598 }
 0x914   : > { %v3662_v60 = vsub.f32 %v7285_v38, %v3599_v16 }
 0x915   : > { %v3696_v47 = vmul.f32 1.442695, %v3663_v22 }
 0x916   : > { %v3694_v12 = vmul.f32 1.442695, %v3662_v60 }
 0x917   : > { %5362 = vpow2.f32 %v3696_v47 }
 0x918   : > { %5364 = vpow2.f32 %v3694_v12 }
 0x91a   : > { %v3605_v27 = vpop.xlane.xlu1 %3604 }
 0x91b   : > { %v3665_v50 = vsub.f32 %v7292_v44, %v3605_v27  ;;  %v3603_v29 = vpop.xlane.xlu0 %3602 }
 0x91c   : > { %v3664_v54 = vsub.f32 %v7297_v36, %v3603_v29 }
 0x91d   : > { %v3700_v10 = vmul.f32 1.442695, %v3665_v50 }
 0x91e   : > { %v3698_v33 = vmul.f32 1.442695, %v3664_v54 }
 0x91f   : > { %5366 = vpow2.f32 %v3700_v10 }
 0x920   : > { %5368 = vpow2.f32 %v3698_v33 }
 0x921   : > { %v7472_v15 = vpop.eup %5362 }
 0x922   : > { %v7474_v52 = vpop.eup %5364  ;;  %v3609_v2 = vpop.xlane.xlu1 %3608  ;;  %3760 = vadd.xlane.f32.xlu1 %v7472_v15 }
 0x923   : > { %v3667_v38 = vsub.f32 %v7304_v3, %v3609_v2  ;;  %3758 = vadd.xlane.f32.xlu0 %v7474_v52  ;;  %v3607_v23 = vpop.xlane.xlu0 %3606 }
 0x924   : > { %v3666_v44 = vsub.f32 %v7309_v32, %v3607_v23 }
 0x925   : > { %v3704_v1 = vmul.f32 1.442695, %v3667_v38 }
 0x926   : > { %v3702_v36 = vmul.f32 1.442695, %v3666_v44 }
 0x927   : > { %5370 = vpow2.f32 %v3704_v1 }
 0x928   : > { %5372 = vpow2.f32 %v3702_v36 }
 0x929   : > { %v7480_v13 = vpop.eup %5366 }
 0x92a   : > { %v7482_v61 = vpop.eup %5368  ;;  %3764 = vadd.xlane.f32.xlu1 %v7480_v13  ;;  %v3613_v25 = vpop.xlane.xlu1 %3612 }
 0x92b   : > { %3762 = vadd.xlane.f32.xlu0 %v7482_v61  ;;  %v3669_v3 = vsub.f32 %v7316_v19, %v3613_v25  ;;  %v3611_v4 = vpop.xlane.xlu0 %3610 }
 0x92c   : > { %v3668_v37 = vsub.f32 %v7321_v7, %v3611_v4 }
 0x92d   : > { %v3708_v40 = vmul.f32 1.442695, %v3669_v3 }
 0x92e   : > { %v3706_v32 = vmul.f32 1.442695, %v3668_v37 }
 0x92f   : > { %5374 = vpow2.f32 %v3708_v40 }
 0x930   : > { %5376 = vpow2.f32 %v3706_v32 }
 0x931   : > { %v7488_v43 = vpop.eup %5370 }
 0x932   : > { %v7490_v53 = vpop.eup %5372  ;;  %3768 = vadd.xlane.f32.xlu1 %v7488_v43  ;;  %v3617_v6 = vpop.xlane.xlu1 %3616 }
 0x933   : > { %3766 = vadd.xlane.f32.xlu0 %v7490_v53  ;;  %v3671_v9 = vsub.f32 %v7328_v11, %v3617_v6  ;;  %v3615_v55 = vpop.xlane.xlu0 %3614 }
 0x934   : > { %v3670_v19 = vsub.f32 %v7333_v46, %v3615_v55 }
 0x935   : > { %v3712_v35 = vmul.f32 1.442695, %v3671_v9 }
 0x936   : > { %v3710_v7 = vmul.f32 1.442695, %v3670_v19 }
 0x937   : > { %5378 = vpow2.f32 %v3712_v35 }
 0x938   : > { %5380 = vpow2.f32 %v3710_v7 }
 0x939   : > { %v7496_v49 = vpop.eup %5374 }
 0x93a   : > { %v7498_v39 = vpop.eup %5376  ;;  %3772 = vadd.xlane.f32.xlu1 %v7496_v49  ;;  %v3621_v26 = vpop.xlane.xlu1 %3620 }
 0x93b   : > { %3770 = vadd.xlane.f32.xlu0 %v7498_v39  ;;  %v3673_v8 = vsub.f32 %v7340_v30, %v3621_v26  ;;  %v3619_v14 = vpop.xlane.xlu0 %3618 }
 0x93c   : > { %v3672_v11 = vsub.f32 %v7345_v17, %v3619_v14 }
 0x93d   : > { %v3716_v22 = vmul.f32 1.442695, %v3673_v8 }
 0x93e   : > { %v3714_v46 = vmul.f32 1.442695, %v3672_v11 }
 0x93f   : > { %5382 = vpow2.f32 %v3716_v22 }
 0x940   : > { %5384 = vpow2.f32 %v3714_v46 }
 0x941   : > { %v7504_v16 = vpop.eup %5378 }
 0x942   : > { %v7506_v60 = vpop.eup %5380  ;;  %v3625_v47 = vpop.xlane.xlu1 %3624  ;;  %3776 = vadd.xlane.f32.xlu1 %v7504_v16 }
 0x943   : > { %v3675_v12 = vsub.f32 %v7352_v28, %v3625_v47  ;;  %3774 = vadd.xlane.f32.xlu0 %v7506_v60  ;;  %v3623_v27 = vpop.xlane.xlu0 %3622 }
 0x944   : > { %v3674_v30 = vsub.f32 %v7357_v58, %v3623_v27 }
 0x945   : > { %v3720_v50 = vmul.f32 1.442695, %v3675_v12 }
 0x946   : > { %v3718_v17 = vmul.f32 1.442695, %v3674_v30 }
 0x947   : > { %5386 = vpow2.f32 %v3720_v50 }
 0x948   : > { %5388 = vpow2.f32 %v3718_v17 }
 0x949   : > { %v7512_v29 = vpop.eup %5382 }
 0x94a   : > { %v7514_v54 = vpop.eup %5384  ;;  %v3629_v10 = vpop.xlane.xlu1 %3628  ;;  %3780 = vadd.xlane.f32.xlu1 %v7512_v29 }
 0x94b   : > { %v3677_v33 = vsub.f32 %v7364_v42, %v3629_v10  ;;  %3778 = vadd.xlane.f32.xlu0 %v7514_v54  ;;  %v3627_v28 = vpop.xlane.xlu0 %3626 }
 0x94c   : > { %v3676_v2 = vsub.f32 %v7369_v31, %v3627_v28 }
 0x94d   : > { %v3724_v38 = vmul.f32 1.442695, %v3677_v33 }
 0x94e   : > { %v3722_v58 = vmul.f32 1.442695, %v3676_v2 }
 0x94f   : > { %5390 = vpow2.f32 %v3724_v38 }
 0x950   : > { %5392 = vpow2.f32 %v3722_v58 }
 0x951   : > { %v7520_v23 = vpop.eup %5386 }
 0x952   : > { %v7522_v44 = vpop.eup %5388  ;;  %v3633_v1 = vpop.xlane.xlu1 %3632  ;;  %3784 = vadd.xlane.f32.xlu1 %v7520_v23 }
 0x953   : > { %v3679_v36 = vsub.f32 %v7376_v59, %v3633_v1  ;;  %3782 = vadd.xlane.f32.xlu0 %v7522_v44  ;;  %v3631_v42 = vpop.xlane.xlu0 %3630 }
 0x954   : > { %v3678_v25 = vsub.f32 %v7381_v18, %v3631_v42 }
 0x955   : > { %v3728_v3 = vmul.f32 1.442695, %v3679_v36 }
 0x956   : > { %v3726_v31 = vmul.f32 1.442695, %v3678_v25 }
 0x957   : > { %5394 = vpow2.f32 %v3728_v3 }
 0x958   : > { %5396 = vpow2.f32 %v3726_v31 }
 0x959   : > { %v7528_v4 = vpop.eup %5390 }
 0x95a   : > { %v7530_v37 = vpop.eup %5392  ;;  %v3637_v40 = vpop.xlane.xlu1 %3636  ;;  %3788 = vadd.xlane.f32.xlu1 %v7528_v4 }
 0x95b   : > { %v3681_v32 = vsub.f32 %v7388_v41, %v3637_v40  ;;  %3786 = vadd.xlane.f32.xlu0 %v7530_v37  ;;  %v3635_v59 = vpop.xlane.xlu0 %3634 }
 0x95c   : > { %v3680_v6 = vsub.f32 %v7393_v62, %v3635_v59 }
 0x95d   : > { %v3732_v9 = vmul.f32 1.442695, %v3681_v32 }
 0x95e   : > { %v3730_v18 = vmul.f32 1.442695, %v3680_v6 }
 0x95f   : > { %5398 = vpow2.f32 %v3732_v9 }
 0x960   : > { %5400 = vpow2.f32 %v3730_v18 }
 0x961   : > { %v7536_v55 = vpop.eup %5394 }
 0x962   : > { %v7538_v19 = vpop.eup %5396  ;;  %v3641_v35 = vpop.xlane.xlu1 %3640  ;;  %3792 = vadd.xlane.f32.xlu1 %v7536_v55 }
 0x963   : > { %v3683_v7 = vsub.f32 %v7400_v24, %v3641_v35  ;;  %3790 = vadd.xlane.f32.xlu0 %v7538_v19  ;;  %v3639_v41 = vpop.xlane.xlu0 %3638 }
 0x964   : > { %v3682_v26 = vsub.f32 %v7405_v48, %v3639_v41 }
 0x965   : > { %v3736_v8 = vmul.f32 1.442695, %v3683_v7 }
 0x966   : > { %v3734_v62 = vmul.f32 1.442695, %v3682_v26 }
 0x967   : > { %5402 = vpow2.f32 %v3736_v8 }
 0x968   : > { %5404 = vpow2.f32 %v3734_v62 }
 0x969   : > { %v7544_v14 = vpop.eup %5398 }
 0x96a   : > { %v7546_v11 = vpop.eup %5400  ;;  %v3645_v22 = vpop.xlane.xlu1 %3644  ;;  %3796 = vadd.xlane.f32.xlu1 %v7544_v14 }
 0x96b   : > { %v3685_v46 = vsub.f32 %v7412_v20, %v3645_v22  ;;  %3794 = vadd.xlane.f32.xlu0 %v7546_v11  ;;  %v3643_v24 = vpop.xlane.xlu0 %3642 }
 0x96c   : > { %v3684_v47 = vsub.f32 %v7417_v63, %v3643_v24 }
 0x96d   : > { %v3740_v12 = vmul.f32 1.442695, %v3685_v46 }
 0x96e   : > { %v3738_v48 = vmul.f32 1.442695, %v3684_v47 }
 0x96f   : > { %5406 = vpow2.f32 %v3740_v12 }
 0x970   : > { %5408 = vpow2.f32 %v3738_v48 }
 0x971   : > { %v7552_v27 = vpop.eup %5402 }
 0x972   : > { %v7554_v30 = vpop.eup %5404  ;;  %v3649_v50 = vpop.xlane.xlu1 %3648  ;;  %3800 = vadd.xlane.f32.xlu1 %v7552_v27 }
 0x973   : > { %v3687_v17 = vsub.f32 %v7424_v0, %v3649_v50  ;;  %3798 = vadd.xlane.f32.xlu0 %v7554_v30  ;;  %v3647_v20 = vpop.xlane.xlu0 %3646 }
 0x974   : > { %v3686_v10 = vsub.f32 %v7429_v5, %v3647_v20 }
 0x975   : > { %v3744_v33 = vmul.f32 1.442695, %v3687_v17 }
 0x976   : > { %v3742_v63 = vmul.f32 1.442695, %v3686_v10 }
 0x977   : > { %5410 = vpow2.f32 %v3744_v33 }
 0x978   : > { %5412 = vpow2.f32 %v3742_v63 }
 0x979   : > { %v7560_v28 = vpop.eup %5406 }
 0x97a   : > { %v7562_v2 = vpop.eup %5408  ;;  %v3653_v38 = vpop.xlane.xlu1 %3652  ;;  %3804 = vadd.xlane.f32.xlu1 %v7560_v28 }
 0x97b   : > { %v3689_v58 = vsub.f32 %v7436_v34, %v3653_v38  ;;  %3802 = vadd.xlane.f32.xlu0 %v7562_v2  ;;  %v3651_v0 = vpop.xlane.xlu0 %3650 }
 0x97c   : > { %v3688_v1 = vsub.f32 %v7441_v56, %v3651_v0 }
 0x97d   : > { %v3748_v36 = vmul.f32 1.442695, %v3689_v58 }
 0x97e   : > { %v3746_v5 = vmul.f32 1.442695, %v3688_v1 }
 0x97f   : > { %5414 = vpow2.f32 %v3748_v36 }
 0x980   : > { %5416 = vpow2.f32 %v3746_v5 }
 0x981   : > { %v7568_v42 = vpop.eup %5410 }
 0x982   : > { %v7570_v25 = vpop.eup %5412  ;;  %v3657_v3 = vpop.xlane.xlu1 %3656  ;;  %3808 = vadd.xlane.f32.xlu1 %v7568_v42 }
 0x983   : > { %v3691_v31 = vsub.f32 %v7448_v57, %v3657_v3  ;;  %3806 = vadd.xlane.f32.xlu0 %v7570_v25  ;;  %v3655_v34 = vpop.xlane.xlu0 %3654 }
 0x984   : > { %v3690_v40 = vsub.f32 %v7453_v45, %v3655_v34 }
 0x985   : > { %v3752_v32 = vmul.f32 1.442695, %v3691_v31 }
 0x986   : > { %v3750_v56 = vmul.f32 1.442695, %v3690_v40 }
 0x987   : > { %5418 = vpow2.f32 %v3752_v32 }
 0x988   : > { %5420 = vpow2.f32 %v3750_v56 }
 0x989   : > { %v7576_v59 = vpop.eup %5414 }
 0x98a   : > { %v7578_v6 = vpop.eup %5416  ;;  %3812 = vadd.xlane.f32.xlu1 %v7576_v59  ;;  %v3661_v9 = vpop.xlane.xlu1 %3660 }
 0x98b   : > { %v3693_v18 = vsub.f32 %v7460_v21, %v3661_v9  ;;  %3810 = vadd.xlane.f32.xlu0 %v7578_v6  ;;  %v3659_v57 = vpop.xlane.xlu0 %3658 }
 0x98c   : > { %v3692_v35 = vsub.f32 %v7465_v51, %v3659_v57 }
 0x98d   : > { %v3756_v7 = vmul.f32 1.442695, %v3693_v18 }
 0x98e   : > { %v3754_v45 = vmul.f32 1.442695, %v3692_v35 }
 0x98f   : > { %5422 = vpow2.f32 %v3756_v7 }
 0x990   : > { %5424 = vpow2.f32 %v3754_v45 }
 0x991   : > { %v7584_v41 = vpop.eup %5418 }
 0x992   : > { %v7586_v26 = vpop.eup %5420  ;;  %3816 = vadd.xlane.f32.xlu1 %v7584_v41 }
 0x993   : > { %3814 = vadd.xlane.f32.xlu0 %v7586_v26 }
 0x999   : > { %v7590_v8 = vpop.eup %5422 }
 0x99a   : > { %v7592_v21 = vpop.eup %5424  ;;  %3820 = vadd.xlane.f32.xlu1 %v7590_v8 }
 0x99b   : > { %3818 = vadd.xlane.f32.xlu0 %v7592_v21 }
 0x9af   : > { %v3761_v51 = vpop.xlane.xlu1 %3760 }
 0x9b0   : > { %5426 = vrcp.f32 %v3761_v51  ;;  %v3759_v62 = vpop.xlane.xlu0 %3758 }
 0x9b1   : > { %5428 = vrcp.f32 %v3759_v62 }
 0x9b7   : > { %v3765_v22 = vpop.xlane.xlu1 %3764 }
 0x9b8   : > { %5430 = vrcp.f32 %v3765_v22  ;;  %v3763_v46 = vpop.xlane.xlu0 %3762 }
 0x9b9   : > { %5432 = vrcp.f32 %v3763_v46 }
 0x9ba   : > { %v5427_v24 = vpop.eup %5426 }
 0x9bb   : > { %v5429_v47 = vpop.eup %5428  ;;  %v3825_v12 = vmul.f32 %v5427_v24, %v7472_v15 }
 0x9bc   : > { %v3823_v48 = vmul.f32 %v5429_v47, %v7474_v52 }
 0x9bd   : > { %3887 = vst [vmem:[%s7601_s23 + $0x8] sm:$0xff] %v3825_v12 }
 0x9be   : > { %3886 = vst [vmem:[%s7601_s23] sm:$0xff] %v3823_v48 }
 0x9bf   : > { %v3769_v50 = vpop.xlane.xlu1 %3768 }
 0x9c0   : > { %5434 = vrcp.f32 %v3769_v50  ;;  %v3767_v17 = vpop.xlane.xlu0 %3766 }
 0x9c1   : > { %5436 = vrcp.f32 %v3767_v17 }
 0x9c2   : > { %v5431_v20 = vpop.eup %5430 }
 0x9c3   : > { %v5433_v10 = vpop.eup %5432  ;;  %v3829_v33 = vmul.f32 %v5431_v20, %v7480_v13 }
 0x9c4   : > { %v3827_v63 = vmul.f32 %v5433_v10, %v7482_v61 }
 0x9c5   : > { %3889 = vst [vmem:[%s7601_s23 + $0x18] sm:$0xff] %v3829_v33 }
 0x9c6   : > { %3888 = vst [vmem:[%s7601_s23 + $0x10] sm:$0xff] %v3827_v63 }
 0x9c7   : > { %v3773_v38 = vpop.xlane.xlu1 %3772 }
 0x9c8   : > { %5438 = vrcp.f32 %v3773_v38  ;;  %v3771_v15 = vpop.xlane.xlu0 %3770 }
 0x9c9   : > { %5440 = vrcp.f32 %v3771_v15 }
 0x9ca   : > { %v5435_v52 = vpop.eup %5434 }
 0x9cb   : > { %v5437_v58 = vpop.eup %5436  ;;  %v3833_v0 = vmul.f32 %v5435_v52, %v7488_v43 }
 0x9cc   : > { %v3831_v1 = vmul.f32 %v5437_v58, %v7490_v53 }
 0x9cd   : > { %3891 = vst [vmem:[%s7601_s23 + $0x28] sm:$0xff] %v3833_v0 }
 0x9ce   : > { %3890 = vst [vmem:[%s7601_s23 + $0x20] sm:$0xff] %v3831_v1 }
 0x9cf   : > { %v3777_v36 = vpop.xlane.xlu1 %3776 }
 0x9d0   : > { %5442 = vrcp.f32 %v3777_v36  ;;  %v3775_v13 = vpop.xlane.xlu0 %3774 }
 0x9d1   : > { %5444 = vrcp.f32 %v3775_v13 }
 0x9d2   : > { %v5439_v61 = vpop.eup %5438 }
 0x9d3   : > { %v5441_v5 = vpop.eup %5440  ;;  %v3837_v3 = vmul.f32 %v5439_v61, %v7496_v49 }
 0x9d4   : > { %v3835_v31 = vmul.f32 %v5441_v5, %v7498_v39 }
 0x9d5   : > { %3893 = vst [vmem:[%s7601_s23 + $0x38] sm:$0xff] %v3837_v3 }
 0x9d6   : > { %3892 = vst [vmem:[%s7601_s23 + $0x30] sm:$0xff] %v3835_v31 }
 0x9d7   : > { %v3781_v34 = vpop.xlane.xlu1 %3780 }
 0x9d8   : > { %5446 = vrcp.f32 %v3781_v34  ;;  %v3779_v43 = vpop.xlane.xlu0 %3778 }
 0x9d9   : > { %5448 = vrcp.f32 %v3779_v43 }
 0x9da   : > { %v5443_v53 = vpop.eup %5442 }
 0x9db   : > { %v5445_v40 = vpop.eup %5444  ;;  %v3841_v32 = vmul.f32 %v5443_v53, %v7504_v16 }
 0x9dc   : > { %v3839_v56 = vmul.f32 %v5445_v40, %v7506_v60 }
 0x9dd   : > { %3895 = vst [vmem:[%s7601_s23 + $0x48] sm:$0xff] %v3841_v32 }
 0x9de   : > { %3894 = vst [vmem:[%s7601_s23 + $0x40] sm:$0xff] %v3839_v56 }
 0x9df   : > { %v3785_v9 = vpop.xlane.xlu1 %3784 }
 0x9e0   : > { %5450 = vrcp.f32 %v3785_v9  ;;  %v3783_v49 = vpop.xlane.xlu0 %3782 }
 0x9e1   : > { %5452 = vrcp.f32 %v3783_v49 }
 0x9e2   : > { %v5447_v39 = vpop.eup %5446 }
 0x9e3   : > { %v5449_v18 = vpop.eup %5448  ;;  %v3845_v57 = vmul.f32 %v5447_v39, %v7512_v29 }
 0x9e4   : > { %v3843_v35 = vmul.f32 %v5449_v18, %v7514_v54 }
 0x9e5   : > { %3897 = vst [vmem:[%s7601_s23 + $0x58] sm:$0xff] %v3845_v57 }
 0x9e6   : > { %3896 = vst [vmem:[%s7601_s23 + $0x50] sm:$0xff] %v3843_v35 }
 0x9e7   : > { %v3789_v7 = vpop.xlane.xlu1 %3788 }
 0x9e8   : > { %5454 = vrcp.f32 %v3789_v7  ;;  %v3787_v16 = vpop.xlane.xlu0 %3786 }
 0x9e9   : > { %5456 = vrcp.f32 %v3787_v16 }
 0x9ea   : > { %v5451_v60 = vpop.eup %5450 }
 0x9eb   : > { %v5453_v45 = vpop.eup %5452  ;;  %v3849_v51 = vmul.f32 %v5451_v60, %v7520_v23 }
 0x9ec   : > { %v3847_v62 = vmul.f32 %v5453_v45, %v7522_v44 }
 0x9ed   : > { %3899 = vst [vmem:[%s7601_s23 + $0x68] sm:$0xff] %v3849_v51 }
 0x9ee   : > { %3898 = vst [vmem:[%s7601_s23 + $0x60] sm:$0xff] %v3847_v62 }
 0x9ef   : > { %v3793_v22 = vpop.xlane.xlu1 %3792 }
 0x9f0   : > { %5458 = vrcp.f32 %v3793_v22  ;;  %v3791_v29 = vpop.xlane.xlu0 %3790 }
 0x9f1   : > { %5460 = vrcp.f32 %v3791_v29 }
 0x9f2   : > { %v5455_v54 = vpop.eup %5454 }
 0x9f3   : > { %v5457_v46 = vpop.eup %5456  ;;  %v3853_v24 = vmul.f32 %v5455_v54, %v7528_v4 }
 0x9f4   : > { %v3851_v47 = vmul.f32 %v5457_v46, %v7530_v37 }
 0x9f5   : > { %3901 = vst [vmem:[%s7601_s23 + $0x78] sm:$0xff] %v3853_v24 }
 0x9f6   : > { %3900 = vst [vmem:[%s7601_s23 + $0x70] sm:$0xff] %v3851_v47 }
 0x9f7   : > { %v3797_v12 = vpop.xlane.xlu1 %3796 }
 0x9f8   : > { %5462 = vrcp.f32 %v3797_v12  ;;  %v3795_v23 = vpop.xlane.xlu0 %3794 }
 0x9f9   : > { %5464 = vrcp.f32 %v3795_v23 }
 0x9fa   : > { %v5459_v44 = vpop.eup %5458 }
 0x9fb   : > { %v5461_v48 = vpop.eup %5460  ;;  %v3857_v50 = vmul.f32 %v5459_v44, %v7536_v55 }
 0x9fc   : > { %v3855_v17 = vmul.f32 %v5461_v48, %v7538_v19 }
 0x9fd   : > { %3903 = vst [vmem:[%s7601_s23 + $0x88] sm:$0xff] %v3857_v50 }
 0x9fe   : > { %3902 = vst [vmem:[%s7601_s23 + $0x80] sm:$0xff] %v3855_v17 }
 0x9ff   : > { %v3801_v20 = vpop.xlane.xlu1 %3800 }
 0xa00   : > { %5466 = vrcp.f32 %v3801_v20  ;;  %v3799_v4 = vpop.xlane.xlu0 %3798 }
 0xa01   : > { %5468 = vrcp.f32 %v3799_v4 }
 0xa02   : > { %v5463_v37 = vpop.eup %5462 }
 0xa03   : > { %v5465_v10 = vpop.eup %5464  ;;  %v3861_v33 = vmul.f32 %v5463_v37, %v7544_v14 }
 0xa04   : > { %v3859_v63 = vmul.f32 %v5465_v10, %v7546_v11 }
 0xa05   : > { %3905 = vst [vmem:[%s7601_s23 + $0x98] sm:$0xff] %v3861_v33 }
 0xa06   : > { %3904 = vst [vmem:[%s7601_s23 + $0x90] sm:$0xff] %v3859_v63 }
 0xa07   : > { %v3805_v38 = vpop.xlane.xlu1 %3804 }
 0xa08   : > { %5470 = vrcp.f32 %v3805_v38  ;;  %v3803_v55 = vpop.xlane.xlu0 %3802 }
 0xa09   : > { %5472 = vrcp.f32 %v3803_v55 }
 0xa0a   : > { %v5467_v19 = vpop.eup %5466 }
 0xa0b   : > { %v5469_v15 = vpop.eup %5468  ;;  %v3865_v52 = vmul.f32 %v5467_v19, %v7552_v27 }
 0xa0c   : > { %v3863_v58 = vmul.f32 %v5469_v15, %v7554_v30 }
 0xa0d   : > { %3907 = vst [vmem:[%s7601_s23 + $0xa8] sm:$0xff] %v3865_v52 }
 0xa0e   : > { %3906 = vst [vmem:[%s7601_s23 + $0xa0] sm:$0xff] %v3863_v58 }
 0xa0f   : > { %v3809_v0 = vpop.xlane.xlu1 %3808 }
 0xa10   : > { %5474 = vrcp.f32 %v3809_v0  ;;  %v3807_v14 = vpop.xlane.xlu0 %3806 }
 0xa11   : > { %5476 = vrcp.f32 %v3807_v14 }
 0xa12   : > { %v5471_v11 = vpop.eup %5470 }
 0xa13   : > { %v5473_v1 = vpop.eup %5472  ;;  %v3869_v36 = vmul.f32 %v5471_v11, %v7560_v28 }
 0xa14   : > { %v3867_v13 = vmul.f32 %v5473_v1, %v7562_v2 }
 0xa15   : > { %3909 = vst [vmem:[%s7601_s23 + $0xb8] sm:$0xff] %v3869_v36 }
 0xa16   : > { %3908 = vst [vmem:[%s7601_s23 + $0xb0] sm:$0xff] %v3867_v13 }
 0xa17   : > { %v3813_v61 = vpop.xlane.xlu1 %3812 }
 0xa18   : > { %5478 = vrcp.f32 %v3813_v61  ;;  %v3811_v27 = vpop.xlane.xlu0 %3810 }
 0xa19   : > { %5480 = vrcp.f32 %v3811_v27 }
 0xa1a   : > { %v5475_v30 = vpop.eup %5474 }
 0xa1b   : > { %v5477_v5 = vpop.eup %5476  ;;  %v3873_v3 = vmul.f32 %v5475_v30, %v7568_v42 }
 0xa1c   : > { %v3871_v31 = vmul.f32 %v5477_v5, %v7570_v25 }
 0xa1d   : > { %3911 = vst [vmem:[%s7601_s23 + $0xc8] sm:$0xff] %v3873_v3 }
 0xa1e   : > { %3910 = vst [vmem:[%s7601_s23 + $0xc0] sm:$0xff] %v3871_v31 }
 0xa1f   : > { %v3817_v34 = vpop.xlane.xlu1 %3816 }
 0xa20   : > { %5482 = vrcp.f32 %v3817_v34  ;;  %v3815_v28 = vpop.xlane.xlu0 %3814 }
 0xa21   : > { %5484 = vrcp.f32 %v3815_v28 }
 0xa22   : > { %v5479_v2 = vpop.eup %5478 }
 0xa23   : > { %v5481_v43 = vpop.eup %5480  ;;  %v3877_v53 = vmul.f32 %v5479_v2, %v7576_v59 }
 0xa24   : > { %v3875_v40 = vmul.f32 %v5481_v43, %v7578_v6 }
 0xa25   : > { %3913 = vst [vmem:[%s7601_s23 + $0xd8] sm:$0xff] %v3877_v53 }
 0xa26   : > { %3912 = vst [vmem:[%s7601_s23 + $0xd0] sm:$0xff] %v3875_v40 }
 0xa27   : > { %v3821_v42 = vpop.xlane.xlu1 %3820 }
 0xa28   : > { %5486 = vrcp.f32 %v3821_v42  ;;  %v3819_v25 = vpop.xlane.xlu0 %3818 }
 0xa29   : > { %5488 = vrcp.f32 %v3819_v25 }
 0xa2a   : > { %v5483_v32 = vpop.eup %5482 }
 0xa2b   : > { %v5485_v56 = vpop.eup %5484  ;;  %v3881_v9 = vmul.f32 %v5483_v32, %v7584_v41 }
 0xa2c   : > { %v3879_v49 = vmul.f32 %v5485_v56, %v7586_v26 }
 0xa2d   : > { %3915 = vst [vmem:[%s7601_s23 + $0xe8] sm:$0xff] %v3881_v9 }
 0xa2e   : > { %3914 = vst [vmem:[%s7601_s23 + $0xe0] sm:$0xff] %v3879_v49 }
 0xa32   : > { %v5487_v39 = vpop.eup %5486 }
 0xa33   : > { %v5489_v59 = vpop.eup %5488  ;;  %v3885_v6 = vmul.f32 %v5487_v39, %v7590_v8 }
 0xa34   : > { %v3883_v18 = vmul.f32 %v5489_v59, %v7592_v21 }
 0xa35   : > { %3917 = vst [vmem:[%s7601_s23 + $0xf8] sm:$0xff] %v3885_v6 }
 0xa36   : > { %3916 = vst [vmem:[%s7601_s23 + $0xf0] sm:$0xff] %v3883_v18 }
 0xa37 PF: > { %s20_s13 = sadd.s32 1, %s5496_s13  }
 0xa38   : > { %p17_p4 = scmp.ge.s32.totalorder %s20_s13, 4  }
 0xa3a   :  { %19 = sbr.rel (!%p17_p4) target bundleno = 1 (0x1), region = 91 }

</bundles_post_ra>
